<compile_context>
chip_gen: v6e
topology: v6e:2x2x1
jax: 0.10.0
libtpu: 0.0.40
codegen_flags: <defaults>
</compile_context>

<pallas_src>
import jax
import jax.numpy as jnp
from jax import lax
from jax.experimental import pallas as pl
from jax.experimental.pallas import tpu as pltpu

latent_space = 64  # module default hid_dim
_LANE = 128


def _round_up(x, m):
    return ((x + m - 1) // m) * m


def _pick_chunk(T, max_chunk=256):
    if T <= max_chunk:
        return T
    for tc in range(max_chunk, 0, -1):
        if T % tc == 0:
            return tc
    return T


def prepare_params(params):
    """One-time weight prep (hoisted out of the rollout path).

    Produces lane-aligned, bias-folded, zero-padded weights:
      w_x   : (Kp, 4*Hp)  rows = [act | obs | 1(bias) | 0-pad], each gate padded to 128 cols
      w_h   : (Hp, 4*Hp)
      w_head: (Hp, Hd)    cols = [mu | logsigma | 0-pad]
      b_head: (1, Hd)
    """
    w_ih = jnp.asarray(params["w_ih"], jnp.float32)
    w_hh = jnp.asarray(params["w_hh"], jnp.float32)
    b_gate = jnp.asarray(params["b_ih"] + params["b_hh"], jnp.float32)
    w_mu = jnp.asarray(params["w_mu"], jnp.float32)
    w_ls = jnp.asarray(params["w_ls"], jnp.float32)

    four_h, K = w_ih.shape
    H = four_h // 4
    O = w_mu.shape[0]
    Hp = _round_up(H, _LANE)
    Kp = _round_up(K + 1, _LANE)      # +1 lane carries the constant-1 bias input
    Hd = _round_up(2 * O, _LANE)

    w_x = jnp.zeros((Kp, 4 * Hp), jnp.float32)
    w_h = jnp.zeros((Hp, 4 * Hp), jnp.float32)
    for g in range(4):
        w_x = w_x.at[0:K, g * Hp:g * Hp + H].set(w_ih[g * H:(g + 1) * H, :].T)
        w_x = w_x.at[K, g * Hp:g * Hp + H].set(b_gate[g * H:(g + 1) * H])
        w_h = w_h.at[0:H, g * Hp:g * Hp + H].set(w_hh[g * H:(g + 1) * H, :].T)

    w_head = jnp.zeros((Hp, Hd), jnp.float32)
    w_head = w_head.at[0:H, 0:O].set(w_mu.T)
    w_head = w_head.at[0:H, O:2 * O].set(w_ls.T)
    b_head = jnp.zeros((1, Hd), jnp.float32)
    b_head = b_head.at[0, 0:O].set(jnp.asarray(params["b_mu"], jnp.float32))
    b_head = b_head.at[0, O:2 * O].set(jnp.asarray(params["b_ls"], jnp.float32))

    return {"w_x": w_x, "w_h": w_h, "w_head": w_head, "b_head": b_head,
            "dims": {"K": K, "H": H, "O": O, "Hp": Hp, "Kp": Kp, "Hd": Hd}}


def _make_kernel(B, TC, Hp, Hd, O, unroll):
    def kernel(x_ref, h0_ref, c0_ref, wx_ref, wh_ref, whd_ref, bhd_ref,
               head_ref, h_out_ref, c_out_ref, h_s, c_s):
        ch = pl.program_id(1)

        # Load initial carry into VMEM scratch at the first chunk of each rollout.
        @pl.when(ch == 0)
        def _():
            h_s[...] = h0_ref[0]
            c_s[...] = c0_ref[0]

        # Loop-invariant values hoisted out of the time loop (no per-step broadcast).
        bhd = jnp.broadcast_to(bhd_ref[...], (B, Hd))
        col = lax.broadcasted_iota(jnp.int32, (B, Hd), 1)
        is_mu = col < O

        def step(t, carry):
            h, c = carry
            x_t = x_ref[0, t]                                     # (B, Kp), lane-dense
            # Gate bias is folded into W_x via the constant-1 input lane.
            gates = (jnp.dot(x_t, wx_ref[...], preferred_element_type=jnp.float32)
                     + jnp.dot(h, wh_ref[...], preferred_element_type=jnp.float32))
            i_g = jax.nn.sigmoid(gates[:, 0 * Hp:1 * Hp])          # 128-lane aligned
            f_g = jax.nn.sigmoid(gates[:, 1 * Hp:2 * Hp])
            g_g = jnp.tanh(gates[:, 2 * Hp:3 * Hp])
            o_g = jax.nn.sigmoid(gates[:, 3 * Hp:4 * Hp])
            c_new = f_g * c + i_g * g_g                            # padded lanes stay 0
            h_new = o_g * jnp.tanh(c_new)
            head = (jnp.dot(h_new, whd_ref[...], preferred_element_type=jnp.float32)
                    + bhd)
            head_ref[0, t] = jnp.where(is_mu, head, jnp.exp(head))  # [mu | sigma | pad]
            return h_new, c_new

        carry0 = (h_s[...], c_s[...])
        if TC <= 16:
            h_fin, c_fin = carry0
            for t in range(TC):                                    # full static unroll
                h_fin, c_fin = step(t, (h_fin, c_fin))
        else:
            h_fin, c_fin = lax.fori_loop(0, TC, step, carry0, unroll=unroll)

        # Carry across chunks.
        h_s[...] = h_fin
        c_s[...] = c_fin

        # Final carry written back only once, at the last chunk.
        @pl.when(ch == pl.num_programs(1) - 1)
        def _():
            h_out_ref[0] = h_fin
            c_out_ref[0] = c_fin

    return kernel


def rnn_rollout_multi(obs_seq, act_seq, hid, prep, max_chunk=256):
    """R independent rollouts of T sequential LSTM steps in ONE pallas_call.

    obs_seq: (R, T, B, obs_dim), act_seq: (R, T, B, act_dim), hid=(h0,c0): (R, B, H).
    Returns (mu, sigma, (h_T, c_T)).
    """
    h0, c0 = hid
    R, T, B, O = obs_seq.shape
    A = act_seq.shape[-1]
    H = h0.shape[-1]
    d = prep["dims"]
    K, Hp, Kp, Hd = d["K"], d["Hp"], d["Kp"], d["Hd"]
    assert A + O == K and H == d["H"] and O == d["O"]

    TC = _pick_chunk(T, max_chunk)
    NC = T // TC
    unroll = 8 if TC % 8 == 0 else (4 if TC % 4 == 0 else 1)

    f32 = jnp.float32
    # One-time XLA input prep: x_t = [act | obs | 1 | 0-pad], padded to Kp lanes.
    x = jnp.concatenate(
        [act_seq.astype(f32), obs_seq.astype(f32),
         jnp.ones((R, T, B, 1), f32),
         jnp.zeros((R, T, B, Kp - K - 1), f32)], axis=-1)
    # Zero-pad the carried state to Hp lanes (padded lanes stay exactly 0 in-kernel).
    h0p = jnp.pad(h0.astype(f32), ((0, 0), (0, 0), (0, Hp - H)))
    c0p = jnp.pad(c0.astype(f32), ((0, 0), (0, 0), (0, Hp - H)))

    wx, wh = prep["w_x"], prep["w_h"]
    whd, bhd = prep["w_head"], prep["b_head"]

    def resident(shape):
        return pl.BlockSpec(shape, lambda r, ch: (0,) * len(shape))

    def per_rollout(last):
        return pl.BlockSpec((1, B, last), lambda r, ch: (r, 0, 0))

    def per_chunk(last):
        return pl.BlockSpec((1, TC, B, last), lambda r, ch: (r, ch, 0, 0))

    out_shapes = (
        jax.ShapeDtypeStruct((R, T, B, Hd), f32),   # [mu | sigma | pad] per step
        jax.ShapeDtypeStruct((R, B, Hp), f32),      # h_T (lane-padded)
        jax.ShapeDtypeStruct((R, B, Hp), f32),      # c_T (lane-padded)
    )

    flops = R * T * (2 * B * Kp * 4 * Hp + 2 * B * Hp * 4 * Hp + 2 * B * Hp * Hd)
    transcendentals = R * T * B * (5 * Hp + Hd)
    bytes_accessed = 4 * (x.size + h0p.size + c0p.size + wx.size + wh.size
                          + whd.size + bhd.size + R * T * B * Hd + 2 * R * B * Hp)

    kernel = _make_kernel(B, TC, Hp, Hd, O, unroll)

    head, h_t, c_t = pl.pallas_call(
        kernel,
        out_shape=out_shapes,
        grid_spec=pltpu.PrefetchScalarGridSpec(
            num_scalar_prefetch=0,
            grid=(R, NC),
            in_specs=[
                per_chunk(Kp),              # x          (streamed per chunk)
                per_rollout(Hp),            # h0         (per rollout)
                per_rollout(Hp),            # c0
                resident(wx.shape),         # w_x        (VMEM-resident)
                resident(wh.shape),         # w_h
                resident(whd.shape),        # w_head
                resident(bhd.shape),        # b_head
            ],
            out_specs=[
                per_chunk(Hd),              # [mu | sigma] per chunk (one writeback/chunk)
                per_rollout(Hp),            # h_T
                per_rollout(Hp),            # c_T
            ],
            scratch_shapes=[
                pltpu.VMEM((B, Hp), f32),   # h carry across chunks
                pltpu.VMEM((B, Hp), f32),   # c carry across chunks
            ],
        ),
        compiler_params=pltpu.CompilerParams(
            dimension_semantics=("parallel", "arbitrary")),
        cost_estimate=pl.CostEstimate(
            flops=flops, transcendentals=transcendentals,
            bytes_accessed=bytes_accessed),
    )(x, h0p, c0p, wx, wh, whd, bhd)

    mu = head[..., :O]
    sigma = head[..., O:2 * O]
    return mu, sigma, (h_t[..., :H], c_t[..., :H])


def rnn_rollout(obs_seq, act_seq, hid, prep):
    """Single rollout: obs_seq (T,B,O), act_seq (T,B,A), hid=(h0,c0) each (B,H)."""
    h0, c0 = hid
    mu, sigma, (h, c) = rnn_rollout_multi(
        obs_seq[None], act_seq[None], (h0[None], c0[None]), prep)
    return mu[0], sigma[0], (h[0], c[0])


def rnn_forward(obs, act, hid, prep):
    """Single-step forward matching RNN.forward(obs, act, hid)."""
    mu, sigma, (h, c) = rnn_rollout(obs[None], act[None], hid, prep)
    return mu[0], sigma[0], (h, c)


def rnn_forward_ref(obs, act, hid, params):
    """Pure-JAX single-step reference (mirrors torch.nn.LSTMCell + Linear)."""
    h0, c0 = hid
    x = jnp.concatenate([act, obs], axis=-1)
    gates = (x @ params["w_ih"].T + params["b_ih"]
             + h0 @ params["w_hh"].T + params["b_hh"])
    H = h0.shape[-1]
    i_g = jax.nn.sigmoid(gates[:, 0 * H:1 * H])
    f_g = jax.nn.sigmoid(gates[:, 1 * H:2 * H])
    g_g = jnp.tanh(gates[:, 2 * H:3 * H])
    o_g = jax.nn.sigmoid(gates[:, 3 * H:4 * H])
    c = f_g * c0 + i_g * g_g
    h = o_g * jnp.tanh(c)
    mu = h @ params["w_mu"].T + params["b_mu"]
    sigma = jnp.exp(h @ params["w_ls"].T + params["b_ls"])
    return mu, sigma, (h, c)


def make_params(key, obs_dim, act_dim, hid_dim):
    ks = jax.random.split(key, 8)
    in_dim = obs_dim + act_dim
    s = 1.0 / jnp.sqrt(hid_dim)
    u = lambda k, shape, scale: jax.random.uniform(
        k, shape, jnp.float32, minval=-scale, maxval=scale)
    return {
        "w_ih": u(ks[0], (4 * hid_dim, in_dim), s),
        "w_hh": u(ks[1], (4 * hid_dim, hid_dim), s),
        "b_ih": u(ks[2], (4 * hid_dim,), s),
        "b_hh": u(ks[3], (4 * hid_dim,), s),
        "w_mu": u(ks[4], (obs_dim, hid_dim), s),
        "b_mu": u(ks[5], (obs_dim,), s),
        "w_ls": u(ks[6], (obs_dim, hid_dim), s),
        "b_ls": u(ks[7], (obs_dim,), s),
    }
    # TODO(synk): self.fc ("step" method) is unused by forward() and not implemented here.


if __name__ == "__main__":
    # Small but sublane-aligned batch (B=8), module-default hidden (64).
    T, B, obs_dim, act_dim, hid_dim = 8, 8, 16, 4, latent_space

    key = jax.random.PRNGKey(0)
    k_obs, k_act, k_h, k_c, k_p = jax.random.split(key, 5)
    obs_seq = jax.random.normal(k_obs, (T, B, obs_dim), jnp.float32)
    act_seq = jax.random.normal(k_act, (T, B, act_dim), jnp.float32)
    h0 = jax.random.normal(k_h, (B, hid_dim), jnp.float32)
    c0 = jax.random.normal(k_c, (B, hid_dim), jnp.float32)
    params = make_params(k_p, obs_dim, act_dim, hid_dim)
    prep = prepare_params(params)

    # Fused multi-step rollout: whole T loop inside one pallas_call grid step.
    mu_seq, sigma_seq, (h_T, c_T) = rnn_rollout(obs_seq, act_seq, (h0, c0), prep)
    jax.block_until_ready((mu_seq, sigma_seq, h_T, c_T))

    # Step-by-step pure-JAX reference.
    h_r, c_r = h0, c0
    for t in range(T):
        mu_r, sigma_r, (h_r, c_r) = rnn_forward_ref(
            obs_seq[t], act_seq[t], (h_r, c_r), params)
        assert jnp.allclose(mu_seq[t], mu_r, atol=1e-4, rtol=1e-4), f"mu mismatch @t={t}"
        assert jnp.allclose(sigma_seq[t], sigma_r, atol=1e-4, rtol=1e-4), f"sigma mismatch @t={t}"
    assert jnp.allclose(h_T, h_r, atol=1e-4, rtol=1e-4), "h mismatch"
    assert jnp.allclose(c_T, c_r, atol=1e-4, rtol=1e-4), "c mismatch"

    # Two independent rollouts -> exercises the "parallel" rollout grid axis (v7x megacore).
    obs2 = jnp.stack([obs_seq, obs_seq[::-1]])
    act2 = jnp.stack([act_seq, act_seq[::-1]])
    h02 = jnp.stack([h0, c0])
    c02 = jnp.stack([c0, h0])
    mu2, sig2, (h2, c2) = rnn_rollout_multi(obs2, act2, (h02, c02), prep)
    jax.block_until_ready((mu2, sig2, h2, c2))
    for r in range(2):
        hr, cr = h02[r], c02[r]
        for t in range(T):
            mu_r, sigma_r, (hr, cr) = rnn_forward_ref(
                obs2[r, t], act2[r, t], (hr, cr), params)
            assert jnp.allclose(mu2[r, t], mu_r, atol=1e-4, rtol=1e-4), f"multi mu @r={r},t={t}"
            assert jnp.allclose(sig2[r, t], sigma_r, atol=1e-4, rtol=1e-4), f"multi sigma @r={r},t={t}"
        assert jnp.allclose(h2[r], hr, atol=1e-4, rtol=1e-4), f"multi h @r={r}"
        assert jnp.allclose(c2[r], cr, atol=1e-4, rtol=1e-4), f"multi c @r={r}"

    # Single-step API (matches RNN.forward signature).
    mu1, sigma1, (h1, c1) = rnn_forward(obs_seq[0], act_seq[0], (h0, c0), prep)
    jax.block_until_ready((mu1, sigma1, h1, c1))
    mu1_r, sigma1_r, (h1_r, c1_r) = rnn_forward_ref(obs_seq[0], act_seq[0], (h0, c0), params)
    assert jnp.allclose(mu1, mu1_r, atol=1e-4, rtol=1e-4), "single-step mu mismatch"
    assert jnp.allclose(sigma1, sigma1_r, atol=1e-4, rtol=1e-4), "single-step sigma mismatch"
    assert jnp.allclose(h1, h1_r, atol=1e-4, rtol=1e-4), "single-step h mismatch"
    assert jnp.allclose(c1, c1_r, atol=1e-4, rtol=1e-4), "single-step c mismatch"

    print("KERNEL_OK")
</pallas_src>

<mosaic_0001>
module attributes {stable_mosaic.version = 11 : i64} {
  func.func @kernel(%arg0: i32, %arg1: i32, %arg2: memref<1x8x8x128xf32, #tpu.memory_space<vmem>>, %arg3: memref<1x8x128xf32, #tpu.memory_space<vmem>>, %arg4: memref<1x8x128xf32, #tpu.memory_space<vmem>>, %arg5: memref<128x512xf32, #tpu.memory_space<vmem>>, %arg6: memref<128x512xf32, #tpu.memory_space<vmem>>, %arg7: memref<128x128xf32, #tpu.memory_space<vmem>>, %arg8: memref<1x128xf32, #tpu.memory_space<vmem>>, %arg9: memref<1x8x8x128xf32, #tpu.memory_space<vmem>>, %arg10: memref<1x8x128xf32, #tpu.memory_space<vmem>>, %arg11: memref<1x8x128xf32, #tpu.memory_space<vmem>>, %arg12: memref<8x128xf32, #tpu.memory_space<vmem>>, %arg13: memref<8x128xf32, #tpu.memory_space<vmem>>) attributes {dimension_semantics = [#tpu.dimension_semantics<parallel>, #tpu.dimension_semantics<arbitrary>], iteration_bounds = array<i64: 1, 1>, scalar_prefetch = 0 : i64, scratch_operands = 2 : i64, tpu.core_type = #tpu.core_type<tc>, window_params = [{transform_indices = @transform_0, window_bounds = array<i64: 1, 8, 8, 128>}, {transform_indices = @transform_1, window_bounds = array<i64: 1, 8, 128>}, {transform_indices = @transform_2, window_bounds = array<i64: 1, 8, 128>}, {pipeline_mode = #tpu.pipeline_mode<synchronous>, transform_indices = @transform_3, window_bounds = array<i64: 128, 512>}, {pipeline_mode = #tpu.pipeline_mode<synchronous>, transform_indices = @transform_4, window_bounds = array<i64: 128, 512>}, {pipeline_mode = #tpu.pipeline_mode<synchronous>, transform_indices = @transform_5, window_bounds = array<i64: 128, 128>}, {pipeline_mode = #tpu.pipeline_mode<synchronous>, transform_indices = @transform_6, window_bounds = array<i64: 1, 128>}, {transform_indices = @transform_7, window_bounds = array<i64: 1, 8, 8, 128>}, {transform_indices = @transform_8, window_bounds = array<i64: 1, 8, 128>}, {transform_indices = @transform_9, window_bounds = array<i64: 1, 8, 128>}]} {
    %c0_i32 = arith.constant 0 : i32
    %0 = arith.cmpi eq, %arg1, %c0_i32 : i32
    %1 = arith.extui %0 : i1 to i32
    %c0_i32_0 = arith.constant 0 : i32
    %2 = arith.cmpi ne, %1, %c0_i32_0 : i32
    scf.if %2 {
      %c0_164 = arith.constant 0 : index
      %c0_165 = arith.constant 0 : index
      %c0_166 = arith.constant 0 : index
      %336 = vector.load %arg3[%c0_164, %c0_165, %c0_166] : memref<1x8x128xf32, #tpu.memory_space<vmem>>, vector<1x8x128xf32>
      %337 = vector.shape_cast %336 : vector<1x8x128xf32> to vector<8x128xf32>
      %c0_167 = arith.constant 0 : index
      %c0_168 = arith.constant 0 : index
      %338 = vector.load %arg12[%c0_167, %c0_168] : memref<8x128xf32, #tpu.memory_space<vmem>>, vector<8x128xf32>
      tpu.vector_store %arg12[%c0_167, %c0_168], %337 {strides = array<i32>} : memref<8x128xf32, #tpu.memory_space<vmem>>, vector<8x128xf32>,
      %c0_169 = arith.constant 0 : index
      %c0_170 = arith.constant 0 : index
      %c0_171 = arith.constant 0 : index
      %339 = vector.load %arg4[%c0_169, %c0_170, %c0_171] : memref<1x8x128xf32, #tpu.memory_space<vmem>>, vector<1x8x128xf32>
      %340 = vector.shape_cast %339 : vector<1x8x128xf32> to vector<8x128xf32>
      %c0_172 = arith.constant 0 : index
      %c0_173 = arith.constant 0 : index
      %341 = vector.load %arg13[%c0_172, %c0_173] : memref<8x128xf32, #tpu.memory_space<vmem>>, vector<8x128xf32>
      tpu.vector_store %arg13[%c0_172, %c0_173], %340 {strides = array<i32>} : memref<8x128xf32, #tpu.memory_space<vmem>>, vector<8x128xf32>,
    } else {
    }
    %c0 = arith.constant 0 : index
    %c0_1 = arith.constant 0 : index
    %3 = vector.load %arg8[%c0, %c0_1] : memref<1x128xf32, #tpu.memory_space<vmem>>, vector<1x128xf32>
    %4 = vector.shape_cast %3 : vector<1x128xf32> to vector<1x128xf32>
    %5 = vector.broadcast %4 : vector<1x128xf32> to vector<8x128xf32>
    %6 = tpu.iota {dimensions = array<i32: 1>} : vector<8x128xi32>
    %c16_i32 = arith.constant 16 : i32
    %7 = vector.broadcast %c16_i32 : i32 to vector<8x128xi32>
    %8 = arith.cmpi slt, %6, %7 : vector<8x128xi32>
    %c0_2 = arith.constant 0 : index
    %c0_3 = arith.constant 0 : index
    %9 = vector.load %arg12[%c0_2, %c0_3] : memref<8x128xf32, #tpu.memory_space<vmem>>, vector<8x128xf32>
    %c0_4 = arith.constant 0 : index
    %c0_5 = arith.constant 0 : index
    %10 = vector.load %arg13[%c0_4, %c0_5] : memref<8x128xf32, #tpu.memory_space<vmem>>, vector<8x128xf32>
    %c0_6 = arith.constant 0 : index
    %c0_7 = arith.constant 0 : index
    %c0_8 = arith.constant 0 : index
    %c0_9 = arith.constant 0 : index
    %11 = vector.load %arg2[%c0_6, %c0_7, %c0_8, %c0_9] : memref<1x8x8x128xf32, #tpu.memory_space<vmem>>, vector<1x1x8x128xf32>
    %12 = vector.shape_cast %11 : vector<1x1x8x128xf32> to vector<8x128xf32>
    %c0_10 = arith.constant 0 : index
    %c0_11 = arith.constant 0 : index
    %13 = vector.load %arg5[%c0_10, %c0_11] : memref<128x512xf32, #tpu.memory_space<vmem>>, vector<128x512xf32>
    %cst = arith.constant dense<0.000000e+00> : vector<8x512xf32>
    %14 = tpu.matmul %12, %13, %cst {dimension_numbers = #tpu.dot_dimension_numbers<[1], [0], [0], [1], [0, 0, 1, 1], [], []>} : vector<8x128xf32>, vector<128x512xf32>, vector<8x512xf32> -> vector<8x512xf32>
    %c0_12 = arith.constant 0 : index
    %c0_13 = arith.constant 0 : index
    %15 = vector.load %arg6[%c0_12, %c0_13] : memref<128x512xf32, #tpu.memory_space<vmem>>, vector<128x512xf32>
    %cst_14 = arith.constant dense<0.000000e+00> : vector<8x512xf32>
    %16 = tpu.matmul %9, %15, %cst_14 {dimension_numbers = #tpu.dot_dimension_numbers<[1], [0], [0], [1], [0, 0, 1, 1], [], []>} : vector<8x128xf32>, vector<128x512xf32>, vector<8x512xf32> -> vector<8x512xf32>
    %17 = arith.addf %14, %16 : vector<8x512xf32>
    %18 = vector.extract_strided_slice %17 {offsets = [0, 0], sizes = [8, 128], strides = [1, 1]} : vector<8x512xf32> to vector<8x128xf32>
    %19 = arith.negf %18 : vector<8x128xf32>
    %20 = math.exp %19 : vector<8x128xf32>
    %cst_15 = arith.constant 1.000000e+00 : f32
    %21 = vector.broadcast %cst_15 : f32 to vector<8x128xf32>
    %22 = arith.addf %21, %20 : vector<8x128xf32>
    %23 = arith.divf %21, %22 : vector<8x128xf32>
    %24 = vector.extract_strided_slice %17 {offsets = [0, 128], sizes = [8, 128], strides = [1, 1]} : vector<8x512xf32> to vector<8x128xf32>
    %25 = arith.negf %24 : vector<8x128xf32>
    %26 = math.exp %25 : vector<8x128xf32>
    %cst_16 = arith.constant 1.000000e+00 : f32
    %27 = vector.broadcast %cst_16 : f32 to vector<8x128xf32>
    %28 = arith.addf %27, %26 : vector<8x128xf32>
    %29 = arith.divf %27, %28 : vector<8x128xf32>
    %30 = vector.extract_strided_slice %17 {offsets = [0, 256], sizes = [8, 128], strides = [1, 1]} : vector<8x512xf32> to vector<8x128xf32>
    %31 = math.tanh %30 : vector<8x128xf32>
    %32 = vector.extract_strided_slice %17 {offsets = [0, 384], sizes = [8, 128], strides = [1, 1]} : vector<8x512xf32> to vector<8x128xf32>
    %33 = arith.negf %32 : vector<8x128xf32>
    %34 = math.exp %33 : vector<8x128xf32>
    %cst_17 = arith.constant 1.000000e+00 : f32
    %35 = vector.broadcast %cst_17 : f32 to vector<8x128xf32>
    %36 = arith.addf %35, %34 : vector<8x128xf32>
    %37 = arith.divf %35, %36 : vector<8x128xf32>
    %38 = arith.mulf %29, %10 : vector<8x128xf32>
    %39 = arith.mulf %23, %31 : vector<8x128xf32>
    %40 = arith.addf %38, %39 : vector<8x128xf32>
    %41 = math.tanh %40 : vector<8x128xf32>
    %42 = arith.mulf %37, %41 : vector<8x128xf32>
    %c0_18 = arith.constant 0 : index
    %c0_19 = arith.constant 0 : index
    %43 = vector.load %arg7[%c0_18, %c0_19] : memref<128x128xf32, #tpu.memory_space<vmem>>, vector<128x128xf32>
    %cst_20 = arith.constant dense<0.000000e+00> : vector<8x128xf32>
    %44 = tpu.matmul %42, %43, %cst_20 {dimension_numbers = #tpu.dot_dimension_numbers<[1], [0], [0], [1], [0, 0, 1, 1], [], []>} : vector<8x128xf32>, vector<128x128xf32>, vector<8x128xf32> -> vector<8x128xf32>
    %45 = arith.addf %44, %5 : vector<8x128xf32>
    %46 = math.exp %45 : vector<8x128xf32>
    %47 = arith.select %8, %45, %46 : vector<8x128xi1>, vector<8x128xf32>
    %c0_21 = arith.constant 0 : index
    %c0_22 = arith.constant 0 : index
    %c0_23 = arith.constant 0 : index
    %c0_24 = arith.constant 0 : index
    %48 = vector.load %arg9[%c0_21, %c0_22, %c0_23, %c0_24] : memref<1x8x8x128xf32, #tpu.memory_space<vmem>>, vector<1x1x8x128xf32>
    %49 = vector.shape_cast %48 : vector<1x1x8x128xf32> to vector<8x128xf32>
    %50 = vector.shape_cast %47 : vector<8x128xf32> to vector<1x1x8x128xf32>
    tpu.vector_store %arg9[%c0_21, %c0_22, %c0_23, %c0_24], %50 {strides = array<i32>} : memref<1x8x8x128xf32, #tpu.memory_space<vmem>>, vector<1x1x8x128xf32>,
    %c0_25 = arith.constant 0 : index
    %c1 = arith.constant 1 : index
    %c0_26 = arith.constant 0 : index
    %c0_27 = arith.constant 0 : index
    %51 = vector.load %arg2[%c0_25, %c1, %c0_26, %c0_27] : memref<1x8x8x128xf32, #tpu.memory_space<vmem>>, vector<1x1x8x128xf32>
    %52 = vector.shape_cast %51 : vector<1x1x8x128xf32> to vector<8x128xf32>
    %c0_28 = arith.constant 0 : index
    %c0_29 = arith.constant 0 : index
    %53 = vector.load %arg5[%c0_28, %c0_29] : memref<128x512xf32, #tpu.memory_space<vmem>>, vector<128x512xf32>
    %cst_30 = arith.constant dense<0.000000e+00> : vector<8x512xf32>
    %54 = tpu.matmul %52, %53, %cst_30 {dimension_numbers = #tpu.dot_dimension_numbers<[1], [0], [0], [1], [0, 0, 1, 1], [], []>} : vector<8x128xf32>, vector<128x512xf32>, vector<8x512xf32> -> vector<8x512xf32>
    %c0_31 = arith.constant 0 : index
    %c0_32 = arith.constant 0 : index
    %55 = vector.load %arg6[%c0_31, %c0_32] : memref<128x512xf32, #tpu.memory_space<vmem>>, vector<128x512xf32>
    %cst_33 = arith.constant dense<0.000000e+00> : vector<8x512xf32>
    %56 = tpu.matmul %42, %55, %cst_33 {dimension_numbers = #tpu.dot_dimension_numbers<[1], [0], [0], [1], [0, 0, 1, 1], [], []>} : vector<8x128xf32>, vector<128x512xf32>, vector<8x512xf32> -> vector<8x512xf32>
    %57 = arith.addf %54, %56 : vector<8x512xf32>
    %58 = vector.extract_strided_slice %57 {offsets = [0, 0], sizes = [8, 128], strides = [1, 1]} : vector<8x512xf32> to vector<8x128xf32>
    %59 = arith.negf %58 : vector<8x128xf32>
    %60 = math.exp %59 : vector<8x128xf32>
    %cst_34 = arith.constant 1.000000e+00 : f32
    %61 = vector.broadcast %cst_34 : f32 to vector<8x128xf32>
    %62 = arith.addf %61, %60 : vector<8x128xf32>
    %63 = arith.divf %61, %62 : vector<8x128xf32>
    %64 = vector.extract_strided_slice %57 {offsets = [0, 128], sizes = [8, 128], strides = [1, 1]} : vector<8x512xf32> to vector<8x128xf32>
    %65 = arith.negf %64 : vector<8x128xf32>
    %66 = math.exp %65 : vector<8x128xf32>
    %cst_35 = arith.constant 1.000000e+00 : f32
    %67 = vector.broadcast %cst_35 : f32 to vector<8x128xf32>
    %68 = arith.addf %67, %66 : vector<8x128xf32>
    %69 = arith.divf %67, %68 : vector<8x128xf32>
    %70 = vector.extract_strided_slice %57 {offsets = [0, 256], sizes = [8, 128], strides = [1, 1]} : vector<8x512xf32> to vector<8x128xf32>
    %71 = math.tanh %70 : vector<8x128xf32>
    %72 = vector.extract_strided_slice %57 {offsets = [0, 384], sizes = [8, 128], strides = [1, 1]} : vector<8x512xf32> to vector<8x128xf32>
    %73 = arith.negf %72 : vector<8x128xf32>
    %74 = math.exp %73 : vector<8x128xf32>
    %cst_36 = arith.constant 1.000000e+00 : f32
    %75 = vector.broadcast %cst_36 : f32 to vector<8x128xf32>
    %76 = arith.addf %75, %74 : vector<8x128xf32>
    %77 = arith.divf %75, %76 : vector<8x128xf32>
    %78 = arith.mulf %69, %40 : vector<8x128xf32>
    %79 = arith.mulf %63, %71 : vector<8x128xf32>
    %80 = arith.addf %78, %79 : vector<8x128xf32>
    %81 = math.tanh %80 : vector<8x128xf32>
    %82 = arith.mulf %77, %81 : vector<8x128xf32>
    %c0_37 = arith.constant 0 : index
    %c0_38 = arith.constant 0 : index
    %83 = vector.load %arg7[%c0_37, %c0_38] : memref<128x128xf32, #tpu.memory_space<vmem>>, vector<128x128xf32>
    %cst_39 = arith.constant dense<0.000000e+00> : vector<8x128xf32>
    %84 = tpu.matmul %82, %83, %cst_39 {dimension_numbers = #tpu.dot_dimension_numbers<[1], [0], [0], [1], [0, 0, 1, 1], [], []>} : vector<8x128xf32>, vector<128x128xf32>, vector<8x128xf32> -> vector<8x128xf32>
    %85 = arith.addf %84, %5 : vector<8x128xf32>
    %86 = math.exp %85 : vector<8x128xf32>
    %87 = arith.select %8, %85, %86 : vector<8x128xi1>, vector<8x128xf32>
    %c0_40 = arith.constant 0 : index
    %c1_41 = arith.constant 1 : index
    %c0_42 = arith.constant 0 : index
    %c0_43 = arith.constant 0 : index
    %88 = vector.load %arg9[%c0_40, %c1_41, %c0_42, %c0_43] : memref<1x8x8x128xf32, #tpu.memory_space<vmem>>, vector<1x1x8x128xf32>
    %89 = vector.shape_cast %88 : vector<1x1x8x128xf32> to vector<8x128xf32>
    %90 = vector.shape_cast %87 : vector<8x128xf32> to vector<1x1x8x128xf32>
    tpu.vector_store %arg9[%c0_40, %c1_41, %c0_42, %c0_43], %90 {strides = array<i32>} : memref<1x8x8x128xf32, #tpu.memory_space<vmem>>, vector<1x1x8x128xf32>,
    %c0_44 = arith.constant 0 : index
    %c2 = arith.constant 2 : index
    %c0_45 = arith.constant 0 : index
    %c0_46 = arith.constant 0 : index
    %91 = vector.load %arg2[%c0_44, %c2, %c0_45, %c0_46] : memref<1x8x8x128xf32, #tpu.memory_space<vmem>>, vector<1x1x8x128xf32>
    %92 = vector.shape_cast %91 : vector<1x1x8x128xf32> to vector<8x128xf32>
    %c0_47 = arith.constant 0 : index
    %c0_48 = arith.constant 0 : index
    %93 = vector.load %arg5[%c0_47, %c0_48] : memref<128x512xf32, #tpu.memory_space<vmem>>, vector<128x512xf32>
    %cst_49 = arith.constant dense<0.000000e+00> : vector<8x512xf32>
    %94 = tpu.matmul %92, %93, %cst_49 {dimension_numbers = #tpu.dot_dimension_numbers<[1], [0], [0], [1], [0, 0, 1, 1], [], []>} : vector<8x128xf32>, vector<128x512xf32>, vector<8x512xf32> -> vector<8x512xf32>
    %c0_50 = arith.constant 0 : index
    %c0_51 = arith.constant 0 : index
    %95 = vector.load %arg6[%c0_50, %c0_51] : memref<128x512xf32, #tpu.memory_space<vmem>>, vector<128x512xf32>
    %cst_52 = arith.constant dense<0.000000e+00> : vector<8x512xf32>
    %96 = tpu.matmul %82, %95, %cst_52 {dimension_numbers = #tpu.dot_dimension_numbers<[1], [0], [0], [1], [0, 0, 1, 1], [], []>} : vector<8x128xf32>, vector<128x512xf32>, vector<8x512xf32> -> vector<8x512xf32>
    %97 = arith.addf %94, %96 : vector<8x512xf32>
    %98 = vector.extract_strided_slice %97 {offsets = [0, 0], sizes = [8, 128], strides = [1, 1]} : vector<8x512xf32> to vector<8x128xf32>
    %99 = arith.negf %98 : vector<8x128xf32>
    %100 = math.exp %99 : vector<8x128xf32>
    %cst_53 = arith.constant 1.000000e+00 : f32
    %101 = vector.broadcast %cst_53 : f32 to vector<8x128xf32>
    %102 = arith.addf %101, %100 : vector<8x128xf32>
    %103 = arith.divf %101, %102 : vector<8x128xf32>
    %104 = vector.extract_strided_slice %97 {offsets = [0, 128], sizes = [8, 128], strides = [1, 1]} : vector<8x512xf32> to vector<8x128xf32>
    %105 = arith.negf %104 : vector<8x128xf32>
    %106 = math.exp %105 : vector<8x128xf32>
    %cst_54 = arith.constant 1.000000e+00 : f32
    %107 = vector.broadcast %cst_54 : f32 to vector<8x128xf32>
    %108 = arith.addf %107, %106 : vector<8x128xf32>
    %109 = arith.divf %107, %108 : vector<8x128xf32>
    %110 = vector.extract_strided_slice %97 {offsets = [0, 256], sizes = [8, 128], strides = [1, 1]} : vector<8x512xf32> to vector<8x128xf32>
    %111 = math.tanh %110 : vector<8x128xf32>
    %112 = vector.extract_strided_slice %97 {offsets = [0, 384], sizes = [8, 128], strides = [1, 1]} : vector<8x512xf32> to vector<8x128xf32>
    %113 = arith.negf %112 : vector<8x128xf32>
    %114 = math.exp %113 : vector<8x128xf32>
    %cst_55 = arith.constant 1.000000e+00 : f32
    %115 = vector.broadcast %cst_55 : f32 to vector<8x128xf32>
    %116 = arith.addf %115, %114 : vector<8x128xf32>
    %117 = arith.divf %115, %116 : vector<8x128xf32>
    %118 = arith.mulf %109, %80 : vector<8x128xf32>
    %119 = arith.mulf %103, %111 : vector<8x128xf32>
    %120 = arith.addf %118, %119 : vector<8x128xf32>
    %121 = math.tanh %120 : vector<8x128xf32>
    %122 = arith.mulf %117, %121 : vector<8x128xf32>
    %c0_56 = arith.constant 0 : index
    %c0_57 = arith.constant 0 : index
    %123 = vector.load %arg7[%c0_56, %c0_57] : memref<128x128xf32, #tpu.memory_space<vmem>>, vector<128x128xf32>
    %cst_58 = arith.constant dense<0.000000e+00> : vector<8x128xf32>
    %124 = tpu.matmul %122, %123, %cst_58 {dimension_numbers = #tpu.dot_dimension_numbers<[1], [0], [0], [1], [0, 0, 1, 1], [], []>} : vector<8x128xf32>, vector<128x128xf32>, vector<8x128xf32> -> vector<8x128xf32>
    %125 = arith.addf %124, %5 : vector<8x128xf32>
    %126 = math.exp %125 : vector<8x128xf32>
    %127 = arith.select %8, %125, %126 : vector<8x128xi1>, vector<8x128xf32>
    %c0_59 = arith.constant 0 : index
    %c2_60 = arith.constant 2 : index
    %c0_61 = arith.constant 0 : index
    %c0_62 = arith.constant 0 : index
    %128 = vector.load %arg9[%c0_59, %c2_60, %c0_61, %c0_62] : memref<1x8x8x128xf32, #tpu.memory_space<vmem>>, vector<1x1x8x128xf32>
    %129 = vector.shape_cast %128 : vector<1x1x8x128xf32> to vector<8x128xf32>
    %130 = vector.shape_cast %127 : vector<8x128xf32> to vector<1x1x8x128xf32>
    tpu.vector_store %arg9[%c0_59, %c2_60, %c0_61, %c0_62], %130 {strides = array<i32>} : memref<1x8x8x128xf32, #tpu.memory_space<vmem>>, vector<1x1x8x128xf32>,
    %c0_63 = arith.constant 0 : index
    %c3 = arith.constant 3 : index
    %c0_64 = arith.constant 0 : index
    %c0_65 = arith.constant 0 : index
    %131 = vector.load %arg2[%c0_63, %c3, %c0_64, %c0_65] : memref<1x8x8x128xf32, #tpu.memory_space<vmem>>, vector<1x1x8x128xf32>
    %132 = vector.shape_cast %131 : vector<1x1x8x128xf32> to vector<8x128xf32>
    %c0_66 = arith.constant 0 : index
    %c0_67 = arith.constant 0 : index
    %133 = vector.load %arg5[%c0_66, %c0_67] : memref<128x512xf32, #tpu.memory_space<vmem>>, vector<128x512xf32>
    %cst_68 = arith.constant dense<0.000000e+00> : vector<8x512xf32>
    %134 = tpu.matmul %132, %133, %cst_68 {dimension_numbers = #tpu.dot_dimension_numbers<[1], [0], [0], [1], [0, 0, 1, 1], [], []>} : vector<8x128xf32>, vector<128x512xf32>, vector<8x512xf32> -> vector<8x512xf32>
    %c0_69 = arith.constant 0 : index
    %c0_70 = arith.constant 0 : index
    %135 = vector.load %arg6[%c0_69, %c0_70] : memref<128x512xf32, #tpu.memory_space<vmem>>, vector<128x512xf32>
    %cst_71 = arith.constant dense<0.000000e+00> : vector<8x512xf32>
    %136 = tpu.matmul %122, %135, %cst_71 {dimension_numbers = #tpu.dot_dimension_numbers<[1], [0], [0], [1], [0, 0, 1, 1], [], []>} : vector<8x128xf32>, vector<128x512xf32>, vector<8x512xf32> -> vector<8x512xf32>
    %137 = arith.addf %134, %136 : vector<8x512xf32>
    %138 = vector.extract_strided_slice %137 {offsets = [0, 0], sizes = [8, 128], strides = [1, 1]} : vector<8x512xf32> to vector<8x128xf32>
    %139 = arith.negf %138 : vector<8x128xf32>
    %140 = math.exp %139 : vector<8x128xf32>
    %cst_72 = arith.constant 1.000000e+00 : f32
    %141 = vector.broadcast %cst_72 : f32 to vector<8x128xf32>
    %142 = arith.addf %141, %140 : vector<8x128xf32>
    %143 = arith.divf %141, %142 : vector<8x128xf32>
    %144 = vector.extract_strided_slice %137 {offsets = [0, 128], sizes = [8, 128], strides = [1, 1]} : vector<8x512xf32> to vector<8x128xf32>
    %145 = arith.negf %144 : vector<8x128xf32>
    %146 = math.exp %145 : vector<8x128xf32>
    %cst_73 = arith.constant 1.000000e+00 : f32
    %147 = vector.broadcast %cst_73 : f32 to vector<8x128xf32>
    %148 = arith.addf %147, %146 : vector<8x128xf32>
    %149 = arith.divf %147, %148 : vector<8x128xf32>
    %150 = vector.extract_strided_slice %137 {offsets = [0, 256], sizes = [8, 128], strides = [1, 1]} : vector<8x512xf32> to vector<8x128xf32>
    %151 = math.tanh %150 : vector<8x128xf32>
    %152 = vector.extract_strided_slice %137 {offsets = [0, 384], sizes = [8, 128], strides = [1, 1]} : vector<8x512xf32> to vector<8x128xf32>
    %153 = arith.negf %152 : vector<8x128xf32>
    %154 = math.exp %153 : vector<8x128xf32>
    %cst_74 = arith.constant 1.000000e+00 : f32
    %155 = vector.broadcast %cst_74 : f32 to vector<8x128xf32>
    %156 = arith.addf %155, %154 : vector<8x128xf32>
    %157 = arith.divf %155, %156 : vector<8x128xf32>
    %158 = arith.mulf %149, %120 : vector<8x128xf32>
    %159 = arith.mulf %143, %151 : vector<8x128xf32>
    %160 = arith.addf %158, %159 : vector<8x128xf32>
    %161 = math.tanh %160 : vector<8x128xf32>
    %162 = arith.mulf %157, %161 : vector<8x128xf32>
    %c0_75 = arith.constant 0 : index
    %c0_76 = arith.constant 0 : index
    %163 = vector.load %arg7[%c0_75, %c0_76] : memref<128x128xf32, #tpu.memory_space<vmem>>, vector<128x128xf32>
    %cst_77 = arith.constant dense<0.000000e+00> : vector<8x128xf32>
    %164 = tpu.matmul %162, %163, %cst_77 {dimension_numbers = #tpu.dot_dimension_numbers<[1], [0], [0], [1], [0, 0, 1, 1], [], []>} : vector<8x128xf32>, vector<128x128xf32>, vector<8x128xf32> -> vector<8x128xf32>
    %165 = arith.addf %164, %5 : vector<8x128xf32>
    %166 = math.exp %165 : vector<8x128xf32>
    %167 = arith.select %8, %165, %166 : vector<8x128xi1>, vector<8x128xf32>
    %c0_78 = arith.constant 0 : index
    %c3_79 = arith.constant 3 : index
    %c0_80 = arith.constant 0 : index
    %c0_81 = arith.constant 0 : index
    %168 = vector.load %arg9[%c0_78, %c3_79, %c0_80, %c0_81] : memref<1x8x8x128xf32, #tpu.memory_space<vmem>>, vector<1x1x8x128xf32>
    %169 = vector.shape_cast %168 : vector<1x1x8x128xf32> to vector<8x128xf32>
    %170 = vector.shape_cast %167 : vector<8x128xf32> to vector<1x1x8x128xf32>
    tpu.vector_store %arg9[%c0_78, %c3_79, %c0_80, %c0_81], %170 {strides = array<i32>} : memref<1x8x8x128xf32, #tpu.memory_space<vmem>>, vector<1x1x8x128xf32>,
    %c0_82 = arith.constant 0 : index
    %c4 = arith.constant 4 : index
    %c0_83 = arith.constant 0 : index
    %c0_84 = arith.constant 0 : index
    %171 = vector.load %arg2[%c0_82, %c4, %c0_83, %c0_84] : memref<1x8x8x128xf32, #tpu.memory_space<vmem>>, vector<1x1x8x128xf32>
    %172 = vector.shape_cast %171 : vector<1x1x8x128xf32> to vector<8x128xf32>
    %c0_85 = arith.constant 0 : index
    %c0_86 = arith.constant 0 : index
    %173 = vector.load %arg5[%c0_85, %c0_86] : memref<128x512xf32, #tpu.memory_space<vmem>>, vector<128x512xf32>
    %cst_87 = arith.constant dense<0.000000e+00> : vector<8x512xf32>
    %174 = tpu.matmul %172, %173, %cst_87 {dimension_numbers = #tpu.dot_dimension_numbers<[1], [0], [0], [1], [0, 0, 1, 1], [], []>} : vector<8x128xf32>, vector<128x512xf32>, vector<8x512xf32> -> vector<8x512xf32>
    %c0_88 = arith.constant 0 : index
    %c0_89 = arith.constant 0 : index
    %175 = vector.load %arg6[%c0_88, %c0_89] : memref<128x512xf32, #tpu.memory_space<vmem>>, vector<128x512xf32>
    %cst_90 = arith.constant dense<0.000000e+00> : vector<8x512xf32>
    %176 = tpu.matmul %162, %175, %cst_90 {dimension_numbers = #tpu.dot_dimension_numbers<[1], [0], [0], [1], [0, 0, 1, 1], [], []>} : vector<8x128xf32>, vector<128x512xf32>, vector<8x512xf32> -> vector<8x512xf32>
    %177 = arith.addf %174, %176 : vector<8x512xf32>
    %178 = vector.extract_strided_slice %177 {offsets = [0, 0], sizes = [8, 128], strides = [1, 1]} : vector<8x512xf32> to vector<8x128xf32>
    %179 = arith.negf %178 : vector<8x128xf32>
    %180 = math.exp %179 : vector<8x128xf32>
    %cst_91 = arith.constant 1.000000e+00 : f32
    %181 = vector.broadcast %cst_91 : f32 to vector<8x128xf32>
    %182 = arith.addf %181, %180 : vector<8x128xf32>
    %183 = arith.divf %181, %182 : vector<8x128xf32>
    %184 = vector.extract_strided_slice %177 {offsets = [0, 128], sizes = [8, 128], strides = [1, 1]} : vector<8x512xf32> to vector<8x128xf32>
    %185 = arith.negf %184 : vector<8x128xf32>
    %186 = math.exp %185 : vector<8x128xf32>
    %cst_92 = arith.constant 1.000000e+00 : f32
    %187 = vector.broadcast %cst_92 : f32 to vector<8x128xf32>
    %188 = arith.addf %187, %186 : vector<8x128xf32>
    %189 = arith.divf %187, %188 : vector<8x128xf32>
    %190 = vector.extract_strided_slice %177 {offsets = [0, 256], sizes = [8, 128], strides = [1, 1]} : vector<8x512xf32> to vector<8x128xf32>
    %191 = math.tanh %190 : vector<8x128xf32>
    %192 = vector.extract_strided_slice %177 {offsets = [0, 384], sizes = [8, 128], strides = [1, 1]} : vector<8x512xf32> to vector<8x128xf32>
    %193 = arith.negf %192 : vector<8x128xf32>
    %194 = math.exp %193 : vector<8x128xf32>
    %cst_93 = arith.constant 1.000000e+00 : f32
    %195 = vector.broadcast %cst_93 : f32 to vector<8x128xf32>
    %196 = arith.addf %195, %194 : vector<8x128xf32>
    %197 = arith.divf %195, %196 : vector<8x128xf32>
    %198 = arith.mulf %189, %160 : vector<8x128xf32>
    %199 = arith.mulf %183, %191 : vector<8x128xf32>
    %200 = arith.addf %198, %199 : vector<8x128xf32>
    %201 = math.tanh %200 : vector<8x128xf32>
    %202 = arith.mulf %197, %201 : vector<8x128xf32>
    %c0_94 = arith.constant 0 : index
    %c0_95 = arith.constant 0 : index
    %203 = vector.load %arg7[%c0_94, %c0_95] : memref<128x128xf32, #tpu.memory_space<vmem>>, vector<128x128xf32>
    %cst_96 = arith.constant dense<0.000000e+00> : vector<8x128xf32>
    %204 = tpu.matmul %202, %203, %cst_96 {dimension_numbers = #tpu.dot_dimension_numbers<[1], [0], [0], [1], [0, 0, 1, 1], [], []>} : vector<8x128xf32>, vector<128x128xf32>, vector<8x128xf32> -> vector<8x128xf32>
    %205 = arith.addf %204, %5 : vector<8x128xf32>
    %206 = math.exp %205 : vector<8x128xf32>
    %207 = arith.select %8, %205, %206 : vector<8x128xi1>, vector<8x128xf32>
    %c0_97 = arith.constant 0 : index
    %c4_98 = arith.constant 4 : index
    %c0_99 = arith.constant 0 : index
    %c0_100 = arith.constant 0 : index
    %208 = vector.load %arg9[%c0_97, %c4_98, %c0_99, %c0_100] : memref<1x8x8x128xf32, #tpu.memory_space<vmem>>, vector<1x1x8x128xf32>
    %209 = vector.shape_cast %208 : vector<1x1x8x128xf32> to vector<8x128xf32>
    %210 = vector.shape_cast %207 : vector<8x128xf32> to vector<1x1x8x128xf32>
    tpu.vector_store %arg9[%c0_97, %c4_98, %c0_99, %c0_100], %210 {strides = array<i32>} : memref<1x8x8x128xf32, #tpu.memory_space<vmem>>, vector<1x1x8x128xf32>,
    %c0_101 = arith.constant 0 : index
    %c5 = arith.constant 5 : index
    %c0_102 = arith.constant 0 : index
    %c0_103 = arith.constant 0 : index
    %211 = vector.load %arg2[%c0_101, %c5, %c0_102, %c0_103] : memref<1x8x8x128xf32, #tpu.memory_space<vmem>>, vector<1x1x8x128xf32>
    %212 = vector.shape_cast %211 : vector<1x1x8x128xf32> to vector<8x128xf32>
    %c0_104 = arith.constant 0 : index
    %c0_105 = arith.constant 0 : index
    %213 = vector.load %arg5[%c0_104, %c0_105] : memref<128x512xf32, #tpu.memory_space<vmem>>, vector<128x512xf32>
    %cst_106 = arith.constant dense<0.000000e+00> : vector<8x512xf32>
    %214 = tpu.matmul %212, %213, %cst_106 {dimension_numbers = #tpu.dot_dimension_numbers<[1], [0], [0], [1], [0, 0, 1, 1], [], []>} : vector<8x128xf32>, vector<128x512xf32>, vector<8x512xf32> -> vector<8x512xf32>
    %c0_107 = arith.constant 0 : index
    %c0_108 = arith.constant 0 : index
    %215 = vector.load %arg6[%c0_107, %c0_108] : memref<128x512xf32, #tpu.memory_space<vmem>>, vector<128x512xf32>
    %cst_109 = arith.constant dense<0.000000e+00> : vector<8x512xf32>
    %216 = tpu.matmul %202, %215, %cst_109 {dimension_numbers = #tpu.dot_dimension_numbers<[1], [0], [0], [1], [0, 0, 1, 1], [], []>} : vector<8x128xf32>, vector<128x512xf32>, vector<8x512xf32> -> vector<8x512xf32>
    %217 = arith.addf %214, %216 : vector<8x512xf32>
    %218 = vector.extract_strided_slice %217 {offsets = [0, 0], sizes = [8, 128], strides = [1, 1]} : vector<8x512xf32> to vector<8x128xf32>
    %219 = arith.negf %218 : vector<8x128xf32>
    %220 = math.exp %219 : vector<8x128xf32>
    %cst_110 = arith.constant 1.000000e+00 : f32
    %221 = vector.broadcast %cst_110 : f32 to vector<8x128xf32>
    %222 = arith.addf %221, %220 : vector<8x128xf32>
    %223 = arith.divf %221, %222 : vector<8x128xf32>
    %224 = vector.extract_strided_slice %217 {offsets = [0, 128], sizes = [8, 128], strides = [1, 1]} : vector<8x512xf32> to vector<8x128xf32>
    %225 = arith.negf %224 : vector<8x128xf32>
    %226 = math.exp %225 : vector<8x128xf32>
    %cst_111 = arith.constant 1.000000e+00 : f32
    %227 = vector.broadcast %cst_111 : f32 to vector<8x128xf32>
    %228 = arith.addf %227, %226 : vector<8x128xf32>
    %229 = arith.divf %227, %228 : vector<8x128xf32>
    %230 = vector.extract_strided_slice %217 {offsets = [0, 256], sizes = [8, 128], strides = [1, 1]} : vector<8x512xf32> to vector<8x128xf32>
    %231 = math.tanh %230 : vector<8x128xf32>
    %232 = vector.extract_strided_slice %217 {offsets = [0, 384], sizes = [8, 128], strides = [1, 1]} : vector<8x512xf32> to vector<8x128xf32>
    %233 = arith.negf %232 : vector<8x128xf32>
    %234 = math.exp %233 : vector<8x128xf32>
    %cst_112 = arith.constant 1.000000e+00 : f32
    %235 = vector.broadcast %cst_112 : f32 to vector<8x128xf32>
    %236 = arith.addf %235, %234 : vector<8x128xf32>
    %237 = arith.divf %235, %236 : vector<8x128xf32>
    %238 = arith.mulf %229, %200 : vector<8x128xf32>
    %239 = arith.mulf %223, %231 : vector<8x128xf32>
    %240 = arith.addf %238, %239 : vector<8x128xf32>
    %241 = math.tanh %240 : vector<8x128xf32>
    %242 = arith.mulf %237, %241 : vector<8x128xf32>
    %c0_113 = arith.constant 0 : index
    %c0_114 = arith.constant 0 : index
    %243 = vector.load %arg7[%c0_113, %c0_114] : memref<128x128xf32, #tpu.memory_space<vmem>>, vector<128x128xf32>
    %cst_115 = arith.constant dense<0.000000e+00> : vector<8x128xf32>
    %244 = tpu.matmul %242, %243, %cst_115 {dimension_numbers = #tpu.dot_dimension_numbers<[1], [0], [0], [1], [0, 0, 1, 1], [], []>} : vector<8x128xf32>, vector<128x128xf32>, vector<8x128xf32> -> vector<8x128xf32>
    %245 = arith.addf %244, %5 : vector<8x128xf32>
    %246 = math.exp %245 : vector<8x128xf32>
    %247 = arith.select %8, %245, %246 : vector<8x128xi1>, vector<8x128xf32>
    %c0_116 = arith.constant 0 : index
    %c5_117 = arith.constant 5 : index
    %c0_118 = arith.constant 0 : index
    %c0_119 = arith.constant 0 : index
    %248 = vector.load %arg9[%c0_116, %c5_117, %c0_118, %c0_119] : memref<1x8x8x128xf32, #tpu.memory_space<vmem>>, vector<1x1x8x128xf32>
    %249 = vector.shape_cast %248 : vector<1x1x8x128xf32> to vector<8x128xf32>
    %250 = vector.shape_cast %247 : vector<8x128xf32> to vector<1x1x8x128xf32>
    tpu.vector_store %arg9[%c0_116, %c5_117, %c0_118, %c0_119], %250 {strides = array<i32>} : memref<1x8x8x128xf32, #tpu.memory_space<vmem>>, vector<1x1x8x128xf32>,
    %c0_120 = arith.constant 0 : index
    %c6 = arith.constant 6 : index
    %c0_121 = arith.constant 0 : index
    %c0_122 = arith.constant 0 : index
    %251 = vector.load %arg2[%c0_120, %c6, %c0_121, %c0_122] : memref<1x8x8x128xf32, #tpu.memory_space<vmem>>, vector<1x1x8x128xf32>
    %252 = vector.shape_cast %251 : vector<1x1x8x128xf32> to vector<8x128xf32>
    %c0_123 = arith.constant 0 : index
    %c0_124 = arith.constant 0 : index
    %253 = vector.load %arg5[%c0_123, %c0_124] : memref<128x512xf32, #tpu.memory_space<vmem>>, vector<128x512xf32>
    %cst_125 = arith.constant dense<0.000000e+00> : vector<8x512xf32>
    %254 = tpu.matmul %252, %253, %cst_125 {dimension_numbers = #tpu.dot_dimension_numbers<[1], [0], [0], [1], [0, 0, 1, 1], [], []>} : vector<8x128xf32>, vector<128x512xf32>, vector<8x512xf32> -> vector<8x512xf32>
    %c0_126 = arith.constant 0 : index
    %c0_127 = arith.constant 0 : index
    %255 = vector.load %arg6[%c0_126, %c0_127] : memref<128x512xf32, #tpu.memory_space<vmem>>, vector<128x512xf32>
    %cst_128 = arith.constant dense<0.000000e+00> : vector<8x512xf32>
    %256 = tpu.matmul %242, %255, %cst_128 {dimension_numbers = #tpu.dot_dimension_numbers<[1], [0], [0], [1], [0, 0, 1, 1], [], []>} : vector<8x128xf32>, vector<128x512xf32>, vector<8x512xf32> -> vector<8x512xf32>
    %257 = arith.addf %254, %256 : vector<8x512xf32>
    %258 = vector.extract_strided_slice %257 {offsets = [0, 0], sizes = [8, 128], strides = [1, 1]} : vector<8x512xf32> to vector<8x128xf32>
    %259 = arith.negf %258 : vector<8x128xf32>
    %260 = math.exp %259 : vector<8x128xf32>
    %cst_129 = arith.constant 1.000000e+00 : f32
    %261 = vector.broadcast %cst_129 : f32 to vector<8x128xf32>
    %262 = arith.addf %261, %260 : vector<8x128xf32>
    %263 = arith.divf %261, %262 : vector<8x128xf32>
    %264 = vector.extract_strided_slice %257 {offsets = [0, 128], sizes = [8, 128], strides = [1, 1]} : vector<8x512xf32> to vector<8x128xf32>
    %265 = arith.negf %264 : vector<8x128xf32>
    %266 = math.exp %265 : vector<8x128xf32>
    %cst_130 = arith.constant 1.000000e+00 : f32
    %267 = vector.broadcast %cst_130 : f32 to vector<8x128xf32>
    %268 = arith.addf %267, %266 : vector<8x128xf32>
    %269 = arith.divf %267, %268 : vector<8x128xf32>
    %270 = vector.extract_strided_slice %257 {offsets = [0, 256], sizes = [8, 128], strides = [1, 1]} : vector<8x512xf32> to vector<8x128xf32>
    %271 = math.tanh %270 : vector<8x128xf32>
    %272 = vector.extract_strided_slice %257 {offsets = [0, 384], sizes = [8, 128], strides = [1, 1]} : vector<8x512xf32> to vector<8x128xf32>
    %273 = arith.negf %272 : vector<8x128xf32>
    %274 = math.exp %273 : vector<8x128xf32>
    %cst_131 = arith.constant 1.000000e+00 : f32
    %275 = vector.broadcast %cst_131 : f32 to vector<8x128xf32>
    %276 = arith.addf %275, %274 : vector<8x128xf32>
    %277 = arith.divf %275, %276 : vector<8x128xf32>
    %278 = arith.mulf %269, %240 : vector<8x128xf32>
    %279 = arith.mulf %263, %271 : vector<8x128xf32>
    %280 = arith.addf %278, %279 : vector<8x128xf32>
    %281 = math.tanh %280 : vector<8x128xf32>
    %282 = arith.mulf %277, %281 : vector<8x128xf32>
    %c0_132 = arith.constant 0 : index
    %c0_133 = arith.constant 0 : index
    %283 = vector.load %arg7[%c0_132, %c0_133] : memref<128x128xf32, #tpu.memory_space<vmem>>, vector<128x128xf32>
    %cst_134 = arith.constant dense<0.000000e+00> : vector<8x128xf32>
    %284 = tpu.matmul %282, %283, %cst_134 {dimension_numbers = #tpu.dot_dimension_numbers<[1], [0], [0], [1], [0, 0, 1, 1], [], []>} : vector<8x128xf32>, vector<128x128xf32>, vector<8x128xf32> -> vector<8x128xf32>
    %285 = arith.addf %284, %5 : vector<8x128xf32>
    %286 = math.exp %285 : vector<8x128xf32>
    %287 = arith.select %8, %285, %286 : vector<8x128xi1>, vector<8x128xf32>
    %c0_135 = arith.constant 0 : index
    %c6_136 = arith.constant 6 : index
    %c0_137 = arith.constant 0 : index
    %c0_138 = arith.constant 0 : index
    %288 = vector.load %arg9[%c0_135, %c6_136, %c0_137, %c0_138] : memref<1x8x8x128xf32, #tpu.memory_space<vmem>>, vector<1x1x8x128xf32>
    %289 = vector.shape_cast %288 : vector<1x1x8x128xf32> to vector<8x128xf32>
    %290 = vector.shape_cast %287 : vector<8x128xf32> to vector<1x1x8x128xf32>
    tpu.vector_store %arg9[%c0_135, %c6_136, %c0_137, %c0_138], %290 {strides = array<i32>} : memref<1x8x8x128xf32, #tpu.memory_space<vmem>>, vector<1x1x8x128xf32>,
    %c0_139 = arith.constant 0 : index
    %c7 = arith.constant 7 : index
    %c0_140 = arith.constant 0 : index
    %c0_141 = arith.constant 0 : index
    %291 = vector.load %arg2[%c0_139, %c7, %c0_140, %c0_141] : memref<1x8x8x128xf32, #tpu.memory_space<vmem>>, vector<1x1x8x128xf32>
    %292 = vector.shape_cast %291 : vector<1x1x8x128xf32> to vector<8x128xf32>
    %c0_142 = arith.constant 0 : index
    %c0_143 = arith.constant 0 : index
    %293 = vector.load %arg5[%c0_142, %c0_143] : memref<128x512xf32, #tpu.memory_space<vmem>>, vector<128x512xf32>
    %cst_144 = arith.constant dense<0.000000e+00> : vector<8x512xf32>
    %294 = tpu.matmul %292, %293, %cst_144 {dimension_numbers = #tpu.dot_dimension_numbers<[1], [0], [0], [1], [0, 0, 1, 1], [], []>} : vector<8x128xf32>, vector<128x512xf32>, vector<8x512xf32> -> vector<8x512xf32>
    %c0_145 = arith.constant 0 : index
    %c0_146 = arith.constant 0 : index
    %295 = vector.load %arg6[%c0_145, %c0_146] : memref<128x512xf32, #tpu.memory_space<vmem>>, vector<128x512xf32>
    %cst_147 = arith.constant dense<0.000000e+00> : vector<8x512xf32>
    %296 = tpu.matmul %282, %295, %cst_147 {dimension_numbers = #tpu.dot_dimension_numbers<[1], [0], [0], [1], [0, 0, 1, 1], [], []>} : vector<8x128xf32>, vector<128x512xf32>, vector<8x512xf32> -> vector<8x512xf32>
    %297 = arith.addf %294, %296 : vector<8x512xf32>
    %298 = vector.extract_strided_slice %297 {offsets = [0, 0], sizes = [8, 128], strides = [1, 1]} : vector<8x512xf32> to vector<8x128xf32>
    %299 = arith.negf %298 : vector<8x128xf32>
    %300 = math.exp %299 : vector<8x128xf32>
    %cst_148 = arith.constant 1.000000e+00 : f32
    %301 = vector.broadcast %cst_148 : f32 to vector<8x128xf32>
    %302 = arith.addf %301, %300 : vector<8x128xf32>
    %303 = arith.divf %301, %302 : vector<8x128xf32>
    %304 = vector.extract_strided_slice %297 {offsets = [0, 128], sizes = [8, 128], strides = [1, 1]} : vector<8x512xf32> to vector<8x128xf32>
    %305 = arith.negf %304 : vector<8x128xf32>
    %306 = math.exp %305 : vector<8x128xf32>
    %cst_149 = arith.constant 1.000000e+00 : f32
    %307 = vector.broadcast %cst_149 : f32 to vector<8x128xf32>
    %308 = arith.addf %307, %306 : vector<8x128xf32>
    %309 = arith.divf %307, %308 : vector<8x128xf32>
    %310 = vector.extract_strided_slice %297 {offsets = [0, 256], sizes = [8, 128], strides = [1, 1]} : vector<8x512xf32> to vector<8x128xf32>
    %311 = math.tanh %310 : vector<8x128xf32>
    %312 = vector.extract_strided_slice %297 {offsets = [0, 384], sizes = [8, 128], strides = [1, 1]} : vector<8x512xf32> to vector<8x128xf32>
    %313 = arith.negf %312 : vector<8x128xf32>
    %314 = math.exp %313 : vector<8x128xf32>
    %cst_150 = arith.constant 1.000000e+00 : f32
    %315 = vector.broadcast %cst_150 : f32 to vector<8x128xf32>
    %316 = arith.addf %315, %314 : vector<8x128xf32>
    %317 = arith.divf %315, %316 : vector<8x128xf32>
    %318 = arith.mulf %309, %280 : vector<8x128xf32>
    %319 = arith.mulf %303, %311 : vector<8x128xf32>
    %320 = arith.addf %318, %319 : vector<8x128xf32>
    %321 = math.tanh %320 : vector<8x128xf32>
    %322 = arith.mulf %317, %321 : vector<8x128xf32>
    %c0_151 = arith.constant 0 : index
    %c0_152 = arith.constant 0 : index
    %323 = vector.load %arg7[%c0_151, %c0_152] : memref<128x128xf32, #tpu.memory_space<vmem>>, vector<128x128xf32>
    %cst_153 = arith.constant dense<0.000000e+00> : vector<8x128xf32>
    %324 = tpu.matmul %322, %323, %cst_153 {dimension_numbers = #tpu.dot_dimension_numbers<[1], [0], [0], [1], [0, 0, 1, 1], [], []>} : vector<8x128xf32>, vector<128x128xf32>, vector<8x128xf32> -> vector<8x128xf32>
    %325 = arith.addf %324, %5 : vector<8x128xf32>
    %326 = math.exp %325 : vector<8x128xf32>
    %327 = arith.select %8, %325, %326 : vector<8x128xi1>, vector<8x128xf32>
    %c0_154 = arith.constant 0 : index
    %c7_155 = arith.constant 7 : index
    %c0_156 = arith.constant 0 : index
    %c0_157 = arith.constant 0 : index
    %328 = vector.load %arg9[%c0_154, %c7_155, %c0_156, %c0_157] : memref<1x8x8x128xf32, #tpu.memory_space<vmem>>, vector<1x1x8x128xf32>
    %329 = vector.shape_cast %328 : vector<1x1x8x128xf32> to vector<8x128xf32>
    %330 = vector.shape_cast %327 : vector<8x128xf32> to vector<1x1x8x128xf32>
    tpu.vector_store %arg9[%c0_154, %c7_155, %c0_156, %c0_157], %330 {strides = array<i32>} : memref<1x8x8x128xf32, #tpu.memory_space<vmem>>, vector<1x1x8x128xf32>,
    %c0_158 = arith.constant 0 : index
    %c0_159 = arith.constant 0 : index
    %331 = vector.load %arg12[%c0_158, %c0_159] : memref<8x128xf32, #tpu.memory_space<vmem>>, vector<8x128xf32>
    tpu.vector_store %arg12[%c0_158, %c0_159], %322 {strides = array<i32>} : memref<8x128xf32, #tpu.memory_space<vmem>>, vector<8x128xf32>,
    %c0_160 = arith.constant 0 : index
    %c0_161 = arith.constant 0 : index
    %332 = vector.load %arg13[%c0_160, %c0_161] : memref<8x128xf32, #tpu.memory_space<vmem>>, vector<8x128xf32>
    tpu.vector_store %arg13[%c0_160, %c0_161], %320 {strides = array<i32>} : memref<8x128xf32, #tpu.memory_space<vmem>>, vector<8x128xf32>,
    %c0_i32_162 = arith.constant 0 : i32
    %333 = arith.cmpi eq, %arg1, %c0_i32_162 : i32
    %334 = arith.extui %333 : i1 to i32
    %c0_i32_163 = arith.constant 0 : i32
    %335 = arith.cmpi ne, %334, %c0_i32_163 : i32
    scf.if %335 {
      %c0_164 = arith.constant 0 : index
      %c0_165 = arith.constant 0 : index
      %c0_166 = arith.constant 0 : index
      %336 = vector.load %arg10[%c0_164, %c0_165, %c0_166] : memref<1x8x128xf32, #tpu.memory_space<vmem>>, vector<1x8x128xf32>
      %337 = vector.shape_cast %336 : vector<1x8x128xf32> to vector<8x128xf32>
      %338 = vector.shape_cast %322 : vector<8x128xf32> to vector<1x8x128xf32>
      tpu.vector_store %arg10[%c0_164, %c0_165, %c0_166], %338 {strides = array<i32>} : memref<1x8x128xf32, #tpu.memory_space<vmem>>, vector<1x8x128xf32>,
      %c0_167 = arith.constant 0 : index
      %c0_168 = arith.constant 0 : index
      %c0_169 = arith.constant 0 : index
      %339 = vector.load %arg11[%c0_167, %c0_168, %c0_169] : memref<1x8x128xf32, #tpu.memory_space<vmem>>, vector<1x8x128xf32>
      %340 = vector.shape_cast %339 : vector<1x8x128xf32> to vector<8x128xf32>
      %341 = vector.shape_cast %320 : vector<8x128xf32> to vector<1x8x128xf32>
      tpu.vector_store %arg11[%c0_167, %c0_168, %c0_169], %341 {strides = array<i32>} : memref<1x8x128xf32, #tpu.memory_space<vmem>>, vector<1x8x128xf32>,
    } else {
    }
    return
  }
  func.func @transform_0(%arg0: i32, %arg1: i32) -> (i32, i32, i32, i32) {
    %c0_i32 = arith.constant 0 : i32
    %c0_i32_0 = arith.constant 0 : i32
    %c0_i32_1 = arith.constant 0 : i32
    return %arg0, %arg1, %c0_i32, %c0_i32_0 : i32, i32, i32, i32
  }
  func.func @transform_1(%arg0: i32, %arg1: i32) -> (i32, i32, i32) {
    %c0_i32 = arith.constant 0 : i32
    %c0_i32_0 = arith.constant 0 : i32
    %c0_i32_1 = arith.constant 0 : i32
    return %arg0, %c0_i32, %c0_i32_0 : i32, i32, i32
  }
  func.func @transform_2(%arg0: i32, %arg1: i32) -> (i32, i32, i32) {
    %c0_i32 = arith.constant 0 : i32
    %c0_i32_0 = arith.constant 0 : i32
    %c0_i32_1 = arith.constant 0 : i32
    return %arg0, %c0_i32, %c0_i32_0 : i32, i32, i32
  }
  func.func @transform_3(%arg0: i32, %arg1: i32) -> (i32, i32) {
    %c0_i32 = arith.constant 0 : i32
    %c0_i32_0 = arith.constant 0 : i32
    %c0_i32_1 = arith.constant 0 : i32
    return %c0_i32, %c0_i32_0 : i32, i32
  }
  func.func @transform_4(%arg0: i32, %arg1: i32) -> (i32, i32) {
    %c0_i32 = arith.constant 0 : i32
    %c0_i32_0 = arith.constant 0 : i32
    %c0_i32_1 = arith.constant 0 : i32
    return %c0_i32, %c0_i32_0 : i32, i32
  }
  func.func @transform_5(%arg0: i32, %arg1: i32) -> (i32, i32) {
    %c0_i32 = arith.constant 0 : i32
    %c0_i32_0 = arith.constant 0 : i32
    %c0_i32_1 = arith.constant 0 : i32
    return %c0_i32, %c0_i32_0 : i32, i32
  }
  func.func @transform_6(%arg0: i32, %arg1: i32) -> (i32, i32) {
    %c0_i32 = arith.constant 0 : i32
    %c0_i32_0 = arith.constant 0 : i32
    %c0_i32_1 = arith.constant 0 : i32
    return %c0_i32, %c0_i32_0 : i32, i32
  }
  func.func @transform_7(%arg0: i32, %arg1: i32) -> (i32, i32, i32, i32) {
    %c0_i32 = arith.constant 0 : i32
    %c0_i32_0 = arith.constant 0 : i32
    %c0_i32_1 = arith.constant 0 : i32
    return %arg0, %arg1, %c0_i32, %c0_i32_0 : i32, i32, i32, i32
  }
  func.func @transform_8(%arg0: i32, %arg1: i32) -> (i32, i32, i32) {
    %c0_i32 = arith.constant 0 : i32
    %c0_i32_0 = arith.constant 0 : i32
    %c0_i32_1 = arith.constant 0 : i32
    return %arg0, %c0_i32, %c0_i32_0 : i32, i32, i32
  }
  func.func @transform_9(%arg0: i32, %arg1: i32) -> (i32, i32, i32) {
    %c0_i32 = arith.constant 0 : i32
    %c0_i32_0 = arith.constant 0 : i32
    %c0_i32_1 = arith.constant 0 : i32
    return %arg0, %c0_i32, %c0_i32_0 : i32, i32, i32
  }
}

</mosaic_0001>

<bundles_post_ra>
// kernel: tpu_custom_call.1
= control target key start
LH: loop header
LB: loop body
LE: loop exit
PB: predicated region body
PF: predicated region fallthrough
CT: control target
= control target key end

     0   :  { %15 = vsyncpa [#allocation5], 0  ;;  %s7930_s0 = inlined_call_operand.hbm [shape: f32[1,8,8,128], index: 0, kind: input, shape index: {}]   ;;  %s7931_s1 = inlined_call_operand.hbm [shape: f32[1,8,128], index: 1, kind: input, shape index: {}]   ;;  %s7932_s2 = inlined_call_operand.hbm [shape: f32[1,8,128], index: 2, kind: input, shape index: {}]   ;;  %s7933_s3 = inlined_call_operand.hbm [shape: f32[128,512], index: 3, kind: input, shape index: {}]   ;;  %s7934_s4 = inlined_call_operand.hbm [shape: f32[128,512], index: 4, kind: input, shape index: {}]   ;;  %s7935_s5 = inlined_call_operand.hbm [shape: f32[128,128], index: 5, kind: input, shape index: {}]   ;;  %s7936_s6 = inlined_call_operand.vmem [shape: f32[1,128], index: 6, kind: input, shape index: {}]   ;;  %s7937_s7 = inlined_call_operand.hbm [shape: f32[1,8,8,128], index: 7, kind: output, shape index: {0}]   ;;  %s7938_s8 = inlined_call_operand.hbm [shape: f32[1,8,128], index: 8, kind: output, shape index: {1}]   ;;  %s7939_s9 = inlined_call_operand.hbm [shape: f32[1,8,128], index: 9, kind: output, shape index: {2}]  }
   0x1   :  { %16 = vsyncpa [#allocation8], 0 }
   0x2   :  { %17 = vsyncpa [#allocation11], 0 }
   0x3   :  { %18 = vsyncpa [#allocation14], 0 }
   0x4   :  { %19 = vsyncpa [#allocation6], 0 }
   0x5   :  { %20 = vsyncpa [#allocation17], 0  ;;  %s5208_s30 = smov [#allocation7]   ;;  %s5209_s11 = smov [#allocation10]  }
   0x6   :  { %s39_s10 = sshll.u32 %s5208_s30, 4  ;;  %s58_s12 = sshll.u32 %s5209_s11, 4  ;;  %s40_s10 = int_to_ptr.vmem [resolvable:$true] %s39_s10  ;;  %s59_s12 = int_to_ptr.vmem [resolvable:$true] %s58_s12 }
   0x7   :  { %s5024_s13 = scalar_lea.vmem %s40_s10, 128  ;;  %p5029_p1 = scmp.lt.s32.totalorder %s40_s10, %s40_s10 }
   0x8   :  { %p5025_p0 = scmp.ne.s32.totalorder %s40_s10, %s5024_s13  ;;  %p5030_p2 = scmp.lt.s32.totalorder %s5024_s13, %s5024_s13 }
   0xa   :  { %p5031_p3 = por %p5030_p2, %p5029_p1 }
   0xc   :  { %p5032_p4 = pnand %p5031_p3, %p5025_p0 }
   0xe   :  { %5035 = shalt.err (!%p5032_p4)
}
   0xf   :  { %42 = dma.hbm_to_vmem [thread:$0]  %s7931_s1, 128, %s40_s10, [#allocation8]  }
  0x10   :  { %s5044_s16 = scalar_lea.vmem %s59_s12, 8192  ;;  %p5049_p6 = scmp.lt.s32.totalorder %s59_s12, %s59_s12 }
  0x11   :  { %p5045_p5 = scmp.ne.s32.totalorder %s59_s12, %s5044_s16  ;;  %p5050_p7 = scmp.lt.s32.totalorder %s5044_s16, %s5044_s16 }
  0x13   :  { %p5051_p8 = por %p5050_p7, %p5049_p6 }
  0x15   :  { %p5052_p9 = pnand %p5051_p8, %p5045_p5 }
  0x17   :  { %5055 = shalt.err (!%p5052_p9)
}
  0x18   :  { %s5210_s17 = smov 512   ;;  %s5211_s18 = smov 32  }
  0x19   :  { %64 = dma.hbm_to_vmem [thread:$0]  %s7933_s3, 8192, %s59_s12, [#allocation11], %s5210_s17, %s5210_s17, %s5211_s18  }
  0x1a   :  { %s5212_s21 = smov [#allocation4]  }
  0x1b   :  { %s26_s22 = sshll.u32 %s5212_s21, 4  ;;  %s27_s22 = int_to_ptr.vmem [resolvable:$true] %s26_s22 }
  0x1c   :  { %s5064_s1 = scalar_lea.vmem %s27_s22, 1024  ;;  %p5069_p11 = scmp.lt.s32.totalorder %s27_s22, %s27_s22 }
  0x1d   :  { %p5065_p10 = scmp.ne.s32.totalorder %s27_s22, %s5064_s1  ;;  %p5070_p12 = scmp.lt.s32.totalorder %s5064_s1, %s5064_s1 }
  0x1f   :  { %p5071_p13 = por %p5070_p12, %p5069_p11 }
  0x21   :  { %p5072_p0 = pnand %p5071_p13, %p5065_p10 }
  0x23   :  { %5075 = shalt.err (!%p5072_p0)
}
  0x24   :  { %s5213_s23 = smov 128   ;;  %s5214_s24 = smov 8  }
  0x25   :  { %32 = dma.hbm_to_vmem [thread:$0]  %s7930_s0, 1024, %s27_s22, [#allocation5], %s5213_s23, %s5213_s23, %s5214_s24  }
  0x26   :  { %s5215_s3 = smov [#allocation9]   ;;  %s5216_s28 = smov [#allocation12]  }
  0x27   :  { %s49_s27 = sshll.u32 %s5215_s3, 4  ;;  %s70_s29 = sshll.u32 %s5216_s28, 4  ;;  %s50_s27 = int_to_ptr.vmem [resolvable:$true] %s49_s27  ;;  %s71_s29 = int_to_ptr.vmem [resolvable:$true] %s70_s29 }
  0x28   :  { %s5084_s30 = scalar_lea.vmem %s50_s27, 128  ;;  %p5089_p2 = scmp.lt.s32.totalorder %s50_s27, %s50_s27 }
  0x29   :  { %p5085_p1 = scmp.ne.s32.totalorder %s50_s27, %s5084_s30  ;;  %p5090_p3 = scmp.lt.s32.totalorder %s5084_s30, %s5084_s30 }
  0x2b   :  { %p5091_p4 = por %p5090_p3, %p5089_p2 }
  0x2d   :  { %p5092_p5 = pnand %p5091_p4, %p5085_p1 }
  0x2f   :  { %5095 = shalt.err (!%p5092_p5)
}
  0x30   :  { %52 = dma.hbm_to_vmem [thread:$0]  %s7932_s2, 128, %s50_s27, [#allocation8]  }
  0x31   :  { %s5104_s12 = scalar_lea.vmem %s71_s29, 8192  ;;  %p5109_p7 = scmp.lt.s32.totalorder %s71_s29, %s71_s29 }
  0x32   :  { %p5105_p6 = scmp.ne.s32.totalorder %s71_s29, %s5104_s12  ;;  %p5110_p8 = scmp.lt.s32.totalorder %s5104_s12, %s5104_s12 }
  0x34   :  { %p5111_p9 = por %p5110_p8, %p5109_p7 }
  0x36   :  { %p5112_p10 = pnand %p5111_p9, %p5105_p6 }
  0x38   :  { %5115 = shalt.err (!%p5112_p10)
}
  0x39   :  { %76 = dma.hbm_to_vmem [thread:$0]  %s7934_s4, 8192, %s71_s29, [#allocation11], %s5210_s17, %s5210_s17, %s5211_s18  }
  0x3a   :  { %s5217_s14 = smov [#allocation13]  }
  0x3b   :  { %s82_s15 = sshll.u32 %s5217_s14, 4  ;;  %s83_s15 = int_to_ptr.vmem [resolvable:$true] %s82_s15 }
  0x3c   :  { %s5124_s16 = scalar_lea.vmem %s83_s15, 2048  ;;  %p5129_p12 = scmp.lt.s32.totalorder %s83_s15, %s83_s15 }
  0x3d   :  { %p5125_p11 = scmp.ne.s32.totalorder %s83_s15, %s5124_s16  ;;  %p5130_p13 = scmp.lt.s32.totalorder %s5124_s16, %s5124_s16 }
  0x3f   :  { %p5131_p0 = por %p5130_p13, %p5129_p12 }
  0x41   :  { %p5132_p1 = pnand %p5131_p0, %p5125_p11 }
  0x43   :  { %5135 = shalt.err (!%p5132_p1)
}
  0x44   :  { %88 = dma.hbm_to_vmem [thread:$0]  %s7935_s5, 2048, %s83_s15, [#allocation14], %s5213_s23, %s5213_s23, %s5214_s24  }
  0x45   :  { %5196 = dma.done.wait [#allocation5], 1024  }
  0x46   :  { %5197 = vsyncadd [#allocation5], 4294966272 }
  0x47   :  { %5198 = dma.done.wait [#allocation8], 256  }
  0x48   :  { %5199 = vsyncadd [#allocation8], 4294967040 }
  0x49   :  { %5200 = dma.done.wait [#allocation11], 16384  }
  0x4a   :  { %5201 = vsyncadd [#allocation11], 4294950912 }
  0x4b   :  { %5202 = dma.done.wait [#allocation14], 2048  }
  0x4c   :  { %5203 = vsyncadd [#allocation14], 4294965248  ;;  %v7940_v0 = vmov 0.0   ;;  %v5305_v1 = vld [vmem:[#allocation12 + $0x1e8] sm:$0xff]  ;;  %v5307_v2 = vld [vmem:[#allocation12 + $0x1f8] sm:$0xff]  ;;  %vm5219_vm0 = vmmov 0  }
  0x4d   :  { %322 = vmatprep.mubr.f32.mxu0 %v7940_v0  ;;  %393 = vmatprep.mubr.f32.mxu1 %v7940_v0  ;;  %v5309_v3 = vld [vmem:[#allocation12 + $0x1e0] sm:$0xff]  ;;  %v5313_v4 = vld [vmem:[#allocation12 + $0x1f0] sm:$0xff]  ;;  %v5315_v5 = vld [vmem:[#allocation12 + $0x1c8] sm:$0xff]  ;;  %s5220_s22 = smov [#allocation16]  }
  0x4e   :  { %258 = vmatprep.subr.mxu0 %v5305_v1  ;;  %329 = vmatprep.subr.mxu1 %v5307_v2  ;;  %v5317_v6 = vld [vmem:[#allocation12 + $0x1d8] sm:$0xff]  ;;  %v5321_v7 = vld [vmem:[#allocation12 + $0x1c0] sm:$0xff]  ;;  %v5323_v8 = vld [vmem:[#allocation12 + $0x1d0] sm:$0xff]  ;;  %s4384_s1 = sshll.u32 %s5220_s22, 4  ;;  %s4385_s1 = int_to_ptr.vmem [resolvable:$true] %s4384_s1 }
  0x4f   :  { %259 = vmatpush1.msra.mxu0 %v5309_v3  ;;  %330 = vmatpush1.msra.mxu1 %v5313_v4  ;;  %v5325_v9 = vld [vmem:[#allocation12 + $0x1a8] sm:$0xff]  ;;  %v5329_v10 = vld [vmem:[#allocation12 + $0x1b8] sm:$0xff]  ;;  %v5331_v11 = vld [vmem:[#allocation12 + $0x1a0] sm:$0xff]  ;;  %s5136_s25 = scalar_lea.vmem %s4385_s1, 128  ;;  %p5141_p3 = scmp.lt.s32.totalorder %s4385_s1, %s4385_s1 }
  0x50   :  { %260 = vmatprep.subr.mxu0 %v5315_v5  ;;  %331 = vmatprep.subr.mxu1 %v5317_v6  ;;  %v5333_v12 = vld [vmem:[#allocation12 + $0x1b0] sm:$0xff]  ;;  %v5337_v13 = vld [vmem:[#allocation12 + $0x188] sm:$0xff]  ;;  %v5339_v14 = vld [vmem:[#allocation12 + $0x198] sm:$0xff]  ;;  %p5137_p2 = scmp.ne.s32.totalorder %s4385_s1, %s5136_s25  ;;  %p5142_p4 = scmp.lt.s32.totalorder %s5136_s25, %s5136_s25 }
  0x51   :  { %261 = vmatpush1.msra.mxu0 %v5321_v7  ;;  %332 = vmatpush1.msra.mxu1 %v5323_v8  ;;  %v5343_v15 = vld [vmem:[#allocation12 + $0x180] sm:$0xff]  ;;  %v5345_v16 = vld [vmem:[#allocation12 + $0x190] sm:$0xff]  ;;  %v5349_v17 = vld [vmem:[#allocation12 + $0x168] sm:$0xff] }
  0x52   :  { %262 = vmatprep.subr.mxu0 %v5325_v9  ;;  %333 = vmatprep.subr.mxu1 %v5329_v10  ;;  %v5351_v18 = vld [vmem:[#allocation12 + $0x178] sm:$0xff]  ;;  %v5355_v19 = vld [vmem:[#allocation12 + $0x160] sm:$0xff]  ;;  %v5357_v20 = vld [vmem:[#allocation12 + $0x170] sm:$0xff]  ;;  %p5143_p5 = por %p5142_p4, %p5141_p3 }
  0x53   :  { %263 = vmatpush1.msra.mxu0 %v5331_v11  ;;  %334 = vmatpush1.msra.mxu1 %v5333_v12  ;;  %v5361_v21 = vld [vmem:[#allocation12 + $0x148] sm:$0xff]  ;;  %v5363_v22 = vld [vmem:[#allocation12 + $0x158] sm:$0xff]  ;;  %v5367_v23 = vld [vmem:[#allocation12 + $0x140] sm:$0xff] }
  0x54   :  { %264 = vmatprep.subr.mxu0 %v5337_v13  ;;  %335 = vmatprep.subr.mxu1 %v5339_v14  ;;  %v5369_v24 = vld [vmem:[#allocation12 + $0x150] sm:$0xff]  ;;  %v5373_v25 = vld [vmem:[#allocation12 + $0x128] sm:$0xff]  ;;  %v5375_v26 = vld [vmem:[#allocation12 + $0x138] sm:$0xff]  ;;  %p5144_p6 = pnand %p5143_p5, %p5137_p2 }
  0x55   :  { %265 = vmatpush1.msra.mxu0 %v5343_v15  ;;  %336 = vmatpush1.msra.mxu1 %v5345_v16  ;;  %8216 = vst [vmem:[#allocation25_spill] sm:$0xff] %v5369_v24  ;;  %8217 = vst [vmem:[#allocation26_spill] sm:$0xff] %v5375_v26  ;;  %v5379_v27 = vld [vmem:[#allocation12 + $0x120] sm:$0xff]  ;;  %v5381_v28 = vld [vmem:[#allocation12 + $0x130] sm:$0xff] }
  0x56   :  { %266 = vmatprep.subr.mxu0 %v5349_v17  ;;  %337 = vmatprep.subr.mxu1 %v5351_v18  ;;  %8218 = vst [vmem:[#allocation27_spill] sm:$0xff] %v5381_v28  ;;  %v5385_v29 = vld [vmem:[#allocation12 + $0x108] sm:$0xff]  ;;  %v5387_v30 = vld [vmem:[#allocation12 + $0x118] sm:$0xff]  ;;  %v5391_v31 = vld [vmem:[#allocation12 + $0x100] sm:$0xff] }
  0x57   :  { %267 = vmatpush1.msra.mxu0 %v5355_v19  ;;  %338 = vmatpush1.msra.mxu1 %v5357_v20  ;;  %8219 = vst [vmem:[#allocation28_spill] sm:$0xff] %v5387_v30  ;;  %v5393_v32 = vld [vmem:[#allocation12 + $0x110] sm:$0xff]  ;;  %v5397_v33 = vld [vmem:[#allocation12 + $0xe8] sm:$0xff]  ;;  %v5399_v34 = vld [vmem:[#allocation12 + $0xf8] sm:$0xff] }
  0x58   :  { %268 = vmatprep.subr.mxu0 %v5361_v21  ;;  %339 = vmatprep.subr.mxu1 %v5363_v22  ;;  %8220 = vst [vmem:[#allocation29_spill] sm:$0xff] %v5393_v32  ;;  %8221 = vst [vmem:[#allocation30_spill] sm:$0xff] %v5399_v34  ;;  %v5403_v35 = vld [vmem:[#allocation12 + $0xe0] sm:$0xff]  ;;  %v5405_v36 = vld [vmem:[#allocation12 + $0xf0] sm:$0xff] }
  0x59   :  { %269 = vmatpush1.msra.mxu0 %v5367_v23  ;;  %340 = vmatpush1.msra.mxu1 %v5369_v24  ;;  %8222 = vst [vmem:[#allocation31_spill] sm:$0xff] %v5405_v36  ;;  %v5409_v37 = vld [vmem:[#allocation12 + $0xc8] sm:$0xff]  ;;  %v5411_v38 = vld [vmem:[#allocation12 + $0xd8] sm:$0xff]  ;;  %v5415_v39 = vld [vmem:[#allocation12 + $0xc0] sm:$0xff] }
  0x5a   :  { %270 = vmatprep.subr.mxu0 %v5373_v25  ;;  %341 = vmatprep.subr.mxu1 %v5375_v26  ;;  %8223 = vst [vmem:[#allocation32_spill] sm:$0xff] %v5411_v38  ;;  %v5417_v40 = vld [vmem:[#allocation12 + $0xd0] sm:$0xff]  ;;  %v5421_v41 = vld [vmem:[#allocation12 + $0xa8] sm:$0xff]  ;;  %v5423_v42 = vld [vmem:[#allocation12 + $0xb8] sm:$0xff] }
  0x5b   :  { %271 = vmatpush1.msra.mxu0 %v5379_v27  ;;  %342 = vmatpush1.msra.mxu1 %v5381_v28  ;;  %8224 = vst [vmem:[#allocation33_spill] sm:$0xff] %v5417_v40  ;;  %8225 = vst [vmem:[#allocation34_spill] sm:$0xff] %v5423_v42  ;;  %v5427_v43 = vld [vmem:[#allocation12 + $0xa0] sm:$0xff]  ;;  %v5429_v44 = vld [vmem:[#allocation12 + $0xb0] sm:$0xff] }
  0x5c   :  { %272 = vmatprep.subr.mxu0 %v5385_v29  ;;  %343 = vmatprep.subr.mxu1 %v5387_v30  ;;  %8226 = vst [vmem:[#allocation35_spill] sm:$0xff] %v5429_v44  ;;  %v5433_v45 = vld [vmem:[#allocation12 + $0x88] sm:$0xff]  ;;  %v5435_v46 = vld [vmem:[#allocation12 + $0x98] sm:$0xff]  ;;  %v5439_v47 = vld [vmem:[#allocation12 + $0x80] sm:$0xff] }
  0x5d   :  { %273 = vmatpush1.msra.mxu0 %v5391_v31  ;;  %344 = vmatpush1.msra.mxu1 %v5393_v32  ;;  %8227 = vst [vmem:[#allocation36_spill] sm:$0xff] %v5435_v46  ;;  %v5441_v48 = vld [vmem:[#allocation12 + $0x90] sm:$0xff]  ;;  %v5445_v49 = vld [vmem:[#allocation12 + $0x68] sm:$0xff]  ;;  %v5447_v50 = vld [vmem:[#allocation12 + $0x78] sm:$0xff] }
  0x5e   :  { %274 = vmatprep.subr.mxu0 %v5397_v33  ;;  %345 = vmatprep.subr.mxu1 %v5399_v34  ;;  %8228 = vst [vmem:[#allocation37_spill] sm:$0xff] %v5441_v48  ;;  %8229 = vst [vmem:[#allocation38_spill] sm:$0xff] %v5447_v50  ;;  %v5451_v51 = vld [vmem:[#allocation12 + $0x60] sm:$0xff]  ;;  %v5453_v52 = vld [vmem:[#allocation12 + $0x70] sm:$0xff] }
  0x5f   :  { %275 = vmatpush1.msra.mxu0 %v5403_v35  ;;  %346 = vmatpush1.msra.mxu1 %v5405_v36  ;;  %8230 = vst [vmem:[#allocation39_spill] sm:$0xff] %v5453_v52  ;;  %v5457_v53 = vld [vmem:[#allocation12 + $0x48] sm:$0xff]  ;;  %v5459_v54 = vld [vmem:[#allocation12 + $0x58] sm:$0xff]  ;;  %v5463_v55 = vld [vmem:[#allocation12 + $0x40] sm:$0xff] }
  0x60   :  { %276 = vmatprep.subr.mxu0 %v5409_v37  ;;  %347 = vmatprep.subr.mxu1 %v5411_v38  ;;  %8231 = vst [vmem:[#allocation40_spill] sm:$0xff] %v5459_v54  ;;  %v5465_v56 = vld [vmem:[#allocation12 + $0x50] sm:$0xff]  ;;  %v5469_v57 = vld [vmem:[#allocation12 + $0x28] sm:$0xff]  ;;  %v5471_v58 = vld [vmem:[#allocation12 + $0x38] sm:$0xff] }
  0x61   :  { %277 = vmatpush1.msra.mxu0 %v5415_v39  ;;  %348 = vmatpush1.msra.mxu1 %v5417_v40  ;;  %8232 = vst [vmem:[#allocation41_spill] sm:$0xff] %v5465_v56  ;;  %8233 = vst [vmem:[#allocation42_spill] sm:$0xff] %v5471_v58  ;;  %v5475_v59 = vld [vmem:[#allocation12 + $0x20] sm:$0xff]  ;;  %v5477_v60 = vld [vmem:[#allocation12 + $0x30] sm:$0xff] }
  0x62   :  { %278 = vmatprep.subr.mxu0 %v5421_v41  ;;  %349 = vmatprep.subr.mxu1 %v5423_v42  ;;  %8234 = vst [vmem:[#allocation43_spill] sm:$0xff] %v5477_v60  ;;  %v5481_v61 = vld [vmem:[#allocation12 + $0x8] sm:$0xff]  ;;  %v5483_v62 = vld [vmem:[#allocation12 + $0x18] sm:$0xff]  ;;  %v5487_v63 = vld [vmem:[#allocation12] sm:$0xff] }
  0x63   :  { %279 = vmatpush1.msra.mxu0 %v5427_v43  ;;  %350 = vmatpush1.msra.mxu1 %v5429_v44  ;;  %8235 = vst [vmem:[#allocation44_spill] sm:$0xff] %v5483_v62  ;;  %v5489_v0 = vld [vmem:[#allocation12 + $0x10] sm:$0xff]  ;;  %v5519_v44 = vld [vmem:[#allocation10 + $0x1b8] sm:$0xff]  ;;  %v5523_v42 = vld [vmem:[#allocation10 + $0x1a0] sm:$0xff] }
  0x64   :  { %280 = vmatprep.subr.mxu0 %v5433_v45  ;;  %351 = vmatprep.subr.mxu1 %v5435_v46  ;;  %8236 = vst [vmem:[#allocation45_spill] sm:$0xff] %v5489_v0  ;;  %v5513_v46 = vld [vmem:[#allocation10 + $0x1d0] sm:$0xff]  ;;  %8241 = vst [vmem:[#allocation50_spill] sm:$0xff] %v5519_v44  ;;  %v5531_v40 = vld [vmem:[#allocation10 + $0x198] sm:$0xff] }
  0x65   :  { %281 = vmatpush1.msra.mxu0 %v5439_v47  ;;  %352 = vmatpush1.msra.mxu1 %v5441_v48  ;;  %v5508_v48 = vld [vmem:[#allocation10 + $0x1d8] sm:$0xff]  ;;  %8240 = vst [vmem:[#allocation49_spill] sm:$0xff] %v5513_v46  ;;  %8243 = vst [vmem:[#allocation52_spill] sm:$0xff] %v5531_v40  ;;  %v5537_v38 = vld [vmem:[#allocation10 + $0x190] sm:$0xff] }
  0x66   :  { %282 = vmatprep.subr.mxu0 %v5445_v49  ;;  %353 = vmatprep.subr.mxu1 %v5447_v50  ;;  %v5503_v50 = vld [vmem:[#allocation10 + $0x1f0] sm:$0xff]  ;;  %8239 = vst [vmem:[#allocation48_spill] sm:$0xff] %v5508_v48  ;;  %8244 = vst [vmem:[#allocation53_spill] sm:$0xff] %v5537_v38  ;;  %v5543_v36 = vld [vmem:[#allocation10 + $0x178] sm:$0xff] }
  0x67   :  { %283 = vmatpush1.msra.mxu0 %v5451_v51  ;;  %354 = vmatpush1.msra.mxu1 %v5453_v52  ;;  %v5493_v52 = vld [vmem:[#allocation10 + $0x1e8] sm:$0xff]  ;;  %8238 = vst [vmem:[#allocation47_spill] sm:$0xff] %v5503_v50  ;;  %8245 = vst [vmem:[#allocation54_spill] sm:$0xff] %v5543_v36  ;;  %v5549_v34 = vld [vmem:[#allocation10 + $0x170] sm:$0xff] }
  0x68   :  { %284 = vmatprep.subr.mxu0 %v5457_v53  ;;  %355 = vmatprep.subr.mxu1 %v5459_v54  ;;  %v113_v54 = vld [vmem:[#allocation7] sm:$0xff]  ;;  %8246 = vst [vmem:[#allocation55_spill] sm:$0xff] %v5549_v34  ;;  %v5555_v32 = vld [vmem:[#allocation10 + $0x158] sm:$0xff] }
  0x69   :  { %285 = vmatpush1.msra.mxu0 %v5463_v55  ;;  %356 = vmatpush1.msra.mxu1 %v5465_v56  ;;  %v5497_v56 = vld [vmem:[#allocation10 + $0x1f8] sm:$0xff]  ;;  %8248 = vst [vmem:[#allocation57_spill] sm:$0xff] %v5555_v32  ;;  %v5561_v30 = vld [vmem:[#allocation10 + $0x150] sm:$0xff] }
  0x6a   :  { %286 = vmatprep.subr.mxu0 %v5469_v57  ;;  %357 = vmatprep.subr.mxu1 %v5471_v58  ;;  %8237 = vst [vmem:[#allocation46_spill] sm:$0xff] %v5497_v56  ;;  %v5501_v58 = vld [vmem:[#allocation10 + $0x1e0] sm:$0xff]  ;;  %8250 = vst [vmem:[#allocation59_spill] sm:$0xff] %v5561_v30  ;;  %v5567_v28 = vld [vmem:[#allocation10 + $0x138] sm:$0xff] }
  0x6b   :  { %287 = vmatpush1.msra.mxu0 %v5475_v59  ;;  %358 = vmatpush1.msra.mxu1 %v5477_v60  ;;  %v5506_v60 = vld [vmem:[#allocation10 + $0x1c8] sm:$0xff]  ;;  %8252 = vst [vmem:[#allocation61_spill] sm:$0xff] %v5567_v28  ;;  %v5573_v26 = vld [vmem:[#allocation10 + $0x130] sm:$0xff]  ;;  %v5579_v24 = vld [vmem:[#allocation10 + $0x118] sm:$0xff] }
  0x6c   :  { %288 = vmatprep.subr.mxu0 %v5481_v61  ;;  %359 = vmatprep.subr.mxu1 %v5483_v62  ;;  %v5511_v62 = vld [vmem:[#allocation10 + $0x1c0] sm:$0xff]  ;;  %8254 = vst [vmem:[#allocation63_spill] sm:$0xff] %v5573_v26  ;;  %8256 = vst [vmem:[#allocation65_spill] sm:$0xff] %v5579_v24 }
  0x6d   :  { %289 = vmatpush1.msra.mxu0 %v5487_v63  ;;  %360 = vmatpush1.msra.mxu1 %v5489_v0  ;;  %v5517_v0 = vld [vmem:[#allocation10 + $0x1a8] sm:$0xff] }
  0x6e   :  { %323 = vmatmul.mubr.f32.vlgmr.msra.gmra.mxu0 %v113_v54  ;;  %400 = vmatprep.subr.mxu0 %v5493_v52 }
  0x6f   :  { %471 = vmatprep.subr.mxu1 %v5497_v56  ;;  %394 = vmatmul.mubr.f32.vlgmr.msra.gmra.mxu1 %v113_v54  ;;  %v5525_v56 = vld [vmem:[#allocation10 + $0x1b0] sm:$0xff]  ;;  %v5529_v54 = vld [vmem:[#allocation10 + $0x188] sm:$0xff] }
  0x70   :  { %401 = vmatpush1.msra.mxu0 %v5501_v58  ;;  %472 = vmatpush1.msra.mxu1 %v5503_v50  ;;  %8242 = vst [vmem:[#allocation51_spill] sm:$0xff] %v5525_v56  ;;  %v5535_v50 = vld [vmem:[#allocation10 + $0x180] sm:$0xff] }
  0x71   :  { %402 = vmatprep.subr.mxu0 %v5506_v60  ;;  %473 = vmatprep.subr.mxu1 %v5508_v48  ;;  %v5541_v48 = vld [vmem:[#allocation10 + $0x168] sm:$0xff] }
  0x72   :  { %403 = vmatpush1.msra.mxu0 %v5511_v62  ;;  %474 = vmatpush1.msra.mxu1 %v5513_v46  ;;  %v5547_v46 = vld [vmem:[#allocation10 + $0x160] sm:$0xff] }
  0x73   :  { %404 = vmatprep.subr.mxu0 %v5517_v0  ;;  %475 = vmatprep.subr.mxu1 %v5519_v44  ;;  %v5553_v44 = vld [vmem:[#allocation10 + $0x148] sm:$0xff] }
  0x74   :  { %405 = vmatpush1.msra.mxu0 %v5523_v42  ;;  %476 = vmatpush1.msra.mxu1 %v5525_v56  ;;  %8247 = vst [vmem:[#allocation56_spill] sm:$0xff] %v5553_v44  ;;  %v5559_v56 = vld [vmem:[#allocation10 + $0x140] sm:$0xff] }
  0x75   :  { %406 = vmatprep.subr.mxu0 %v5529_v54  ;;  %477 = vmatprep.subr.mxu1 %v5531_v40  ;;  %8249 = vst [vmem:[#allocation58_spill] sm:$0xff] %v5559_v56  ;;  %v5565_v40 = vld [vmem:[#allocation10 + $0x128] sm:$0xff] }
  0x76   :  { %407 = vmatpush1.msra.mxu0 %v5535_v50  ;;  %478 = vmatpush1.msra.mxu1 %v5537_v38  ;;  %8251 = vst [vmem:[#allocation60_spill] sm:$0xff] %v5565_v40  ;;  %v5571_v38 = vld [vmem:[#allocation10 + $0x120] sm:$0xff] }
  0x77   :  { %408 = vmatprep.subr.mxu0 %v5541_v48  ;;  %479 = vmatprep.subr.mxu1 %v5543_v36  ;;  %8253 = vst [vmem:[#allocation62_spill] sm:$0xff] %v5571_v38  ;;  %v5577_v36 = vld [vmem:[#allocation10 + $0x108] sm:$0xff] }
  0x78   :  { %409 = vmatpush1.msra.mxu0 %v5547_v46  ;;  %480 = vmatpush1.msra.mxu1 %v5549_v34  ;;  %8255 = vst [vmem:[#allocation64_spill] sm:$0xff] %v5577_v36  ;;  %v5583_v34 = vld [vmem:[#allocation10 + $0x100] sm:$0xff] }
  0x79   :  { %410 = vmatprep.subr.mxu0 %v5553_v44  ;;  %481 = vmatprep.subr.mxu1 %v5555_v32  ;;  %8257 = vst [vmem:[#allocation66_spill] sm:$0xff] %v5583_v34  ;;  %v5585_v44 = vld [vmem:[#allocation10 + $0x110] sm:$0xff]  ;;  %v5589_v32 = vld [vmem:[#allocation10 + $0xe8] sm:$0xff] }
  0x7a   :  { %411 = vmatpush1.msra.mxu0 %v5559_v56  ;;  %482 = vmatpush1.msra.mxu1 %v5561_v30  ;;  %8258 = vst [vmem:[#allocation67_spill] sm:$0xff] %v5585_v44  ;;  %8259 = vst [vmem:[#allocation68_spill] sm:$0xff] %v5589_v32  ;;  %v5591_v56 = vld [vmem:[#allocation10 + $0xf8] sm:$0xff]  ;;  %v5595_v30 = vld [vmem:[#allocation10 + $0xe0] sm:$0xff] }
  0x7b   :  { %412 = vmatprep.subr.mxu0 %v5565_v40  ;;  %483 = vmatprep.subr.mxu1 %v5567_v28  ;;  %8260 = vst [vmem:[#allocation69_spill] sm:$0xff] %v5591_v56  ;;  %8261 = vst [vmem:[#allocation70_spill] sm:$0xff] %v5595_v30  ;;  %v5597_v40 = vld [vmem:[#allocation10 + $0xf0] sm:$0xff]  ;;  %v5601_v28 = vld [vmem:[#allocation10 + $0xc8] sm:$0xff] }
  0x7c   :  { %413 = vmatpush1.msra.mxu0 %v5571_v38  ;;  %484 = vmatpush1.msra.mxu1 %v5573_v26  ;;  %8262 = vst [vmem:[#allocation71_spill] sm:$0xff] %v5597_v40  ;;  %8263 = vst [vmem:[#allocation72_spill] sm:$0xff] %v5601_v28  ;;  %v5603_v38 = vld [vmem:[#allocation10 + $0xd8] sm:$0xff]  ;;  %v5607_v26 = vld [vmem:[#allocation10 + $0xc0] sm:$0xff] }
  0x7d   :  { %414 = vmatprep.subr.mxu0 %v5577_v36  ;;  %485 = vmatprep.subr.mxu1 %v5579_v24  ;;  %8264 = vst [vmem:[#allocation73_spill] sm:$0xff] %v5603_v38  ;;  %8265 = vst [vmem:[#allocation74_spill] sm:$0xff] %v5607_v26  ;;  %v5609_v36 = vld [vmem:[#allocation10 + $0xd0] sm:$0xff]  ;;  %v5613_v24 = vld [vmem:[#allocation10 + $0xa8] sm:$0xff] }
  0x7e   :  { %415 = vmatpush1.msra.mxu0 %v5583_v34  ;;  %486 = vmatpush1.msra.mxu1 %v5585_v44  ;;  %8266 = vst [vmem:[#allocation75_spill] sm:$0xff] %v5609_v36  ;;  %8267 = vst [vmem:[#allocation76_spill] sm:$0xff] %v5613_v24  ;;  %v5615_v34 = vld [vmem:[#allocation10 + $0xb8] sm:$0xff]  ;;  %v5619_v44 = vld [vmem:[#allocation10 + $0xa0] sm:$0xff] }
  0x7f   :  { %416 = vmatprep.subr.mxu0 %v5589_v32  ;;  %487 = vmatprep.subr.mxu1 %v5591_v56  ;;  %8268 = vst [vmem:[#allocation77_spill] sm:$0xff] %v5615_v34  ;;  %8269 = vst [vmem:[#allocation78_spill] sm:$0xff] %v5619_v44  ;;  %v5621_v32 = vld [vmem:[#allocation10 + $0xb0] sm:$0xff]  ;;  %v5625_v56 = vld [vmem:[#allocation10 + $0x88] sm:$0xff] }
  0x80   :  { %417 = vmatpush1.msra.mxu0 %v5595_v30  ;;  %488 = vmatpush1.msra.mxu1 %v5597_v40  ;;  %8270 = vst [vmem:[#allocation79_spill] sm:$0xff] %v5621_v32  ;;  %8271 = vst [vmem:[#allocation80_spill] sm:$0xff] %v5625_v56  ;;  %v5627_v30 = vld [vmem:[#allocation10 + $0x98] sm:$0xff]  ;;  %v5631_v40 = vld [vmem:[#allocation10 + $0x80] sm:$0xff] }
  0x81   :  { %418 = vmatprep.subr.mxu0 %v5601_v28  ;;  %489 = vmatprep.subr.mxu1 %v5603_v38  ;;  %8272 = vst [vmem:[#allocation81_spill] sm:$0xff] %v5627_v30  ;;  %8273 = vst [vmem:[#allocation82_spill] sm:$0xff] %v5631_v40  ;;  %v5633_v28 = vld [vmem:[#allocation10 + $0x90] sm:$0xff]  ;;  %v5637_v38 = vld [vmem:[#allocation10 + $0x68] sm:$0xff] }
  0x82   :  { %419 = vmatpush1.msra.mxu0 %v5607_v26  ;;  %490 = vmatpush1.msra.mxu1 %v5609_v36  ;;  %8274 = vst [vmem:[#allocation83_spill] sm:$0xff] %v5633_v28  ;;  %8275 = vst [vmem:[#allocation84_spill] sm:$0xff] %v5637_v38  ;;  %v5639_v26 = vld [vmem:[#allocation10 + $0x78] sm:$0xff]  ;;  %v5643_v36 = vld [vmem:[#allocation10 + $0x60] sm:$0xff] }
  0x83   :  { %420 = vmatprep.subr.mxu0 %v5613_v24  ;;  %491 = vmatprep.subr.mxu1 %v5615_v34  ;;  %8276 = vst [vmem:[#allocation85_spill] sm:$0xff] %v5639_v26  ;;  %8277 = vst [vmem:[#allocation86_spill] sm:$0xff] %v5643_v36  ;;  %v5645_v24 = vld [vmem:[#allocation10 + $0x70] sm:$0xff]  ;;  %v5649_v34 = vld [vmem:[#allocation10 + $0x48] sm:$0xff] }
  0x84   :  { %421 = vmatpush1.msra.mxu0 %v5619_v44  ;;  %492 = vmatpush1.msra.mxu1 %v5621_v32  ;;  %8278 = vst [vmem:[#allocation87_spill] sm:$0xff] %v5645_v24  ;;  %v5651_v44 = vld [vmem:[#allocation10 + $0x58] sm:$0xff]  ;;  %v5655_v32 = vld [vmem:[#allocation10 + $0x40] sm:$0xff] }
  0x85   :  { %422 = vmatprep.subr.mxu0 %v5625_v56  ;;  %493 = vmatprep.subr.mxu1 %v5627_v30  ;;  %8279 = vst [vmem:[#allocation88_spill] sm:$0xff] %v5651_v44  ;;  %8280 = vst [vmem:[#allocation89_spill] sm:$0xff] %v5655_v32  ;;  %v5657_v56 = vld [vmem:[#allocation10 + $0x50] sm:$0xff]  ;;  %v5661_v30 = vld [vmem:[#allocation10 + $0x28] sm:$0xff] }
  0x86   :  { %423 = vmatpush1.msra.mxu0 %v5631_v40  ;;  %494 = vmatpush1.msra.mxu1 %v5633_v28  ;;  %8281 = vst [vmem:[#allocation90_spill] sm:$0xff] %v5657_v56  ;;  %v5663_v40 = vld [vmem:[#allocation10 + $0x38] sm:$0xff]  ;;  %v5667_v28 = vld [vmem:[#allocation10 + $0x20] sm:$0xff] }
  0x87   :  { %424 = vmatprep.subr.mxu0 %v5637_v38  ;;  %495 = vmatprep.subr.mxu1 %v5639_v26  ;;  %v5669_v38 = vld [vmem:[#allocation10 + $0x30] sm:$0xff]  ;;  %v5673_v26 = vld [vmem:[#allocation10 + $0x8] sm:$0xff] }
  0x88   :  { %425 = vmatpush1.msra.mxu0 %v5643_v36  ;;  %496 = vmatpush1.msra.mxu1 %v5645_v24  ;;  %v5675_v36 = vld [vmem:[#allocation10 + $0x18] sm:$0xff]  ;;  %v5679_v24 = vld [vmem:[#allocation10] sm:$0xff] }
  0x89   :  { %426 = vmatprep.subr.mxu0 %v5649_v34  ;;  %497 = vmatprep.subr.mxu1 %v5651_v44  ;;  %v5683_v44 = vld [vmem:[#allocation10 + $0x10] sm:$0xff] }
  0x8a   :  { %427 = vmatpush1.msra.mxu0 %v5655_v32  ;;  %498 = vmatpush1.msra.mxu1 %v5657_v56  ;;  %v129_v56 = vld [vmem:[#allocation4] sm:$0xff]  ;;  %v8282_v32 = vmov 0.0  }
  0x8b   :  { %428 = vmatprep.subr.mxu0 %v5661_v30  ;;  %499 = vmatprep.subr.mxu1 %v5663_v40 }
  0x8c   :  { %429 = vmatpush1.msra.mxu0 %v5667_v28  ;;  %500 = vmatpush1.msra.mxu1 %v5669_v38 }
  0x8d   :  { %430 = vmatprep.subr.mxu0 %v5673_v26  ;;  %501 = vmatprep.subr.mxu1 %v5675_v36 }
  0x8e   :  { %431 = vmatpush1.msra.mxu0 %v5679_v24  ;;  %464 = vmatprep.mubr.f32.mxu0 %v8282_v32 }
  0x8f   :  { %502 = vmatpush1.msra.mxu1 %v5683_v44  ;;  %535 = vmatprep.mubr.f32.mxu1 %v8282_v32 }
  0x90   :  { %465 = vmatmul.mubr.f32.vlgmr.msra.gmra.mxu0 %v129_v56  ;;  %536 = vmatmul.mubr.f32.vlgmr.msra.gmra.mxu1 %v129_v56 }
  0x91   :  { %4574 = vmatprep.subr.mxu0 %v8282_v32  ;;  %786 = vmatprep.subr.mxu1 %v5305_v1  ;;  %v5726_v1 = vld [vmem:[#allocation13 + $0x78] sm:$0xff] }
  0x92   :  { %787 = vmatpush1.msra.mxu1 %v5309_v3  ;;  %850 = vmatprep.mubr.f32.mxu1 %v8282_v32  ;;  %v5730_v3 = vld [vmem:[#allocation13 + $0x70] sm:$0xff] }
  0x93   :  { %788 = vmatprep.subr.mxu1 %v5315_v5  ;;  %4575 = vmatpush3.msra.mxu0 %v5726_v1  ;;  %v5734_v5 = vld [vmem:[#allocation13 + $0x68] sm:$0xff] }
  0x94   :  { %789 = vmatpush1.msra.mxu1 %v5321_v7  ;;  %4576 = vmatprep.subr.mxu0 %v8282_v32  ;;  %v5738_v7 = vld [vmem:[#allocation13 + $0x60] sm:$0xff] }
  0x95   :  { %790 = vmatprep.subr.mxu1 %v5325_v9  ;;  %4577 = vmatpush3.msra.mxu0 %v5730_v3  ;;  %v5742_v9 = vld [vmem:[#allocation13 + $0x58] sm:$0xff] }
  0x96   :  { %791 = vmatpush1.msra.mxu1 %v5331_v11  ;;  %4578 = vmatprep.subr.mxu0 %v8282_v32  ;;  %v5746_v11 = vld [vmem:[#allocation13 + $0x50] sm:$0xff] }
  0x97   :  { %792 = vmatprep.subr.mxu1 %v5337_v13  ;;  %4579 = vmatpush3.msra.mxu0 %v5734_v5  ;;  %v5750_v13 = vld [vmem:[#allocation13 + $0x48] sm:$0xff] }
  0x98   :  { %793 = vmatpush1.msra.mxu1 %v5343_v15  ;;  %4580 = vmatprep.subr.mxu0 %v8282_v32  ;;  %v5754_v15 = vld [vmem:[#allocation13 + $0x40] sm:$0xff] }
  0x99   :  { %794 = vmatprep.subr.mxu1 %v5349_v17  ;;  %4581 = vmatpush3.msra.mxu0 %v5738_v7  ;;  %v5756_v17 = vld [vmem:[#allocation13 + $0x38] sm:$0xff] }
  0x9a   :  { %795 = vmatpush1.msra.mxu1 %v5355_v19  ;;  %4582 = vmatprep.subr.mxu0 %v8282_v32  ;;  %v5762_v19 = vld [vmem:[#allocation13 + $0x30] sm:$0xff] }
  0x9b   :  { %796 = vmatprep.subr.mxu1 %v5361_v21  ;;  %4583 = vmatpush3.msra.mxu0 %v5742_v9  ;;  %v5766_v21 = vld [vmem:[#allocation13 + $0x28] sm:$0xff] }
  0x9c   :  { %797 = vmatpush1.msra.mxu1 %v5367_v23  ;;  %4584 = vmatprep.subr.mxu0 %v8282_v32  ;;  %v5770_v23 = vld [vmem:[#allocation13 + $0x20] sm:$0xff] }
  0x9d   :  { %798 = vmatprep.subr.mxu1 %v5373_v25  ;;  %4585 = vmatpush3.msra.mxu0 %v5746_v11  ;;  %v5774_v25 = vld [vmem:[#allocation13 + $0x18] sm:$0xff] }
  0x9e   :  { %799 = vmatpush1.msra.mxu1 %v5379_v27  ;;  %4586 = vmatprep.subr.mxu0 %v8282_v32  ;;  %v5778_v27 = vld [vmem:[#allocation13 + $0x10] sm:$0xff] }
  0x9f   :  { %800 = vmatprep.subr.mxu1 %v5385_v29  ;;  %4587 = vmatpush3.msra.mxu0 %v5750_v13  ;;  %v5782_v29 = vld [vmem:[#allocation13 + $0x8] sm:$0xff] }
  0xa0   :  { %801 = vmatpush1.msra.mxu1 %v5391_v31  ;;  %4588 = vmatprep.subr.mxu0 %v8282_v32  ;;  %v5786_v31 = vld [vmem:[#allocation13] sm:$0xff] }
  0xa1   :  { %802 = vmatprep.subr.mxu1 %v5397_v33  ;;  %4589 = vmatpush3.msra.mxu0 %v5754_v15  ;;  %8283 = vst [vmem:[#allocation91_spill] sm:$0xff] %v5786_v31 }
  0xa2   :  { %803 = vmatpush1.msra.mxu1 %v5403_v35  ;;  %4606 = vmatprep.mubr.msk.f32.mxu0 %vm5219_vm0, %v8282_v32 }
  0xa3   :  { %804 = vmatprep.subr.mxu1 %v5409_v37  ;;  %4590 = vmatprep.subr.mxu0 %v8282_v32 }
  0xa4   :  { %805 = vmatpush1.msra.mxu1 %v5415_v39  ;;  %4591 = vmatpush3.msra.mxu0 %v5756_v17 }
  0xa5   :  { %806 = vmatprep.subr.mxu1 %v5421_v41  ;;  %4592 = vmatprep.subr.mxu0 %v8282_v32 }
  0xa6   :  { %807 = vmatpush1.msra.mxu1 %v5427_v43  ;;  %4593 = vmatpush3.msra.mxu0 %v5762_v19 }
  0xa7   :  { %808 = vmatprep.subr.mxu1 %v5433_v45  ;;  %4594 = vmatprep.subr.mxu0 %v8282_v32 }
  0xa8   :  { %809 = vmatpush1.msra.mxu1 %v5439_v47  ;;  %4595 = vmatpush3.msra.mxu0 %v5766_v21 }
  0xa9   :  { %810 = vmatprep.subr.mxu1 %v5445_v49  ;;  %4596 = vmatprep.subr.mxu0 %v8282_v32 }
  0xaa   :  { %811 = vmatpush1.msra.mxu1 %v5451_v51  ;;  %4597 = vmatpush3.msra.mxu0 %v5770_v23 }
  0xab   :  { %812 = vmatprep.subr.mxu1 %v5457_v53  ;;  %4598 = vmatprep.subr.mxu0 %v8282_v32 }
  0xac   :  { %813 = vmatpush1.msra.mxu1 %v5463_v55  ;;  %4599 = vmatpush3.msra.mxu0 %v5774_v25 }
  0xad   :  { %814 = vmatprep.subr.mxu1 %v5469_v57  ;;  %4600 = vmatprep.subr.mxu0 %v8282_v32 }
  0xae   :  { %815 = vmatpush1.msra.mxu1 %v5475_v59  ;;  %4601 = vmatpush3.msra.mxu0 %v5778_v27 }
  0xaf   :  { %816 = vmatprep.subr.mxu1 %v5481_v61  ;;  %4602 = vmatprep.subr.mxu0 %v8282_v32 }
  0xb0   :  { %817 = vmatpush1.msra.mxu1 %v5487_v63  ;;  %4603 = vmatpush3.msra.mxu0 %v5782_v29 }
  0xb1   :  { %928 = vmatprep.subr.mxu1 %v5493_v52  ;;  %4604 = vmatprep.subr.mxu0 %v8282_v32 }
  0xb2   :  { %4605 = vmatpush3.msra.mxu0 %v5786_v31 }
  0xb3   :  { %857 = vmatprep.subr.mxu0 %v5307_v2 }
 0x12e   :  { %v324_v33 = vpop.f32.mrf.mxu0 }
 0x12f   :  { %v395_v37 = vpop.f32.mrf.mxu1 }
 0x130   :  { %v326_v35 = vpop.f32.mrf.mxu0 }
 0x131   :  { %v397_v45 = vpop.f32.mrf.mxu1 }
 0x150   :  { %v466_v39 = vpop.f32.mrf.mxu0  ;;  %v537_v51 = vpop.f32.mrf.mxu1 }
 0x151   :  { %v467_v41 = vadd.f32 %v466_v39, %v324_v33  ;;  %v538_v59 = vadd.f32 %v537_v51, %v395_v37 }
 0x152   :  { %v468_v43 = vpop.f32.mrf.mxu0  ;;  %v539_v53 = vpop.f32.mrf.mxu1 }
 0x153   :  { %v4414_v47 = vmul.f32 -1.442695, %v467_v41  ;;  %v469_v49 = vadd.f32 %v468_v43, %v326_v35  ;;  %v540_v55 = vadd.f32 %v539_v53, %v397_v45  ;;  %v115_v41 = vld [vmem:[#allocation9] sm:$0xff] }
 0x154   :  { %v8303_v53 = vld [vmem:[#allocation34_spill] sm:$0xff] }
 0x155   :  { %4869 = vpow2.f32 %v4414_v47  ;;  %v4415_v52 = vmul.f32 -1.442695, %v469_v49  ;;  %v4416_v56 = vmul.f32 -1.442695, %v540_v55  ;;  %v8304_v55 = vld [vmem:[#allocation76_spill] sm:$0xff] }
 0x157   :  { %4871 = vpow2.f32 %v4415_v52 }
 0x158   :  { %4873 = vpow2.f32 %v4416_v56  ;;  %v8305_v56 = vld [vmem:[#allocation35_spill] sm:$0xff] }
 0x162   :  { %v4870_v57 = vpop.eup %4869 }
 0x163   :  { %v545_v61 = vadd.f32 1.0, %v4870_v57  ;;  %v8306_v57 = vld [vmem:[#allocation78_spill] sm:$0xff] }
 0x164   :  { %v4872_v2 = vpop.eup %4871 }
 0x165   :  { %4875 = vrcp.f32 %v545_v61  ;;  %v551_v63 = vadd.f32 1.0, %v4872_v2  ;;  %v4874_v33 = vpop.eup %4873  ;;  %v8308_v61 = vld [vmem:[#allocation80_spill] sm:$0xff]  ;;  %v8309_v2 = vld [vmem:[#allocation37_spill] sm:$0xff] }
 0x166   :  { %4877 = vtanh.f32 %v538_v59  ;;  %v558_v47 = vadd.f32 1.0, %v4874_v33  ;;  %v8307_v59 = vld [vmem:[#allocation36_spill] sm:$0xff]  ;;  %v8311_v33 = vld [vmem:[#allocation38_spill] sm:$0xff] }
 0x167   :  { %4879 = vrcp.f32 %v551_v63  ;;  %v8310_v63 = vld [vmem:[#allocation82_spill] sm:$0xff] }
 0x168   :  { %4881 = vrcp.f32 %v558_v47  ;;  %v8316_v47 = vld [vmem:[#allocation41_spill] sm:$0xff] }
 0x172   :  { %v4876_v39 = vpop.eup %4875 }
 0x173   :  { %v4878_v35 = vpop.eup %4877 }
 0x174   :  { %v4880_v43 = vpop.eup %4879  ;;  %v562_v49 = vmul.f32 %v4878_v35, %v4876_v39  ;;  %v8312_v39 = vld [vmem:[#allocation84_spill] sm:$0xff]  ;;  %v8314_v35 = vld [vmem:[#allocation86_spill] sm:$0xff] }
 0x175   :  { %v561_v52 = vmul.f32 %v4880_v43, %v115_v41  ;;  %v4882_v37 = vpop.eup %4881  ;;  %v8313_v41 = vld [vmem:[#allocation39_spill] sm:$0xff]  ;;  %v8315_v43 = vld [vmem:[#allocation40_spill] sm:$0xff] }
 0x177   :  { %v5792_v31 = vadd.f32 %v562_v49, %v561_v52  ;;  %v8317_v49 = vld [vmem:[#allocation89_spill] sm:$0xff]  ;;  %v8318_v52 = vld [vmem:[#allocation42_spill] sm:$0xff] }
 0x179   :  { %4883 = vtanh.f32 %v5792_v31 }
 0x186   :  { %v4884_v45 = vpop.eup %4883 }
 0x187   :  { %v5795_v51 = vmul.f32 %v4884_v45, %v4882_v37  ;;  %v8319_v37 = vld [vmem:[#allocation43_spill] sm:$0xff]  ;;  %v8320_v45 = vld [vmem:[#allocation44_spill] sm:$0xff] }
 0x189   :  { %4607 = vmatmul.mubr.f32.vlgmr.msra.gmra.mxu0 %v5795_v51  ;;  %851 = vmatmul.mubr.f32.vlgmr.msra.gmra.mxu1 %v5795_v51 }
 0x18a   :  { %858 = vmatpush1.msra.mxu0 %v5313_v4  ;;  %929 = vmatpush1.msra.mxu1 %v5501_v58  ;;  %v8285_v4 = vld [vmem:[#allocation25_spill] sm:$0xff]  ;;  %v8299_v58 = vld [vmem:[#allocation32_spill] sm:$0xff] }
 0x18b   :  { %859 = vmatprep.subr.mxu0 %v5317_v6  ;;  %930 = vmatprep.subr.mxu1 %v5506_v60  ;;  %v8286_v6 = vld [vmem:[#allocation58_spill] sm:$0xff]  ;;  %v8300_v60 = vld [vmem:[#allocation72_spill] sm:$0xff] }
 0x18c   :  { %860 = vmatpush1.msra.mxu0 %v5323_v8  ;;  %931 = vmatpush1.msra.mxu1 %v5511_v62  ;;  %v8287_v8 = vld [vmem:[#allocation26_spill] sm:$0xff]  ;;  %v8301_v62 = vld [vmem:[#allocation33_spill] sm:$0xff] }
 0x18d   :  { %861 = vmatprep.subr.mxu0 %v5329_v10  ;;  %932 = vmatprep.subr.mxu1 %v5517_v0  ;;  %v8284_v0 = vld [vmem:[#allocation56_spill] sm:$0xff] }
 0x18e   :  { %862 = vmatpush1.msra.mxu0 %v5333_v12  ;;  %933 = vmatpush1.msra.mxu1 %v5523_v42  ;;  %v8288_v10 = vld [vmem:[#allocation60_spill] sm:$0xff]  ;;  %v8289_v12 = vld [vmem:[#allocation27_spill] sm:$0xff]  ;;  %v8295_v42 = vld [vmem:[#allocation30_spill] sm:$0xff] }
 0x18f   :  { %863 = vmatprep.subr.mxu0 %v5339_v14  ;;  %934 = vmatprep.subr.mxu1 %v5529_v54  ;;  %v8290_v14 = vld [vmem:[#allocation62_spill] sm:$0xff] }
 0x190   :  { %864 = vmatpush1.msra.mxu0 %v5345_v16  ;;  %935 = vmatpush1.msra.mxu1 %v5535_v50  ;;  %v8291_v16 = vld [vmem:[#allocation28_spill] sm:$0xff]  ;;  %v8298_v50 = vld [vmem:[#allocation70_spill] sm:$0xff] }
 0x191   :  { %865 = vmatprep.subr.mxu0 %v5351_v18  ;;  %936 = vmatprep.subr.mxu1 %v5541_v48  ;;  %v8292_v18 = vld [vmem:[#allocation64_spill] sm:$0xff]  ;;  %v8297_v48 = vld [vmem:[#allocation31_spill] sm:$0xff]  ;;  %v8302_v54 = vld [vmem:[#allocation74_spill] sm:$0xff] }
 0x192   :  { %866 = vmatpush1.msra.mxu0 %v5357_v20  ;;  %937 = vmatpush1.msra.mxu1 %v5547_v46  ;;  %v8293_v20 = vld [vmem:[#allocation29_spill] sm:$0xff]  ;;  %v8296_v46 = vld [vmem:[#allocation68_spill] sm:$0xff] }
 0x193   :  { %867 = vmatprep.subr.mxu0 %v5363_v22  ;;  %938 = vmatprep.subr.mxu1 %v8284_v0  ;;  %v8294_v22 = vld [vmem:[#allocation66_spill] sm:$0xff] }
 0x194   :  { %868 = vmatpush1.msra.mxu0 %v8285_v4  ;;  %939 = vmatpush1.msra.mxu1 %v8286_v6  ;;  %v5859_v0 = vld [vmem:[#allocation4 + $0x8] sm:$0xff]  ;;  %v8321_v4 = vld [vmem:[#allocation45_spill] sm:$0xff]  ;;  %v8328_v6 = vld [vmem:[#allocation52_spill] sm:$0xff] }
 0x195   :  { %869 = vmatprep.subr.mxu0 %v8287_v8  ;;  %940 = vmatprep.subr.mxu1 %v8288_v10  ;;  %v8329_v8 = vld [vmem:[#allocation53_spill] sm:$0xff]  ;;  %v8331_v10 = vld [vmem:[#allocation55_spill] sm:$0xff] }
 0x196   :  { %870 = vmatpush1.msra.mxu0 %v8289_v12  ;;  %941 = vmatpush1.msra.mxu1 %v8290_v14  ;;  %v8333_v12 = vld [vmem:[#allocation59_spill] sm:$0xff] }
 0x197   :  { %871 = vmatprep.subr.mxu0 %v8291_v16  ;;  %942 = vmatprep.subr.mxu1 %v8292_v18  ;;  %v8335_v14 = vld [vmem:[#allocation63_spill] sm:$0xff] }
 0x198   :  { %872 = vmatpush1.msra.mxu0 %v8293_v20  ;;  %943 = vmatpush1.msra.mxu1 %v8294_v22  ;;  %v8337_v16 = vld [vmem:[#allocation67_spill] sm:$0xff] }
 0x199   :  { %873 = vmatprep.subr.mxu0 %v8295_v42  ;;  %944 = vmatprep.subr.mxu1 %v8296_v46  ;;  %v8339_v18 = vld [vmem:[#allocation71_spill] sm:$0xff] }
 0x19a   :  { %874 = vmatpush1.msra.mxu0 %v8297_v48  ;;  %945 = vmatpush1.msra.mxu1 %v8298_v50  ;;  %v8341_v20 = vld [vmem:[#allocation75_spill] sm:$0xff]  ;;  %v8349_v48 = vld [vmem:[#allocation90_spill] sm:$0xff]  ;;  %v5960_v50 = vld [vmem:[#allocation12 + $0x168] sm:$0xff] }
 0x19b   :  { %875 = vmatprep.subr.mxu0 %v8299_v58  ;;  %946 = vmatprep.subr.mxu1 %v8300_v60  ;;  %v8343_v22 = vld [vmem:[#allocation79_spill] sm:$0xff]  ;;  %v5966_v60 = vld [vmem:[#allocation12 + $0x148] sm:$0xff] }
 0x19c   :  { %876 = vmatpush1.msra.mxu0 %v8301_v62  ;;  %947 = vmatpush1.msra.mxu1 %v8302_v54  ;;  %v8345_v42 = vld [vmem:[#allocation83_spill] sm:$0xff]  ;;  %v5972_v54 = vld [vmem:[#allocation12 + $0x128] sm:$0xff] }
 0x19d   :  { %877 = vmatprep.subr.mxu0 %v8303_v53  ;;  %948 = vmatprep.subr.mxu1 %v8304_v55  ;;  %v8347_v46 = vld [vmem:[#allocation87_spill] sm:$0xff]  ;;  %v5978_v55 = vld [vmem:[#allocation12 + $0x108] sm:$0xff] }
 0x19e   :  { %878 = vmatpush1.msra.mxu0 %v8305_v56  ;;  %949 = vmatpush1.msra.mxu1 %v8306_v57  ;;  %v5963_v58 = vld [vmem:[#allocation12 + $0x160] sm:$0xff]  ;;  %v5984_v57 = vld [vmem:[#allocation12 + $0xe8] sm:$0xff] }
 0x19f   :  { %879 = vmatprep.subr.mxu0 %v8307_v59  ;;  %950 = vmatprep.subr.mxu1 %v8308_v61  ;;  %v5969_v62 = vld [vmem:[#allocation12 + $0x140] sm:$0xff]  ;;  %v5990_v61 = vld [vmem:[#allocation12 + $0xc8] sm:$0xff] }
 0x1a0   :  { %880 = vmatpush1.msra.mxu0 %v8309_v2  ;;  %951 = vmatpush1.msra.mxu1 %v8310_v63  ;;  %v5975_v53 = vld [vmem:[#allocation12 + $0x120] sm:$0xff]  ;;  %v5994_v63 = vld [vmem:[#allocation12 + $0xa8] sm:$0xff] }
 0x1a1   :  { %881 = vmatprep.subr.mxu0 %v8311_v33  ;;  %952 = vmatprep.subr.mxu1 %v8312_v39  ;;  %v5981_v56 = vld [vmem:[#allocation12 + $0x100] sm:$0xff]  ;;  %v6000_v39 = vld [vmem:[#allocation12 + $0x88] sm:$0xff] }
 0x1a2   :  { %882 = vmatpush1.msra.mxu0 %v8313_v41  ;;  %953 = vmatpush1.msra.mxu1 %v8314_v35  ;;  %v5987_v59 = vld [vmem:[#allocation12 + $0xe0] sm:$0xff]  ;;  %v6006_v35 = vld [vmem:[#allocation12 + $0x68] sm:$0xff] }
 0x1a3   :  { %883 = vmatprep.subr.mxu0 %v8315_v43  ;;  %954 = vmatprep.subr.mxu1 %v5649_v34  ;;  %v8325_v34 = vld [vmem:[#allocation49_spill] sm:$0xff]  ;;  %v5992_v2 = vld [vmem:[#allocation12 + $0xc0] sm:$0xff]  ;;  %v6008_v43 = vld [vmem:[#allocation12 + $0x1f8] sm:$0xff] }
 0x1a4   :  { %884 = vmatpush1.msra.mxu0 %v8316_v47  ;;  %955 = vmatpush1.msra.mxu1 %v8317_v49  ;;  %v5997_v33 = vld [vmem:[#allocation12 + $0xa0] sm:$0xff]  ;;  %v6015_v49 = vld [vmem:[#allocation12 + $0x48] sm:$0xff] }
 0x1a5   :  { %885 = vmatprep.subr.mxu0 %v8318_v52  ;;  %956 = vmatprep.subr.mxu1 %v5661_v30  ;;  %v8322_v30 = vld [vmem:[#allocation46_spill] sm:$0xff]  ;;  %v6003_v41 = vld [vmem:[#allocation12 + $0x80] sm:$0xff] }
 0x1a6   :  { %886 = vmatpush1.msra.mxu0 %v8319_v37  ;;  %957 = vmatpush1.msra.mxu1 %v5667_v28  ;;  %v8323_v28 = vld [vmem:[#allocation47_spill] sm:$0xff]  ;;  %v6021_v37 = vld [vmem:[#allocation12 + $0x28] sm:$0xff] }
 0x1a7   :  { %887 = vmatprep.subr.mxu0 %v8320_v45  ;;  %958 = vmatprep.subr.mxu1 %v5673_v26  ;;  %v8324_v26 = vld [vmem:[#allocation48_spill] sm:$0xff]  ;;  %v6011_v47 = vld [vmem:[#allocation12 + $0x60] sm:$0xff] }
 0x1a8   :  { %888 = vmatpush1.msra.mxu0 %v8321_v4  ;;  %921 = vmatprep.mubr.f32.mxu0 %v8282_v32  ;;  %v6018_v52 = vld [vmem:[#allocation12 + $0x40] sm:$0xff] }
 0x1a9   :  { %959 = vmatpush1.msra.mxu1 %v5679_v24  ;;  %992 = vmatprep.mubr.f32.mxu1 %v8282_v32  ;;  %v8326_v24 = vld [vmem:[#allocation50_spill] sm:$0xff]  ;;  %v6024_v45 = vld [vmem:[#allocation12 + $0x20] sm:$0xff] }
 0x1aa   :  { %922 = vmatmul.mubr.f32.vlgmr.msra.gmra.mxu0 %v5795_v51  ;;  %993 = vmatmul.mubr.f32.vlgmr.msra.gmra.mxu1 %v5859_v0  ;;  %v8327_v51 = vld [vmem:[#allocation51_spill] sm:$0xff] }
 0x1ab   :  { %999 = vmatprep.subr.mxu0 %v8322_v30  ;;  %1063 = vmatprep.mubr.f32.mxu0 %v8282_v32  ;;  %v6030_v4 = vld [vmem:[#allocation12] sm:$0xff]  ;;  %v6033_v30 = vld [vmem:[#allocation10 + $0x1e8] sm:$0xff] }
 0x1ac   :  { %1000 = vmatpush1.msra.mxu0 %v8323_v28  ;;  %4609 = vmatprep.subr.mxu1 %v8282_v32  ;;  %v6041_v28 = vld [vmem:[%s7936_s6] ss:$0 sm:$0xff] }
 0x1ad   :  { %1001 = vmatprep.subr.mxu0 %v8324_v26  ;;  %4610 = vmatpush3.msra.mxu1 %v5726_v1  ;;  %v8330_v1 = vld [vmem:[#allocation54_spill] sm:$0xff] }
 0x1ae   :  { %1002 = vmatpush1.msra.mxu0 %v8325_v34  ;;  %4611 = vmatprep.subr.mxu1 %v8282_v32 }
 0x1af   :  { %1003 = vmatprep.subr.mxu0 %v8326_v24  ;;  %4612 = vmatpush3.msra.mxu1 %v5730_v3  ;;  %v8332_v3 = vld [vmem:[#allocation57_spill] sm:$0xff] }
 0x1b0   :  { %1004 = vmatpush1.msra.mxu0 %v8327_v51  ;;  %4613 = vmatprep.subr.mxu1 %v8282_v32 }
 0x1b1   :  { %1005 = vmatprep.subr.mxu0 %v8328_v6  ;;  %4614 = vmatpush3.msra.mxu1 %v5734_v5  ;;  %v8334_v5 = vld [vmem:[#allocation61_spill] sm:$0xff]  ;;  %v124_v6 = vlaneseq }
 0x1b2   :  { %1006 = vmatpush1.msra.mxu0 %v8329_v8  ;;  %4615 = vmatprep.subr.mxu1 %v8282_v32 }
 0x1b3   :  { %1007 = vmatprep.subr.mxu0 %v8330_v1  ;;  %4616 = vmatpush3.msra.mxu1 %v5738_v7  ;;  %v8336_v7 = vld [vmem:[#allocation65_spill] sm:$0xff]  ;;  %v6044_v8 = vand.u32 127, %v124_v6 }
 0x1b4   :  { %1008 = vmatpush1.msra.mxu0 %v8331_v10  ;;  %4617 = vmatprep.subr.mxu1 %v8282_v32 }
 0x1b5   :  { %1009 = vmatprep.subr.mxu0 %v8332_v3  ;;  %4618 = vmatpush3.msra.mxu1 %v5742_v9  ;;  %v8338_v9 = vld [vmem:[#allocation69_spill] sm:$0xff]  ;;  %vm126_vm1 = vcmp.lt.s32.totalorder %v6044_v8, 16 }
 0x1b6   :  { %1010 = vmatpush1.msra.mxu0 %v8333_v12  ;;  %4619 = vmatprep.subr.mxu1 %v8282_v32 }
 0x1b7   :  { %1011 = vmatprep.subr.mxu0 %v8334_v5  ;;  %4620 = vmatpush3.msra.mxu1 %v5746_v11  ;;  %v8340_v11 = vld [vmem:[#allocation73_spill] sm:$0xff] }
 0x1b8   :  { %1012 = vmatpush1.msra.mxu0 %v8335_v14  ;;  %4621 = vmatprep.subr.mxu1 %v8282_v32 }
 0x1b9   :  { %1013 = vmatprep.subr.mxu0 %v8336_v7  ;;  %4622 = vmatpush3.msra.mxu1 %v5750_v13  ;;  %v8342_v13 = vld [vmem:[#allocation77_spill] sm:$0xff] }
 0x1ba   :  { %1014 = vmatpush1.msra.mxu0 %v8337_v16  ;;  %4623 = vmatprep.subr.mxu1 %v8282_v32 }
 0x1bb   :  { %1015 = vmatprep.subr.mxu0 %v8338_v9  ;;  %4624 = vmatpush3.msra.mxu1 %v5754_v15  ;;  %v8344_v15 = vld [vmem:[#allocation81_spill] sm:$0xff] }
 0x1bc   :  { %1016 = vmatpush1.msra.mxu0 %v8339_v18  ;;  %4625 = vmatprep.subr.mxu1 %v8282_v32 }
 0x1bd   :  { %1017 = vmatprep.subr.mxu0 %v8340_v11  ;;  %4626 = vmatpush3.msra.mxu1 %v5756_v17  ;;  %v8346_v17 = vld [vmem:[#allocation85_spill] sm:$0xff] }
 0x1be   :  { %1018 = vmatpush1.msra.mxu0 %v8341_v20  ;;  %4627 = vmatprep.subr.mxu1 %v8282_v32 }
 0x1bf   :  { %1019 = vmatprep.subr.mxu0 %v8342_v13  ;;  %4628 = vmatpush3.msra.mxu1 %v5762_v19  ;;  %v8348_v19 = vld [vmem:[#allocation88_spill] sm:$0xff] }
 0x1c0   :  { %1020 = vmatpush1.msra.mxu0 %v8343_v22  ;;  %4629 = vmatprep.subr.mxu1 %v8282_v32 }
 0x1c1   :  { %1021 = vmatprep.subr.mxu0 %v8344_v15  ;;  %4630 = vmatpush3.msra.mxu1 %v5766_v21  ;;  %v8350_v21 = vld [vmem:[#allocation91_spill] sm:$0xff] }
 0x1c2   :  { %1022 = vmatpush1.msra.mxu0 %v8345_v42  ;;  %4631 = vmatprep.subr.mxu1 %v8282_v32 }
 0x1c3   :  { %1023 = vmatprep.subr.mxu0 %v8346_v17  ;;  %4632 = vmatpush3.msra.mxu1 %v5770_v23  ;;  %v5948_v23 = vld [vmem:[#allocation12 + $0x1a8] sm:$0xff] }
 0x1c4   :  { %1024 = vmatpush1.msra.mxu0 %v8347_v46  ;;  %4633 = vmatprep.subr.mxu1 %v8282_v32 }
 0x1c5   :  { %1025 = vmatprep.subr.mxu0 %v8348_v19  ;;  %4634 = vmatpush3.msra.mxu1 %v5774_v25  ;;  %v5951_v25 = vld [vmem:[#allocation12 + $0x1a0] sm:$0xff] }
 0x1c6   :  { %1026 = vmatpush1.msra.mxu0 %v8349_v48  ;;  %4635 = vmatprep.subr.mxu1 %v8282_v32 }
 0x1c7   :  { %1027 = vmatprep.subr.mxu0 %v5663_v40  ;;  %4636 = vmatpush3.msra.mxu1 %v5778_v27  ;;  %v5942_v40 = vld [vmem:[#allocation12 + $0x1c8] sm:$0xff] }
 0x1c8   :  { %1028 = vmatpush1.msra.mxu0 %v5669_v38  ;;  %4637 = vmatprep.subr.mxu1 %v8282_v32  ;;  %v5936_v38 = vld [vmem:[#allocation12 + $0x1e8] sm:$0xff] }
 0x1c9   :  { %1029 = vmatprep.subr.mxu0 %v5675_v36  ;;  %4638 = vmatpush3.msra.mxu1 %v5782_v29  ;;  %v5939_v36 = vld [vmem:[#allocation12 + $0x1e0] sm:$0xff]  ;;  %v5954_v27 = vld [vmem:[#allocation12 + $0x188] sm:$0xff] }
 0x1ca   :  { %1030 = vmatpush1.msra.mxu0 %v5683_v44  ;;  %4639 = vmatprep.subr.mxu1 %v8282_v32  ;;  %v5945_v44 = vld [vmem:[#allocation12 + $0x1c0] sm:$0xff] }
 0x1cb   :  { %1064 = vmatmul.mubr.f32.vlgmr.msra.gmra.mxu0 %v5859_v0  ;;  %4640 = vmatpush3.msra.mxu1 %v8350_v21  ;;  %v5957_v29 = vld [vmem:[#allocation12 + $0x180] sm:$0xff]  ;;  %v6027_v0 = vld [vmem:[#allocation12 + $0x8] sm:$0xff] }
 0x1cc   :  { %4641 = vmatprep.mubr.msk.f32.mxu1 %vm5219_vm0, %v8282_v32  ;;  %1379 = vmatprep.mubr.f32.mxu0 %v8282_v32 }
 0x1cd   :  { %1315 = vmatprep.subr.mxu0 %v5936_v38  ;;  %1386 = vmatprep.subr.mxu1 %v6008_v43 }
 0x1ce   :  { %1316 = vmatpush1.msra.mxu0 %v5939_v36 }
 0x1cf   :  { %1317 = vmatprep.subr.mxu0 %v5942_v40 }
 0x1d0   :  { %1318 = vmatpush1.msra.mxu0 %v5945_v44 }
 0x1d1   :  { %1319 = vmatprep.subr.mxu0 %v5948_v23 }
 0x1d2   :  { %1320 = vmatpush1.msra.mxu0 %v5951_v25 }
 0x1d3   :  { %1321 = vmatprep.subr.mxu0 %v5954_v27 }
 0x1d4   :  { %1322 = vmatpush1.msra.mxu0 %v5957_v29 }
 0x1d5   :  { %1323 = vmatprep.subr.mxu0 %v5960_v50 }
 0x1d6   :  { %1324 = vmatpush1.msra.mxu0 %v5963_v58 }
 0x1d7   :  { %1325 = vmatprep.subr.mxu0 %v5966_v60 }
 0x1d8   :  { %1326 = vmatpush1.msra.mxu0 %v5969_v62 }
 0x1d9   :  { %1327 = vmatprep.subr.mxu0 %v5972_v54 }
 0x1da   :  { %1328 = vmatpush1.msra.mxu0 %v5975_v53 }
 0x1db   :  { %1329 = vmatprep.subr.mxu0 %v5978_v55 }
 0x1dc   :  { %1330 = vmatpush1.msra.mxu0 %v5981_v56 }
 0x1dd   :  { %1331 = vmatprep.subr.mxu0 %v5984_v57 }
 0x1de   :  { %1332 = vmatpush1.msra.mxu0 %v5987_v59 }
 0x1df   :  { %1333 = vmatprep.subr.mxu0 %v5990_v61 }
 0x1e0   :  { %1334 = vmatpush1.msra.mxu0 %v5992_v2 }
 0x1e1   :  { %1335 = vmatprep.subr.mxu0 %v5994_v63 }
 0x1e2   :  { %1336 = vmatpush1.msra.mxu0 %v5997_v33 }
 0x1e3   :  { %1337 = vmatprep.subr.mxu0 %v6000_v39 }
 0x1e4   :  { %1338 = vmatpush1.msra.mxu0 %v6003_v41 }
 0x1e5   :  { %1339 = vmatprep.subr.mxu0 %v6006_v35 }
 0x1e6   :  { %1340 = vmatpush1.msra.mxu0 %v6011_v47 }
 0x1e7   :  { %1341 = vmatprep.subr.mxu0 %v6015_v49 }
 0x1e8   :  { %1342 = vmatpush1.msra.mxu0 %v6018_v52 }
 0x1e9   :  { %1343 = vmatprep.subr.mxu0 %v6021_v37 }
 0x1ea   :  { %1344 = vmatpush1.msra.mxu0 %v6024_v45 }
 0x1eb   :  { %1345 = vmatprep.subr.mxu0 %v6027_v0 }
 0x1ec   :  { %1346 = vmatpush1.msra.mxu0 %v6030_v4 }
 0x1ed   :  { %1457 = vmatprep.subr.mxu0 %v6033_v30 }
 0x249   :  { %v648_v26 = vpop.f32.mrf.mxu0  ;;  %v852_v3 = vpop.f32.mrf.mxu1 }
 0x24a   :  { %v649_v34 = vadd.f32 %v6041_v28, %v648_v26 }
 0x24b   :  { %v4608_v24 = vpop.f32.mrf.mxu0  ;;  %v854_v12 = vpop.f32.mrf.mxu1 }
 0x24c   :  { %v652_v51 = vmul.f32 1.442695, %v649_v34 }
 0x24e   :  { %4885 = vpow2.f32 %v652_v51 }
 0x25b   :  { %v4886_v1 = vpop.eup %4885 }
 0x25c   :  { %v654_v10 = vsel %vm126_vm1, %v649_v34, %v4886_v1 }
 0x25d   :  { %655 = vst [vmem:[#allocation15] sm:$0xff] %v654_v10 }
 0x26a   :  { %v994_v5 = vpop.f32.mrf.mxu1  ;;  %v923_v20 = vpop.f32.mrf.mxu0 }
 0x26b   :  { %v995_v16 = vadd.f32 %v994_v5, %v852_v3 }
 0x26c   :  { %v996_v14 = vpop.f32.mrf.mxu1  ;;  %v925_v42 = vpop.f32.mrf.mxu0 }
 0x26d   :  { %v997_v7 = vadd.f32 %v996_v14, %v854_v12  ;;  %v4417_v18 = vmul.f32 -1.442695, %v995_v16  ;;  %v6057_v16 = vld [vmem:[#allocation10 + $0x1e0] sm:$0xff] }
 0x26f   :  { %v4418_v9 = vmul.f32 -1.442695, %v997_v7  ;;  %v6055_v7 = vld [vmem:[#allocation12 + $0x1f0] sm:$0xff] }
 0x271   :  { %4887 = vpow2.f32 %v4418_v9  ;;  %v6059_v9 = vld [vmem:[#allocation12 + $0x1d8] sm:$0xff] }
 0x272   :  { %4889 = vpow2.f32 %v4417_v18  ;;  %v6061_v18 = vld [vmem:[#allocation10 + $0x1c8] sm:$0xff] }
 0x27e   :  { %v4888_v11 = vpop.eup %4887 }
 0x27f   :  { %v4890_v13 = vpop.eup %4889  ;;  %v1079_v22 = vadd.f32 1.0, %v4888_v11  ;;  %v6067_v11 = vld [vmem:[#allocation10 + $0x1c0] sm:$0xff] }
 0x280   :  { %v1073_v15 = vadd.f32 1.0, %v4890_v13  ;;  %v6073_v13 = vld [vmem:[#allocation10 + $0x1a8] sm:$0xff] }
 0x281   :  { %4891 = vrcp.f32 %v1079_v22  ;;  %v6077_v22 = vld [vmem:[#allocation12 + $0x1b0] sm:$0xff] }
 0x282   :  { %4893 = vrcp.f32 %v1073_v15  ;;  %v6079_v15 = vld [vmem:[#allocation10 + $0x1a0] sm:$0xff] }
 0x28b   :  { %v1065_v17 = vpop.f32.mrf.mxu0 }
 0x28c   :  { %v1066_v46 = vadd.f32 %v1065_v17, %v923_v20  ;;  %v6071_v20 = vld [vmem:[#allocation12 + $0x1b8] sm:$0xff]  ;;  %v6085_v17 = vld [vmem:[#allocation10 + $0x188] sm:$0xff] }
 0x28d   :  { %v1067_v19 = vpop.f32.mrf.mxu0 }
 0x28e   :  { %4895 = vtanh.f32 %v1066_v46  ;;  %v1068_v48 = vadd.f32 %v1067_v19, %v925_v42  ;;  %v4892_v26 = vpop.eup %4891  ;;  %v6083_v42 = vld [vmem:[#allocation12 + $0x198] sm:$0xff]  ;;  %v6089_v46 = vld [vmem:[#allocation12 + $0x190] sm:$0xff]  ;;  %v6091_v19 = vld [vmem:[#allocation10 + $0x180] sm:$0xff] }
 0x28f   :  { %v4894_v34 = vpop.eup %4893  ;;  %v1089_v51 = vmul.f32 %v4892_v26, %v5792_v31  ;;  %v6065_v31 = vld [vmem:[#allocation12 + $0x1d0] sm:$0xff] }
 0x290   :  { %v4419_v21 = vmul.f32 -1.442695, %v1068_v48  ;;  %v6095_v48 = vld [vmem:[#allocation12 + $0x178] sm:$0xff]  ;;  %v6101_v26 = vld [vmem:[#allocation12 + $0x170] sm:$0xff] }
 0x291   :  { %8351 = vst [vmem:[#allocation56_spill] sm:$0xff] %v6095_v48  ;;  %8353 = vst [vmem:[#allocation58_spill] sm:$0xff] %v6101_v26 }
 0x292   :  { %4897 = vpow2.f32 %v4419_v21  ;;  %v6097_v21 = vld [vmem:[#allocation10 + $0x168] sm:$0xff] }
 0x293   :  { %8352 = vst [vmem:[#allocation25_spill] sm:$0xff] %v6097_v21 }
 0x29b   :  { %v4896_v24 = vpop.eup %4895 }
 0x29c   :  { %v1090_v6 = vmul.f32 %v4896_v24, %v4894_v34  ;;  %v6103_v34 = vld [vmem:[#allocation10 + $0x160] sm:$0xff]  ;;  %v6107_v24 = vld [vmem:[#allocation12 + $0x158] sm:$0xff] }
 0x29d   :  { %8354 = vst [vmem:[#allocation26_spill] sm:$0xff] %v6103_v34  ;;  %8355 = vst [vmem:[#allocation60_spill] sm:$0xff] %v6107_v24 }
 0x29e   :  { %v6050_v1 = vadd.f32 %v1090_v6, %v1089_v51  ;;  %v6109_v51 = vld [vmem:[#allocation10 + $0x148] sm:$0xff]  ;;  %v6113_v6 = vld [vmem:[#allocation12 + $0x150] sm:$0xff] }
 0x29f   :  { %v4898_v10 = vpop.eup %4897  ;;  %8356 = vst [vmem:[#allocation27_spill] sm:$0xff] %v6109_v51  ;;  %8357 = vst [vmem:[#allocation62_spill] sm:$0xff] %v6113_v6 }
 0x2a0   :  { %v1086_v3 = vadd.f32 1.0, %v4898_v10  ;;  %4899 = vtanh.f32 %v6050_v1  ;;  %v6115_v10 = vld [vmem:[#allocation10 + $0x140] sm:$0xff] }
 0x2a1   :  { %8358 = vst [vmem:[#allocation28_spill] sm:$0xff] %v6115_v10 }
 0x2a2   :  { %4901 = vrcp.f32 %v1086_v3  ;;  %v6119_v3 = vld [vmem:[#allocation12 + $0x138] sm:$0xff] }
 0x2a3   :  { %8359 = vst [vmem:[#allocation64_spill] sm:$0xff] %v6119_v3 }
 0x2ad   :  { %v4900_v12 = vpop.eup %4899 }
 0x2af   :  { %v4902_v5 = vpop.eup %4901 }
 0x2b0   :  { %v6053_v14 = vmul.f32 %v4902_v5, %v4900_v12  ;;  %v6121_v12 = vld [vmem:[#allocation10 + $0x128] sm:$0xff]  ;;  %v6125_v5 = vld [vmem:[#allocation12 + $0x130] sm:$0xff] }
 0x2b1   :  { %8360 = vst [vmem:[#allocation29_spill] sm:$0xff] %v6121_v12  ;;  %8361 = vst [vmem:[#allocation66_spill] sm:$0xff] %v6125_v5 }
 0x2b2   :  { %4642 = vmatmul.mubr.f32.vlgmr.msra.gmra.mxu1 %v6053_v14  ;;  %1380 = vmatmul.mubr.f32.vlgmr.msra.gmra.mxu0 %v6053_v14 }
 0x2b3   :  { %1387 = vmatpush1.msra.mxu1 %v6055_v7  ;;  %1458 = vmatpush1.msra.mxu0 %v6057_v16 }
 0x2b4   :  { %1388 = vmatprep.subr.mxu1 %v6059_v9  ;;  %1459 = vmatprep.subr.mxu0 %v6061_v18 }
 0x2b5   :  { %1389 = vmatpush1.msra.mxu1 %v6065_v31  ;;  %1460 = vmatpush1.msra.mxu0 %v6067_v11 }
 0x2b6   :  { %1390 = vmatprep.subr.mxu1 %v6071_v20  ;;  %1461 = vmatprep.subr.mxu0 %v6073_v13 }
 0x2b7   :  { %1391 = vmatpush1.msra.mxu1 %v6077_v22  ;;  %1462 = vmatpush1.msra.mxu0 %v6079_v15 }
 0x2b8   :  { %1392 = vmatprep.subr.mxu1 %v6083_v42  ;;  %1463 = vmatprep.subr.mxu0 %v6085_v17 }
 0x2b9   :  { %1393 = vmatpush1.msra.mxu1 %v6089_v46  ;;  %1464 = vmatpush1.msra.mxu0 %v6091_v19 }
 0x2ba   :  { %1394 = vmatprep.subr.mxu1 %v6095_v48  ;;  %1465 = vmatprep.subr.mxu0 %v6097_v21  ;;  %v6127_v48 = vld [vmem:[#allocation10 + $0x120] sm:$0xff]  ;;  %v6131_v21 = vld [vmem:[#allocation12 + $0x118] sm:$0xff] }
 0x2bb   :  { %1395 = vmatpush1.msra.mxu1 %v6101_v26  ;;  %1466 = vmatpush1.msra.mxu0 %v6103_v34  ;;  %8362 = vst [vmem:[#allocation30_spill] sm:$0xff] %v6127_v48  ;;  %8363 = vst [vmem:[#allocation68_spill] sm:$0xff] %v6131_v21  ;;  %v6133_v26 = vld [vmem:[#allocation10 + $0x108] sm:$0xff]  ;;  %v6137_v34 = vld [vmem:[#allocation12 + $0x110] sm:$0xff] }
 0x2bc   :  { %1396 = vmatprep.subr.mxu1 %v6107_v24  ;;  %1467 = vmatprep.subr.mxu0 %v6109_v51  ;;  %8364 = vst [vmem:[#allocation31_spill] sm:$0xff] %v6133_v26  ;;  %8365 = vst [vmem:[#allocation70_spill] sm:$0xff] %v6137_v34  ;;  %v6139_v24 = vld [vmem:[#allocation10 + $0x100] sm:$0xff]  ;;  %v6143_v51 = vld [vmem:[#allocation12 + $0xf8] sm:$0xff] }
 0x2bd   :  { %1397 = vmatpush1.msra.mxu1 %v6113_v6  ;;  %1468 = vmatpush1.msra.mxu0 %v6115_v10  ;;  %8366 = vst [vmem:[#allocation32_spill] sm:$0xff] %v6139_v24  ;;  %8367 = vst [vmem:[#allocation72_spill] sm:$0xff] %v6143_v51  ;;  %v6145_v6 = vld [vmem:[#allocation10 + $0xe8] sm:$0xff]  ;;  %v6149_v10 = vld [vmem:[#allocation12 + $0xf0] sm:$0xff] }
 0x2be   :  { %1398 = vmatprep.subr.mxu1 %v6119_v3  ;;  %1469 = vmatprep.subr.mxu0 %v6121_v12  ;;  %8368 = vst [vmem:[#allocation33_spill] sm:$0xff] %v6145_v6  ;;  %8369 = vst [vmem:[#allocation74_spill] sm:$0xff] %v6149_v10  ;;  %v6151_v3 = vld [vmem:[#allocation10 + $0xe0] sm:$0xff]  ;;  %v6155_v12 = vld [vmem:[#allocation12 + $0xd8] sm:$0xff] }
 0x2bf   :  { %1399 = vmatpush1.msra.mxu1 %v6125_v5  ;;  %1470 = vmatpush1.msra.mxu0 %v6127_v48  ;;  %8370 = vst [vmem:[#allocation34_spill] sm:$0xff] %v6151_v3  ;;  %8371 = vst [vmem:[#allocation76_spill] sm:$0xff] %v6155_v12  ;;  %v6157_v5 = vld [vmem:[#allocation10 + $0xc8] sm:$0xff]  ;;  %v6161_v48 = vld [vmem:[#allocation12 + $0xd0] sm:$0xff] }
 0x2c0   :  { %1400 = vmatprep.subr.mxu1 %v6131_v21  ;;  %1471 = vmatprep.subr.mxu0 %v6133_v26  ;;  %8372 = vst [vmem:[#allocation35_spill] sm:$0xff] %v6157_v5  ;;  %8373 = vst [vmem:[#allocation78_spill] sm:$0xff] %v6161_v48  ;;  %v6163_v21 = vld [vmem:[#allocation10 + $0xc0] sm:$0xff]  ;;  %v6167_v26 = vld [vmem:[#allocation12 + $0xb8] sm:$0xff] }
 0x2c1   :  { %1401 = vmatpush1.msra.mxu1 %v6137_v34  ;;  %1472 = vmatpush1.msra.mxu0 %v6139_v24  ;;  %8374 = vst [vmem:[#allocation36_spill] sm:$0xff] %v6163_v21  ;;  %8375 = vst [vmem:[#allocation80_spill] sm:$0xff] %v6167_v26  ;;  %v6169_v34 = vld [vmem:[#allocation10 + $0xa8] sm:$0xff]  ;;  %v6173_v24 = vld [vmem:[#allocation12 + $0xb0] sm:$0xff] }
 0x2c2   :  { %1402 = vmatprep.subr.mxu1 %v6143_v51  ;;  %1473 = vmatprep.subr.mxu0 %v6145_v6  ;;  %8376 = vst [vmem:[#allocation37_spill] sm:$0xff] %v6169_v34  ;;  %8377 = vst [vmem:[#allocation82_spill] sm:$0xff] %v6173_v24  ;;  %v6175_v51 = vld [vmem:[#allocation10 + $0xa0] sm:$0xff]  ;;  %v6179_v6 = vld [vmem:[#allocation12 + $0x98] sm:$0xff] }
 0x2c3   :  { %1403 = vmatpush1.msra.mxu1 %v6149_v10  ;;  %1474 = vmatpush1.msra.mxu0 %v6151_v3  ;;  %8378 = vst [vmem:[#allocation38_spill] sm:$0xff] %v6175_v51  ;;  %8379 = vst [vmem:[#allocation84_spill] sm:$0xff] %v6179_v6  ;;  %v6181_v10 = vld [vmem:[#allocation10 + $0x88] sm:$0xff]  ;;  %v6185_v3 = vld [vmem:[#allocation12 + $0x90] sm:$0xff] }
 0x2c4   :  { %1404 = vmatprep.subr.mxu1 %v6155_v12  ;;  %1475 = vmatprep.subr.mxu0 %v6157_v5  ;;  %8380 = vst [vmem:[#allocation39_spill] sm:$0xff] %v6181_v10  ;;  %8381 = vst [vmem:[#allocation86_spill] sm:$0xff] %v6185_v3  ;;  %v6187_v12 = vld [vmem:[#allocation10 + $0x80] sm:$0xff]  ;;  %v6191_v5 = vld [vmem:[#allocation12 + $0x78] sm:$0xff] }
 0x2c5   :  { %1405 = vmatpush1.msra.mxu1 %v6161_v48  ;;  %1476 = vmatpush1.msra.mxu0 %v6163_v21  ;;  %8382 = vst [vmem:[#allocation40_spill] sm:$0xff] %v6187_v12  ;;  %8383 = vst [vmem:[#allocation41_spill] sm:$0xff] %v6191_v5  ;;  %v6193_v48 = vld [vmem:[#allocation10 + $0x68] sm:$0xff]  ;;  %v6197_v21 = vld [vmem:[#allocation12 + $0x70] sm:$0xff] }
 0x2c6   :  { %1406 = vmatprep.subr.mxu1 %v6167_v26  ;;  %1477 = vmatprep.subr.mxu0 %v6169_v34  ;;  %8384 = vst [vmem:[#allocation89_spill] sm:$0xff] %v6193_v48  ;;  %8385 = vst [vmem:[#allocation42_spill] sm:$0xff] %v6197_v21  ;;  %v6199_v26 = vld [vmem:[#allocation10 + $0x60] sm:$0xff]  ;;  %v6203_v34 = vld [vmem:[#allocation12 + $0x58] sm:$0xff] }
 0x2c7   :  { %1407 = vmatpush1.msra.mxu1 %v6173_v24  ;;  %1478 = vmatpush1.msra.mxu0 %v6175_v51  ;;  %8386 = vst [vmem:[#allocation43_spill] sm:$0xff] %v6199_v26  ;;  %v6205_v24 = vld [vmem:[#allocation10 + $0x48] sm:$0xff]  ;;  %v6209_v51 = vld [vmem:[#allocation12 + $0x50] sm:$0xff] }
 0x2c8   :  { %1408 = vmatprep.subr.mxu1 %v6179_v6  ;;  %1479 = vmatprep.subr.mxu0 %v6181_v10  ;;  %8387 = vst [vmem:[#allocation44_spill] sm:$0xff] %v6205_v24  ;;  %v6211_v6 = vld [vmem:[#allocation10 + $0x40] sm:$0xff]  ;;  %v6215_v10 = vld [vmem:[#allocation12 + $0x38] sm:$0xff] }
 0x2c9   :  { %1409 = vmatpush1.msra.mxu1 %v6185_v3  ;;  %1480 = vmatpush1.msra.mxu0 %v6187_v12  ;;  %8388 = vst [vmem:[#allocation45_spill] sm:$0xff] %v6211_v6  ;;  %8389 = vst [vmem:[#allocation46_spill] sm:$0xff] %v6215_v10  ;;  %v6217_v3 = vld [vmem:[#allocation10 + $0x28] sm:$0xff]  ;;  %v6221_v12 = vld [vmem:[#allocation12 + $0x30] sm:$0xff] }
 0x2ca   :  { %1410 = vmatprep.subr.mxu1 %v6191_v5  ;;  %1481 = vmatprep.subr.mxu0 %v6193_v48  ;;  %8390 = vst [vmem:[#allocation47_spill] sm:$0xff] %v6221_v12  ;;  %v6223_v5 = vld [vmem:[#allocation10 + $0x20] sm:$0xff]  ;;  %v6227_v48 = vld [vmem:[#allocation12 + $0x18] sm:$0xff] }
 0x2cb   :  { %1411 = vmatpush1.msra.mxu1 %v6197_v21  ;;  %1482 = vmatpush1.msra.mxu0 %v6199_v26  ;;  %8391 = vst [vmem:[#allocation48_spill] sm:$0xff] %v6223_v5  ;;  %8392 = vst [vmem:[#allocation49_spill] sm:$0xff] %v6227_v48  ;;  %v6229_v21 = vld [vmem:[#allocation10 + $0x8] sm:$0xff]  ;;  %v6233_v26 = vld [vmem:[#allocation12 + $0x10] sm:$0xff] }
 0x2cc   :  { %1412 = vmatprep.subr.mxu1 %v6203_v34  ;;  %1483 = vmatprep.subr.mxu0 %v6205_v24  ;;  %8393 = vst [vmem:[#allocation50_spill] sm:$0xff] %v6229_v21  ;;  %8394 = vst [vmem:[#allocation51_spill] sm:$0xff] %v6233_v26  ;;  %v6237_v24 = vld [vmem:[#allocation10] sm:$0xff] }
 0x2cd   :  { %1413 = vmatpush1.msra.mxu1 %v6209_v51  ;;  %1484 = vmatpush1.msra.mxu0 %v6211_v6  ;;  %8395 = vst [vmem:[#allocation52_spill] sm:$0xff] %v6237_v24  ;;  %v6241_v6 = vld [vmem:[#allocation4 + $0x10] sm:$0xff] }
 0x2ce   :  { %1414 = vmatprep.subr.mxu1 %v6215_v10  ;;  %1485 = vmatprep.subr.mxu0 %v6217_v3  ;;  %v6245_v10 = vld [vmem:[#allocation10 + $0x1f8] sm:$0xff] }
 0x2cf   :  { %1415 = vmatpush1.msra.mxu1 %v6221_v12  ;;  %1486 = vmatpush1.msra.mxu0 %v6223_v5  ;;  %8396 = vst [vmem:[#allocation53_spill] sm:$0xff] %v6245_v10  ;;  %v6249_v12 = vld [vmem:[#allocation10 + $0x1f0] sm:$0xff]  ;;  %v6281_v5 = vld [vmem:[#allocation10 + $0x158] sm:$0xff] }
 0x2d0   :  { %1416 = vmatprep.subr.mxu1 %v6227_v48  ;;  %1487 = vmatprep.subr.mxu0 %v6229_v21  ;;  %8397 = vst [vmem:[#allocation54_spill] sm:$0xff] %v6249_v12  ;;  %v6253_v48 = vld [vmem:[#allocation10 + $0x1d8] sm:$0xff]  ;;  %v6256_v21 = vld [vmem:[#allocation10 + $0x1d0] sm:$0xff]  ;;  %8406 = vst [vmem:[#allocation71_spill] sm:$0xff] %v6281_v5 }
 0x2d1   :  { %1417 = vmatpush1.msra.mxu1 %v6233_v26  ;;  %1450 = vmatprep.mubr.f32.mxu1 %v8282_v32  ;;  %8398 = vst [vmem:[#allocation55_spill] sm:$0xff] %v6253_v48  ;;  %8399 = vst [vmem:[#allocation57_spill] sm:$0xff] %v6256_v21  ;;  %v6260_v26 = vld [vmem:[#allocation10 + $0x1b8] sm:$0xff] }
 0x2d2   :  { %1488 = vmatpush1.msra.mxu0 %v6237_v24  ;;  %1521 = vmatprep.mubr.f32.mxu0 %v8282_v32  ;;  %8400 = vst [vmem:[#allocation59_spill] sm:$0xff] %v6260_v26  ;;  %v6264_v24 = vld [vmem:[#allocation10 + $0x1b0] sm:$0xff] }
 0x2d3   :  { %1451 = vmatmul.mubr.f32.vlgmr.msra.gmra.mxu1 %v6053_v14  ;;  %1522 = vmatmul.mubr.f32.vlgmr.msra.gmra.mxu0 %v6241_v6  ;;  %8401 = vst [vmem:[#allocation61_spill] sm:$0xff] %v6264_v24  ;;  %v6269_v14 = vld [vmem:[#allocation10 + $0x198] sm:$0xff] }
 0x2d4   :  { %1528 = vmatprep.subr.mxu1 %v6245_v10  ;;  %1592 = vmatprep.mubr.f32.mxu1 %v8282_v32  ;;  %8402 = vst [vmem:[#allocation63_spill] sm:$0xff] %v6269_v14  ;;  %v6272_v10 = vld [vmem:[#allocation10 + $0x190] sm:$0xff] }
 0x2d5   :  { %1529 = vmatpush1.msra.mxu1 %v6249_v12  ;;  %4644 = vmatprep.subr.mxu0 %v8282_v32  ;;  %8403 = vst [vmem:[#allocation65_spill] sm:$0xff] %v6272_v10  ;;  %v6275_v12 = vld [vmem:[#allocation10 + $0x178] sm:$0xff] }
 0x2d6   :  { %1530 = vmatprep.subr.mxu1 %v6253_v48  ;;  %4676 = vmatprep.mubr.msk.f32.mxu0 %vm5219_vm0, %v8282_v32  ;;  %8404 = vst [vmem:[#allocation67_spill] sm:$0xff] %v6275_v12  ;;  %v6278_v48 = vld [vmem:[#allocation10 + $0x170] sm:$0xff] }
 0x2d7   :  { %1531 = vmatpush1.msra.mxu1 %v6256_v21  ;;  %8405 = vst [vmem:[#allocation69_spill] sm:$0xff] %v6278_v48  ;;  %v6284_v21 = vld [vmem:[#allocation10 + $0x150] sm:$0xff] }
 0x2d8   :  { %1532 = vmatprep.subr.mxu1 %v6260_v26  ;;  %8407 = vst [vmem:[#allocation73_spill] sm:$0xff] %v6284_v21  ;;  %v6287_v26 = vld [vmem:[#allocation10 + $0x138] sm:$0xff] }
 0x2d9   :  { %1533 = vmatpush1.msra.mxu1 %v6264_v24  ;;  %8408 = vst [vmem:[#allocation75_spill] sm:$0xff] %v6287_v26  ;;  %v6290_v24 = vld [vmem:[#allocation10 + $0x130] sm:$0xff] }
 0x2da   :  { %1534 = vmatprep.subr.mxu1 %v6269_v14  ;;  %8409 = vst [vmem:[#allocation77_spill] sm:$0xff] %v6290_v24  ;;  %v6293_v14 = vld [vmem:[#allocation10 + $0x118] sm:$0xff] }
 0x2db   :  { %1535 = vmatpush1.msra.mxu1 %v6272_v10  ;;  %8410 = vst [vmem:[#allocation79_spill] sm:$0xff] %v6293_v14  ;;  %v6296_v10 = vld [vmem:[#allocation10 + $0x110] sm:$0xff] }
 0x2dc   :  { %1536 = vmatprep.subr.mxu1 %v6275_v12  ;;  %8411 = vst [vmem:[#allocation81_spill] sm:$0xff] %v6296_v10  ;;  %v6299_v12 = vld [vmem:[#allocation10 + $0xf8] sm:$0xff] }
 0x2dd   :  { %1537 = vmatpush1.msra.mxu1 %v6278_v48  ;;  %8412 = vst [vmem:[#allocation83_spill] sm:$0xff] %v6299_v12  ;;  %v6302_v48 = vld [vmem:[#allocation10 + $0xf0] sm:$0xff] }
 0x2de   :  { %1538 = vmatprep.subr.mxu1 %v6281_v5  ;;  %8413 = vst [vmem:[#allocation85_spill] sm:$0xff] %v6302_v48  ;;  %v6305_v5 = vld [vmem:[#allocation10 + $0xd8] sm:$0xff] }
 0x2df   :  { %1539 = vmatpush1.msra.mxu1 %v6284_v21  ;;  %8414 = vst [vmem:[#allocation87_spill] sm:$0xff] %v6305_v5  ;;  %v6308_v21 = vld [vmem:[#allocation10 + $0xd0] sm:$0xff] }
 0x2e0   :  { %1540 = vmatprep.subr.mxu1 %v6287_v26  ;;  %8415 = vst [vmem:[#allocation88_spill] sm:$0xff] %v6308_v21  ;;  %v6311_v26 = vld [vmem:[#allocation10 + $0xb8] sm:$0xff] }
 0x2e1   :  { %1541 = vmatpush1.msra.mxu1 %v6290_v24  ;;  %8416 = vst [vmem:[#allocation90_spill] sm:$0xff] %v6311_v26  ;;  %v6314_v24 = vld [vmem:[#allocation10 + $0xb0] sm:$0xff] }
 0x2e2   :  { %1542 = vmatprep.subr.mxu1 %v6293_v14  ;;  %8417 = vst [vmem:[#allocation91_spill] sm:$0xff] %v6314_v24  ;;  %v6317_v14 = vld [vmem:[#allocation10 + $0x98] sm:$0xff] }
 0x2e3   :  { %1543 = vmatpush1.msra.mxu1 %v6296_v10  ;;  %8418 = vst [vmem:[#allocation92_spill] sm:$0xff] %v6317_v14  ;;  %v6320_v10 = vld [vmem:[#allocation10 + $0x90] sm:$0xff] }
 0x2e4   :  { %1544 = vmatprep.subr.mxu1 %v6299_v12  ;;  %8419 = vst [vmem:[#allocation93_spill] sm:$0xff] %v6320_v10  ;;  %v6323_v12 = vld [vmem:[#allocation10 + $0x78] sm:$0xff] }
 0x2e5   :  { %1545 = vmatpush1.msra.mxu1 %v6302_v48  ;;  %v6326_v48 = vld [vmem:[#allocation10 + $0x70] sm:$0xff] }
 0x2e6   :  { %1546 = vmatprep.subr.mxu1 %v6305_v5  ;;  %v6329_v5 = vld [vmem:[#allocation10 + $0x58] sm:$0xff] }
 0x2e7   :  { %1547 = vmatpush1.msra.mxu1 %v6308_v21  ;;  %v6332_v21 = vld [vmem:[#allocation10 + $0x50] sm:$0xff] }
 0x2e8   :  { %1548 = vmatprep.subr.mxu1 %v6311_v26  ;;  %v6335_v26 = vld [vmem:[#allocation10 + $0x38] sm:$0xff] }
 0x2e9   :  { %1549 = vmatpush1.msra.mxu1 %v6314_v24  ;;  %v6338_v24 = vld [vmem:[#allocation10 + $0x30] sm:$0xff] }
 0x2ea   :  { %1550 = vmatprep.subr.mxu1 %v6317_v14  ;;  %v6341_v14 = vld [vmem:[#allocation10 + $0x18] sm:$0xff] }
 0x2eb   :  { %1551 = vmatpush1.msra.mxu1 %v6320_v10  ;;  %v6344_v10 = vld [vmem:[#allocation10 + $0x10] sm:$0xff] }
 0x2ec   :  { %1552 = vmatprep.subr.mxu1 %v6323_v12 }
 0x2ed   :  { %1553 = vmatpush1.msra.mxu1 %v6326_v48 }
 0x2ee   :  { %1554 = vmatprep.subr.mxu1 %v6329_v5 }
 0x2ef   :  { %1555 = vmatpush1.msra.mxu1 %v6332_v21 }
 0x2f0   :  { %1556 = vmatprep.subr.mxu1 %v6335_v26 }
 0x2f1   :  { %1557 = vmatpush1.msra.mxu1 %v6338_v24 }
 0x2f2   :  { %1558 = vmatprep.subr.mxu1 %v6341_v14 }
 0x2f3   :  { %1559 = vmatpush1.msra.mxu1 %v6344_v10 }
 0x2f4   :  { %1593 = vmatmul.mubr.f32.vlgmr.msra.gmra.mxu1 %v6241_v6  ;;  %1844 = vmatprep.subr.mxu1 %v5936_v38  ;;  %v6384_v38 = vld [vmem:[#allocation13 + $0x78] sm:$0xff] }
 0x2f5   :  { %1845 = vmatpush1.msra.mxu1 %v5939_v36  ;;  %1908 = vmatprep.mubr.f32.mxu1 %v8282_v32  ;;  %v6388_v36 = vld [vmem:[#allocation13 + $0x70] sm:$0xff] }
 0x2f6   :  { %1846 = vmatprep.subr.mxu1 %v5942_v40  ;;  %4645 = vmatpush3.msra.mxu0 %v6384_v38  ;;  %v6392_v40 = vld [vmem:[#allocation13 + $0x68] sm:$0xff] }
 0x2f7   :  { %1847 = vmatpush1.msra.mxu1 %v5945_v44  ;;  %4646 = vmatprep.subr.mxu0 %v8282_v32  ;;  %v6396_v44 = vld [vmem:[#allocation13 + $0x60] sm:$0xff] }
 0x2f8   :  { %1848 = vmatprep.subr.mxu1 %v5948_v23  ;;  %4647 = vmatpush3.msra.mxu0 %v6388_v36  ;;  %v6400_v23 = vld [vmem:[#allocation13 + $0x58] sm:$0xff] }
 0x2f9   :  { %1849 = vmatpush1.msra.mxu1 %v5951_v25  ;;  %4648 = vmatprep.subr.mxu0 %v8282_v32  ;;  %v6404_v25 = vld [vmem:[#allocation13 + $0x50] sm:$0xff] }
 0x2fa   :  { %1850 = vmatprep.subr.mxu1 %v5954_v27  ;;  %4649 = vmatpush3.msra.mxu0 %v6392_v40  ;;  %v6408_v27 = vld [vmem:[#allocation13 + $0x48] sm:$0xff] }
 0x2fb   :  { %1851 = vmatpush1.msra.mxu1 %v5957_v29  ;;  %4650 = vmatprep.subr.mxu0 %v8282_v32  ;;  %v6412_v29 = vld [vmem:[#allocation13 + $0x40] sm:$0xff] }
 0x2fc   :  { %1852 = vmatprep.subr.mxu1 %v5960_v50  ;;  %4651 = vmatpush3.msra.mxu0 %v6396_v44  ;;  %v6416_v50 = vld [vmem:[#allocation13 + $0x38] sm:$0xff] }
 0x2fd   :  { %1853 = vmatpush1.msra.mxu1 %v5963_v58  ;;  %4652 = vmatprep.subr.mxu0 %v8282_v32  ;;  %v6419_v58 = vld [vmem:[#allocation13 + $0x30] sm:$0xff] }
 0x2fe   :  { %1854 = vmatprep.subr.mxu1 %v5966_v60  ;;  %4653 = vmatpush3.msra.mxu0 %v6400_v23  ;;  %v6422_v60 = vld [vmem:[#allocation13 + $0x28] sm:$0xff] }
 0x2ff   :  { %1855 = vmatpush1.msra.mxu1 %v5969_v62  ;;  %4654 = vmatprep.subr.mxu0 %v8282_v32  ;;  %v6426_v62 = vld [vmem:[#allocation13 + $0x20] sm:$0xff] }
 0x300   :  { %1856 = vmatprep.subr.mxu1 %v5972_v54  ;;  %4655 = vmatpush3.msra.mxu0 %v6404_v25  ;;  %v6430_v54 = vld [vmem:[#allocation13 + $0x18] sm:$0xff] }
 0x301   :  { %1857 = vmatpush1.msra.mxu1 %v5975_v53  ;;  %4656 = vmatprep.subr.mxu0 %v8282_v32  ;;  %v6434_v53 = vld [vmem:[#allocation13 + $0x10] sm:$0xff] }
 0x302   :  { %1858 = vmatprep.subr.mxu1 %v5978_v55  ;;  %4657 = vmatpush3.msra.mxu0 %v6408_v27  ;;  %v6438_v55 = vld [vmem:[#allocation13 + $0x8] sm:$0xff] }
 0x303   :  { %1859 = vmatpush1.msra.mxu1 %v5981_v56  ;;  %4658 = vmatprep.subr.mxu0 %v8282_v32  ;;  %v6442_v56 = vld [vmem:[#allocation13] sm:$0xff] }
 0x304   :  { %1860 = vmatprep.subr.mxu1 %v5984_v57  ;;  %4659 = vmatpush3.msra.mxu0 %v6412_v29 }
 0x305   :  { %1861 = vmatpush1.msra.mxu1 %v5987_v59  ;;  %4660 = vmatprep.subr.mxu0 %v8282_v32 }
 0x306   :  { %1862 = vmatprep.subr.mxu1 %v5990_v61  ;;  %4661 = vmatpush3.msra.mxu0 %v6416_v50 }
 0x307   :  { %1863 = vmatpush1.msra.mxu1 %v5992_v2  ;;  %4662 = vmatprep.subr.mxu0 %v8282_v32 }
 0x308   :  { %1864 = vmatprep.subr.mxu1 %v5994_v63  ;;  %4663 = vmatpush3.msra.mxu0 %v6419_v58 }
 0x309   :  { %1865 = vmatpush1.msra.mxu1 %v5997_v33  ;;  %4664 = vmatprep.subr.mxu0 %v8282_v32 }
 0x30a   :  { %1866 = vmatprep.subr.mxu1 %v6000_v39  ;;  %4665 = vmatpush3.msra.mxu0 %v6422_v60 }
 0x30b   :  { %1867 = vmatpush1.msra.mxu1 %v6003_v41  ;;  %4666 = vmatprep.subr.mxu0 %v8282_v32 }
 0x30c   :  { %1868 = vmatprep.subr.mxu1 %v6006_v35  ;;  %4667 = vmatpush3.msra.mxu0 %v6426_v62 }
 0x30d   :  { %1869 = vmatpush1.msra.mxu1 %v6011_v47  ;;  %4668 = vmatprep.subr.mxu0 %v8282_v32 }
 0x30e   :  { %1870 = vmatprep.subr.mxu1 %v6015_v49  ;;  %4669 = vmatpush3.msra.mxu0 %v6430_v54 }
 0x30f   :  { %1871 = vmatpush1.msra.mxu1 %v6018_v52  ;;  %4670 = vmatprep.subr.mxu0 %v8282_v32 }
 0x310   :  { %1872 = vmatprep.subr.mxu1 %v6021_v37  ;;  %4671 = vmatpush3.msra.mxu0 %v6434_v53 }
 0x311   :  { %1873 = vmatpush1.msra.mxu1 %v6024_v45  ;;  %4672 = vmatprep.subr.mxu0 %v8282_v32 }
 0x312   :  { %1874 = vmatprep.subr.mxu1 %v6027_v0  ;;  %4673 = vmatpush3.msra.mxu0 %v6438_v55 }
 0x313   :  { %1875 = vmatpush1.msra.mxu1 %v6030_v4  ;;  %4674 = vmatprep.subr.mxu0 %v8282_v32 }
 0x314   :  { %1986 = vmatprep.subr.mxu1 %v6033_v30  ;;  %4675 = vmatpush3.msra.mxu0 %v6442_v56 }
 0x315   :  { %1915 = vmatprep.subr.mxu0 %v6008_v43 }
 0x372   :  { %v1176_v57 = vpop.f32.mrf.mxu1  ;;  %v1381_v39 = vpop.f32.mrf.mxu0 }
 0x373   :  { %v1177_v59 = vadd.f32 %v6041_v28, %v1176_v57 }
 0x374   :  { %v4643_v61 = vpop.f32.mrf.mxu1  ;;  %v1383_v41 = vpop.f32.mrf.mxu0 }
 0x375   :  { %v1180_v2 = vmul.f32 1.442695, %v1177_v59 }
 0x377   :  { %4903 = vpow2.f32 %v1180_v2 }
 0x384   :  { %v4904_v63 = vpop.eup %4903 }
 0x385   :  { %v1182_v33 = vsel %vm126_vm1, %v1177_v59, %v4904_v63 }
 0x386   :  { %1184 = vst [vmem:[#allocation15 + $0x8] sm:$0xff] %v1182_v33 }
 0x393   :  { %v1523_v35 = vpop.f32.mrf.mxu0  ;;  %v1452_v0 = vpop.f32.mrf.mxu1 }
 0x394   :  { %v1524_v52 = vadd.f32 %v1523_v35, %v1381_v39 }
 0x395   :  { %v1525_v47 = vpop.f32.mrf.mxu0  ;;  %v1454_v6 = vpop.f32.mrf.mxu1 }
 0x396   :  { %v1526_v49 = vadd.f32 %v1525_v47, %v1383_v41  ;;  %v4420_v45 = vmul.f32 -1.442695, %v1524_v52 }
 0x398   :  { %v4421_v37 = vmul.f32 -1.442695, %v1526_v49 }
 0x39a   :  { %4905 = vpow2.f32 %v4421_v37 }
 0x39b   :  { %4907 = vpow2.f32 %v4420_v45 }
 0x3a7   :  { %v4906_v43 = vpop.eup %4905 }
 0x3a8   :  { %v4908_v4 = vpop.eup %4907  ;;  %v1608_v30 = vadd.f32 1.0, %v4906_v43 }
 0x3a9   :  { %v1602_v28 = vadd.f32 1.0, %v4908_v4  ;;  %v8435_v4 = vld [vmem:[#allocation32_spill] sm:$0xff] }
 0x3aa   :  { %4909 = vrcp.f32 %v1608_v30  ;;  %v8436_v30 = vld [vmem:[#allocation72_spill] sm:$0xff] }
 0x3ab   :  { %4911 = vrcp.f32 %v1602_v28  ;;  %v8437_v28 = vld [vmem:[#allocation33_spill] sm:$0xff] }
 0x3b4   :  { %v1594_v57 = vpop.f32.mrf.mxu1 }
 0x3b5   :  { %v1595_v59 = vadd.f32 %v1594_v57, %v1452_v0  ;;  %v8439_v57 = vld [vmem:[#allocation34_spill] sm:$0xff] }
 0x3b6   :  { %v1596_v61 = vpop.f32.mrf.mxu1 }
 0x3b7   :  { %4913 = vtanh.f32 %v1595_v59  ;;  %v1597_v2 = vadd.f32 %v1596_v61, %v1454_v6  ;;  %v4910_v33 = vpop.eup %4909  ;;  %v8438_v6 = vld [vmem:[#allocation74_spill] sm:$0xff]  ;;  %v8440_v59 = vld [vmem:[#allocation76_spill] sm:$0xff]  ;;  %v8441_v61 = vld [vmem:[#allocation35_spill] sm:$0xff] }
 0x3b8   :  { %v4912_v39 = vpop.eup %4911  ;;  %v1618_v35 = vmul.f32 %v4910_v33, %v6050_v1  ;;  %v8420_v1 = vld [vmem:[#allocation56_spill] sm:$0xff] }
 0x3b9   :  { %v4422_v63 = vmul.f32 -1.442695, %v1597_v2  ;;  %v8442_v2 = vld [vmem:[#allocation78_spill] sm:$0xff]  ;;  %v8444_v33 = vld [vmem:[#allocation80_spill] sm:$0xff] }
 0x3bb   :  { %4915 = vpow2.f32 %v4422_v63  ;;  %v8443_v63 = vld [vmem:[#allocation36_spill] sm:$0xff] }
 0x3c4   :  { %v4914_v41 = vpop.eup %4913 }
 0x3c5   :  { %v1619_v47 = vmul.f32 %v4914_v41, %v4912_v39  ;;  %v8445_v39 = vld [vmem:[#allocation37_spill] sm:$0xff]  ;;  %v8446_v41 = vld [vmem:[#allocation82_spill] sm:$0xff] }
 0x3c7   :  { %v6452_v49 = vadd.f32 %v1619_v47, %v1618_v35  ;;  %v8447_v35 = vld [vmem:[#allocation38_spill] sm:$0xff]  ;;  %v8448_v47 = vld [vmem:[#allocation84_spill] sm:$0xff] }
 0x3c8   :  { %v4916_v52 = vpop.eup %4915 }
 0x3c9   :  { %v1615_v37 = vadd.f32 1.0, %v4916_v52  ;;  %4917 = vtanh.f32 %v6452_v49  ;;  %v8449_v52 = vld [vmem:[#allocation39_spill] sm:$0xff] }
 0x3cb   :  { %4919 = vrcp.f32 %v1615_v37  ;;  %v8450_v37 = vld [vmem:[#allocation86_spill] sm:$0xff] }
 0x3d6   :  { %v4918_v45 = vpop.eup %4917 }
 0x3d8   :  { %v4920_v43 = vpop.eup %4919 }
 0x3d9   :  { %v6455_v0 = vmul.f32 %v4920_v43, %v4918_v45  ;;  %v8451_v45 = vld [vmem:[#allocation40_spill] sm:$0xff]  ;;  %v8452_v43 = vld [vmem:[#allocation41_spill] sm:$0xff] }
 0x3db   :  { %4677 = vmatmul.mubr.f32.vlgmr.msra.gmra.mxu0 %v6455_v0  ;;  %1909 = vmatmul.mubr.f32.vlgmr.msra.gmra.mxu1 %v6455_v0 }
 0x3dc   :  { %1916 = vmatpush1.msra.mxu0 %v6055_v7  ;;  %1987 = vmatpush1.msra.mxu1 %v6057_v16  ;;  %v8421_v7 = vld [vmem:[#allocation25_spill] sm:$0xff]  ;;  %v8422_v16 = vld [vmem:[#allocation58_spill] sm:$0xff] }
 0x3dd   :  { %1917 = vmatprep.subr.mxu0 %v6059_v9  ;;  %1988 = vmatprep.subr.mxu1 %v6061_v18  ;;  %v8423_v9 = vld [vmem:[#allocation26_spill] sm:$0xff]  ;;  %v8424_v18 = vld [vmem:[#allocation60_spill] sm:$0xff] }
 0x3de   :  { %1918 = vmatpush1.msra.mxu0 %v6065_v31  ;;  %1989 = vmatpush1.msra.mxu1 %v6067_v11  ;;  %v8425_v31 = vld [vmem:[#allocation27_spill] sm:$0xff]  ;;  %v8426_v11 = vld [vmem:[#allocation62_spill] sm:$0xff] }
 0x3df   :  { %1919 = vmatprep.subr.mxu0 %v6071_v20  ;;  %1990 = vmatprep.subr.mxu1 %v6073_v13  ;;  %v8427_v20 = vld [vmem:[#allocation28_spill] sm:$0xff] }
 0x3e0   :  { %1920 = vmatpush1.msra.mxu0 %v6077_v22  ;;  %1991 = vmatpush1.msra.mxu1 %v6079_v15  ;;  %v8428_v13 = vld [vmem:[#allocation64_spill] sm:$0xff]  ;;  %v8429_v22 = vld [vmem:[#allocation29_spill] sm:$0xff]  ;;  %v8430_v15 = vld [vmem:[#allocation66_spill] sm:$0xff] }
 0x3e1   :  { %1921 = vmatprep.subr.mxu0 %v6083_v42  ;;  %1992 = vmatprep.subr.mxu1 %v6085_v17  ;;  %v8431_v42 = vld [vmem:[#allocation30_spill] sm:$0xff]  ;;  %v8432_v17 = vld [vmem:[#allocation68_spill] sm:$0xff] }
 0x3e2   :  { %1922 = vmatpush1.msra.mxu0 %v6089_v46  ;;  %1993 = vmatpush1.msra.mxu1 %v6091_v19  ;;  %v8433_v46 = vld [vmem:[#allocation31_spill] sm:$0xff]  ;;  %v8434_v19 = vld [vmem:[#allocation70_spill] sm:$0xff] }
 0x3e3   :  { %1923 = vmatprep.subr.mxu0 %v8420_v1  ;;  %1994 = vmatprep.subr.mxu1 %v8421_v7  ;;  %v8453_v1 = vld [vmem:[#allocation89_spill] sm:$0xff]  ;;  %v8454_v7 = vld [vmem:[#allocation42_spill] sm:$0xff] }
 0x3e4   :  { %1924 = vmatpush1.msra.mxu0 %v8422_v16  ;;  %1995 = vmatpush1.msra.mxu1 %v8423_v9  ;;  %v8455_v16 = vld [vmem:[#allocation43_spill] sm:$0xff]  ;;  %v8456_v9 = vld [vmem:[#allocation44_spill] sm:$0xff] }
 0x3e5   :  { %1925 = vmatprep.subr.mxu0 %v8424_v18  ;;  %1996 = vmatprep.subr.mxu1 %v8425_v31  ;;  %v8457_v18 = vld [vmem:[#allocation45_spill] sm:$0xff]  ;;  %v8458_v31 = vld [vmem:[#allocation46_spill] sm:$0xff] }
 0x3e6   :  { %1926 = vmatpush1.msra.mxu0 %v8426_v11  ;;  %1997 = vmatpush1.msra.mxu1 %v8427_v20  ;;  %v8459_v11 = vld [vmem:[#allocation47_spill] sm:$0xff]  ;;  %v8460_v20 = vld [vmem:[#allocation48_spill] sm:$0xff] }
 0x3e7   :  { %1927 = vmatprep.subr.mxu0 %v8428_v13  ;;  %1998 = vmatprep.subr.mxu1 %v8429_v22  ;;  %v8461_v13 = vld [vmem:[#allocation49_spill] sm:$0xff]  ;;  %v8462_v22 = vld [vmem:[#allocation50_spill] sm:$0xff] }
 0x3e8   :  { %1928 = vmatpush1.msra.mxu0 %v8430_v15  ;;  %1999 = vmatpush1.msra.mxu1 %v8431_v42  ;;  %v6519_v15 = vld [vmem:[#allocation4 + $0x18] sm:$0xff]  ;;  %v8466_v42 = vld [vmem:[#allocation54_spill] sm:$0xff] }
 0x3e9   :  { %1929 = vmatprep.subr.mxu0 %v8432_v17  ;;  %2000 = vmatprep.subr.mxu1 %v8433_v46  ;;  %v8467_v17 = vld [vmem:[#allocation55_spill] sm:$0xff]  ;;  %v8468_v46 = vld [vmem:[#allocation57_spill] sm:$0xff] }
 0x3ea   :  { %1930 = vmatpush1.msra.mxu0 %v8434_v19  ;;  %2001 = vmatpush1.msra.mxu1 %v8435_v4  ;;  %v8469_v19 = vld [vmem:[#allocation59_spill] sm:$0xff] }
 0x3eb   :  { %1931 = vmatprep.subr.mxu0 %v8436_v30  ;;  %2002 = vmatprep.subr.mxu1 %v8437_v28  ;;  %v8471_v4 = vld [vmem:[#allocation63_spill] sm:$0xff]  ;;  %v8472_v30 = vld [vmem:[#allocation65_spill] sm:$0xff] }
 0x3ec   :  { %1932 = vmatpush1.msra.mxu0 %v8438_v6  ;;  %2003 = vmatpush1.msra.mxu1 %v8439_v57  ;;  %v8474_v28 = vld [vmem:[#allocation69_spill] sm:$0xff] }
 0x3ed   :  { %1933 = vmatprep.subr.mxu0 %v8440_v59  ;;  %2004 = vmatprep.subr.mxu1 %v8441_v61  ;;  %v8476_v6 = vld [vmem:[#allocation73_spill] sm:$0xff] }
 0x3ee   :  { %1934 = vmatpush1.msra.mxu0 %v8442_v2  ;;  %2005 = vmatpush1.msra.mxu1 %v8443_v63  ;;  %v8478_v57 = vld [vmem:[#allocation77_spill] sm:$0xff]  ;;  %v8484_v2 = vld [vmem:[#allocation88_spill] sm:$0xff]  ;;  %v8486_v63 = vld [vmem:[#allocation91_spill] sm:$0xff] }
 0x3ef   :  { %1935 = vmatprep.subr.mxu0 %v8444_v33  ;;  %2006 = vmatprep.subr.mxu1 %v8445_v39  ;;  %v8480_v59 = vld [vmem:[#allocation81_spill] sm:$0xff]  ;;  %v6644_v39 = vld [vmem:[#allocation12 + $0xe8] sm:$0xff] }
 0x3f0   :  { %1936 = vmatpush1.msra.mxu0 %v8446_v41  ;;  %2007 = vmatpush1.msra.mxu1 %v8447_v35  ;;  %v8482_v61 = vld [vmem:[#allocation85_spill] sm:$0xff]  ;;  %v6647_v41 = vld [vmem:[#allocation12 + $0xe0] sm:$0xff]  ;;  %v6650_v35 = vld [vmem:[#allocation12 + $0xc8] sm:$0xff] }
 0x3f1   :  { %1937 = vmatprep.subr.mxu0 %v8448_v47  ;;  %2008 = vmatprep.subr.mxu1 %v8449_v52  ;;  %v8488_v33 = vld [vmem:[#allocation93_spill] sm:$0xff]  ;;  %v6652_v47 = vld [vmem:[#allocation12 + $0xc0] sm:$0xff]  ;;  %v6654_v52 = vld [vmem:[#allocation12 + $0xa8] sm:$0xff] }
 0x3f2   :  { %1938 = vmatpush1.msra.mxu0 %v8450_v37  ;;  %2009 = vmatpush1.msra.mxu1 %v8451_v45  ;;  %v6657_v37 = vld [vmem:[#allocation12 + $0xa0] sm:$0xff]  ;;  %v6660_v45 = vld [vmem:[#allocation12 + $0x88] sm:$0xff] }
 0x3f3   :  { %1939 = vmatprep.subr.mxu0 %v8452_v43  ;;  %2010 = vmatprep.subr.mxu1 %v8453_v1  ;;  %v6663_v43 = vld [vmem:[#allocation12 + $0x80] sm:$0xff]  ;;  %v6666_v1 = vld [vmem:[#allocation12 + $0x68] sm:$0xff] }
 0x3f4   :  { %1940 = vmatpush1.msra.mxu0 %v8454_v7  ;;  %2011 = vmatpush1.msra.mxu1 %v8455_v16  ;;  %v6668_v7 = vld [vmem:[#allocation12 + $0x1f8] sm:$0xff]  ;;  %v6671_v16 = vld [vmem:[#allocation12 + $0x60] sm:$0xff] }
 0x3f5   :  { %1941 = vmatprep.subr.mxu0 %v6203_v34  ;;  %2012 = vmatprep.subr.mxu1 %v8456_v9  ;;  %v8463_v34 = vld [vmem:[#allocation51_spill] sm:$0xff]  ;;  %v6675_v9 = vld [vmem:[#allocation12 + $0x48] sm:$0xff] }
 0x3f6   :  { %1942 = vmatpush1.msra.mxu0 %v6209_v51  ;;  %2013 = vmatpush1.msra.mxu1 %v8457_v18  ;;  %v8464_v51 = vld [vmem:[#allocation52_spill] sm:$0xff]  ;;  %v6678_v18 = vld [vmem:[#allocation12 + $0x40] sm:$0xff] }
 0x3f7   :  { %1943 = vmatprep.subr.mxu0 %v8458_v31  ;;  %2014 = vmatprep.subr.mxu1 %v6217_v3  ;;  %v8465_v3 = vld [vmem:[#allocation53_spill] sm:$0xff]  ;;  %v6681_v31 = vld [vmem:[#allocation12 + $0x28] sm:$0xff] }
 0x3f8   :  { %1944 = vmatpush1.msra.mxu0 %v8459_v11  ;;  %2015 = vmatpush1.msra.mxu1 %v8460_v20  ;;  %v6684_v11 = vld [vmem:[#allocation12 + $0x20] sm:$0xff]  ;;  %v6687_v20 = vld [vmem:[#allocation12 + $0x8] sm:$0xff] }
 0x3f9   :  { %1945 = vmatprep.subr.mxu0 %v8461_v13  ;;  %2016 = vmatprep.subr.mxu1 %v8462_v22  ;;  %v6690_v13 = vld [vmem:[#allocation12] sm:$0xff]  ;;  %v6693_v22 = vld [vmem:[#allocation10 + $0x1e8] sm:$0xff] }
 0x3fa   :  { %1946 = vmatpush1.msra.mxu0 %v8463_v34  ;;  %1979 = vmatprep.mubr.f32.mxu0 %v8282_v32  ;;  %v6701_v34 = vld [vmem:[%s7936_s6] ss:$0 sm:$0xff] }
 0x3fb   :  { %2017 = vmatpush1.msra.mxu1 %v8464_v51  ;;  %2050 = vmatprep.mubr.f32.mxu1 %v8282_v32 }
 0x3fc   :  { %1980 = vmatmul.mubr.f32.vlgmr.msra.gmra.mxu0 %v6455_v0  ;;  %2051 = vmatmul.mubr.f32.vlgmr.msra.gmra.mxu1 %v6519_v15  ;;  %v8470_v0 = vld [vmem:[#allocation61_spill] sm:$0xff] }
 0x3fd   :  { %2057 = vmatprep.subr.mxu0 %v8465_v3  ;;  %2121 = vmatprep.mubr.f32.mxu0 %v8282_v32 }
 0x3fe   :  { %2058 = vmatpush1.msra.mxu0 %v8466_v42  ;;  %4679 = vmatprep.subr.mxu1 %v8282_v32 }
 0x3ff   :  { %2059 = vmatprep.subr.mxu0 %v8467_v17  ;;  %4680 = vmatpush3.msra.mxu1 %v6384_v38  ;;  %v8473_v38 = vld [vmem:[#allocation67_spill] sm:$0xff] }
 0x400   :  { %2060 = vmatpush1.msra.mxu0 %v8468_v46  ;;  %4681 = vmatprep.subr.mxu1 %v8282_v32 }
 0x401   :  { %2061 = vmatprep.subr.mxu0 %v8469_v19  ;;  %4682 = vmatpush3.msra.mxu1 %v6388_v36  ;;  %v8475_v36 = vld [vmem:[#allocation71_spill] sm:$0xff] }
 0x402   :  { %2062 = vmatpush1.msra.mxu0 %v8470_v0  ;;  %4683 = vmatprep.subr.mxu1 %v8282_v32 }
 0x403   :  { %2063 = vmatprep.subr.mxu0 %v8471_v4  ;;  %4684 = vmatpush3.msra.mxu1 %v6392_v40  ;;  %v8477_v40 = vld [vmem:[#allocation75_spill] sm:$0xff] }
 0x404   :  { %2064 = vmatpush1.msra.mxu0 %v8472_v30  ;;  %4685 = vmatprep.subr.mxu1 %v8282_v32 }
 0x405   :  { %2065 = vmatprep.subr.mxu0 %v8473_v38  ;;  %4686 = vmatpush3.msra.mxu1 %v6396_v44  ;;  %v8479_v44 = vld [vmem:[#allocation79_spill] sm:$0xff] }
 0x406   :  { %2066 = vmatpush1.msra.mxu0 %v8474_v28  ;;  %4687 = vmatprep.subr.mxu1 %v8282_v32 }
 0x407   :  { %2067 = vmatprep.subr.mxu0 %v8475_v36  ;;  %4688 = vmatpush3.msra.mxu1 %v6400_v23  ;;  %v8481_v23 = vld [vmem:[#allocation83_spill] sm:$0xff] }
 0x408   :  { %2068 = vmatpush1.msra.mxu0 %v8476_v6  ;;  %4689 = vmatprep.subr.mxu1 %v8282_v32 }
 0x409   :  { %2069 = vmatprep.subr.mxu0 %v8477_v40  ;;  %4690 = vmatpush3.msra.mxu1 %v6404_v25  ;;  %v8483_v25 = vld [vmem:[#allocation87_spill] sm:$0xff] }
 0x40a   :  { %2070 = vmatpush1.msra.mxu0 %v8478_v57  ;;  %4691 = vmatprep.subr.mxu1 %v8282_v32 }
 0x40b   :  { %2071 = vmatprep.subr.mxu0 %v8479_v44  ;;  %4692 = vmatpush3.msra.mxu1 %v6408_v27  ;;  %v8485_v27 = vld [vmem:[#allocation90_spill] sm:$0xff] }
 0x40c   :  { %2072 = vmatpush1.msra.mxu0 %v8480_v59  ;;  %4693 = vmatprep.subr.mxu1 %v8282_v32 }
 0x40d   :  { %2073 = vmatprep.subr.mxu0 %v8481_v23  ;;  %4694 = vmatpush3.msra.mxu1 %v6412_v29  ;;  %v8487_v29 = vld [vmem:[#allocation92_spill] sm:$0xff] }
 0x40e   :  { %2074 = vmatpush1.msra.mxu0 %v8482_v61  ;;  %4695 = vmatprep.subr.mxu1 %v8282_v32 }
 0x40f   :  { %2075 = vmatprep.subr.mxu0 %v8483_v25  ;;  %4696 = vmatpush3.msra.mxu1 %v6416_v50  ;;  %v6620_v50 = vld [vmem:[#allocation12 + $0x168] sm:$0xff] }
 0x410   :  { %2076 = vmatpush1.msra.mxu0 %v8484_v2  ;;  %4697 = vmatprep.subr.mxu1 %v8282_v32 }
 0x411   :  { %2077 = vmatprep.subr.mxu0 %v8485_v27  ;;  %4698 = vmatpush3.msra.mxu1 %v6419_v58  ;;  %v6623_v58 = vld [vmem:[#allocation12 + $0x160] sm:$0xff] }
 0x412   :  { %2078 = vmatpush1.msra.mxu0 %v8486_v63  ;;  %4699 = vmatprep.subr.mxu1 %v8282_v32 }
 0x413   :  { %2079 = vmatprep.subr.mxu0 %v8487_v29  ;;  %4700 = vmatpush3.msra.mxu1 %v6422_v60  ;;  %v6626_v60 = vld [vmem:[#allocation12 + $0x148] sm:$0xff] }
 0x414   :  { %2080 = vmatpush1.msra.mxu0 %v8488_v33  ;;  %4701 = vmatprep.subr.mxu1 %v8282_v32 }
 0x415   :  { %2081 = vmatprep.subr.mxu0 %v6323_v12  ;;  %4702 = vmatpush3.msra.mxu1 %v6426_v62  ;;  %v6611_v12 = vld [vmem:[#allocation12 + $0x1a0] sm:$0xff] }
 0x416   :  { %2082 = vmatpush1.msra.mxu0 %v6326_v48  ;;  %4703 = vmatprep.subr.mxu1 %v8282_v32  ;;  %v6596_v48 = vld [vmem:[#allocation12 + $0x1e8] sm:$0xff]  ;;  %v6629_v62 = vld [vmem:[#allocation12 + $0x140] sm:$0xff] }
 0x417   :  { %2083 = vmatprep.subr.mxu0 %v6329_v5  ;;  %4704 = vmatpush3.msra.mxu1 %v6430_v54  ;;  %v6614_v5 = vld [vmem:[#allocation12 + $0x188] sm:$0xff] }
 0x418   :  { %2084 = vmatpush1.msra.mxu0 %v6332_v21  ;;  %4705 = vmatprep.subr.mxu1 %v8282_v32  ;;  %v6599_v21 = vld [vmem:[#allocation12 + $0x1e0] sm:$0xff]  ;;  %v6632_v54 = vld [vmem:[#allocation12 + $0x128] sm:$0xff] }
 0x419   :  { %2085 = vmatprep.subr.mxu0 %v6335_v26  ;;  %4706 = vmatpush3.msra.mxu1 %v6434_v53  ;;  %v6602_v26 = vld [vmem:[#allocation12 + $0x1c8] sm:$0xff]  ;;  %v6635_v53 = vld [vmem:[#allocation12 + $0x120] sm:$0xff] }
 0x41a   :  { %2086 = vmatpush1.msra.mxu0 %v6338_v24  ;;  %4707 = vmatprep.subr.mxu1 %v8282_v32  ;;  %v6605_v24 = vld [vmem:[#allocation12 + $0x1c0] sm:$0xff] }
 0x41b   :  { %2087 = vmatprep.subr.mxu0 %v6341_v14  ;;  %4708 = vmatpush3.msra.mxu1 %v6438_v55  ;;  %v6617_v14 = vld [vmem:[#allocation12 + $0x180] sm:$0xff]  ;;  %v6638_v55 = vld [vmem:[#allocation12 + $0x108] sm:$0xff] }
 0x41c   :  { %2088 = vmatpush1.msra.mxu0 %v6344_v10  ;;  %4709 = vmatprep.subr.mxu1 %v8282_v32  ;;  %v6608_v10 = vld [vmem:[#allocation12 + $0x1a8] sm:$0xff] }
 0x41d   :  { %2122 = vmatmul.mubr.f32.vlgmr.msra.gmra.mxu0 %v6519_v15  ;;  %4710 = vmatpush3.msra.mxu1 %v6442_v56  ;;  %v6641_v56 = vld [vmem:[#allocation12 + $0x100] sm:$0xff] }
 0x41e   :  { %4711 = vmatprep.mubr.msk.f32.mxu1 %vm5219_vm0, %v8282_v32  ;;  %2437 = vmatprep.mubr.f32.mxu0 %v8282_v32 }
 0x41f   :  { %2373 = vmatprep.subr.mxu0 %v6596_v48  ;;  %2444 = vmatprep.subr.mxu1 %v6668_v7 }
 0x420   :  { %2374 = vmatpush1.msra.mxu0 %v6599_v21 }
 0x421   :  { %2375 = vmatprep.subr.mxu0 %v6602_v26 }
 0x422   :  { %2376 = vmatpush1.msra.mxu0 %v6605_v24 }
 0x423   :  { %2377 = vmatprep.subr.mxu0 %v6608_v10 }
 0x424   :  { %2378 = vmatpush1.msra.mxu0 %v6611_v12 }
 0x425   :  { %2379 = vmatprep.subr.mxu0 %v6614_v5 }
 0x426   :  { %2380 = vmatpush1.msra.mxu0 %v6617_v14 }
 0x427   :  { %2381 = vmatprep.subr.mxu0 %v6620_v50 }
 0x428   :  { %2382 = vmatpush1.msra.mxu0 %v6623_v58 }
 0x429   :  { %2383 = vmatprep.subr.mxu0 %v6626_v60 }
 0x42a   :  { %2384 = vmatpush1.msra.mxu0 %v6629_v62 }
 0x42b   :  { %2385 = vmatprep.subr.mxu0 %v6632_v54 }
 0x42c   :  { %2386 = vmatpush1.msra.mxu0 %v6635_v53 }
 0x42d   :  { %2387 = vmatprep.subr.mxu0 %v6638_v55 }
 0x42e   :  { %2388 = vmatpush1.msra.mxu0 %v6641_v56 }
 0x42f   :  { %2389 = vmatprep.subr.mxu0 %v6644_v39 }
 0x430   :  { %2390 = vmatpush1.msra.mxu0 %v6647_v41 }
 0x431   :  { %2391 = vmatprep.subr.mxu0 %v6650_v35 }
 0x432   :  { %2392 = vmatpush1.msra.mxu0 %v6652_v47 }
 0x433   :  { %2393 = vmatprep.subr.mxu0 %v6654_v52 }
 0x434   :  { %2394 = vmatpush1.msra.mxu0 %v6657_v37 }
 0x435   :  { %2395 = vmatprep.subr.mxu0 %v6660_v45 }
 0x436   :  { %2396 = vmatpush1.msra.mxu0 %v6663_v43 }
 0x437   :  { %2397 = vmatprep.subr.mxu0 %v6666_v1 }
 0x438   :  { %2398 = vmatpush1.msra.mxu0 %v6671_v16 }
 0x439   :  { %2399 = vmatprep.subr.mxu0 %v6675_v9 }
 0x43a   :  { %2400 = vmatpush1.msra.mxu0 %v6678_v18 }
 0x43b   :  { %2401 = vmatprep.subr.mxu0 %v6681_v31 }
 0x43c   :  { %2402 = vmatpush1.msra.mxu0 %v6684_v11 }
 0x43d   :  { %2403 = vmatprep.subr.mxu0 %v6687_v20 }
 0x43e   :  { %2404 = vmatpush1.msra.mxu0 %v6690_v13 }
 0x43f   :  { %2515 = vmatprep.subr.mxu0 %v6693_v22 }
 0x49b   :  { %v1705_v15 = vpop.f32.mrf.mxu0  ;;  %v1910_v19 = vpop.f32.mrf.mxu1 }
 0x49c   :  { %v1706_v51 = vadd.f32 %v6701_v34, %v1705_v15 }
 0x49d   :  { %v4678_v3 = vpop.f32.mrf.mxu0  ;;  %v1912_v0 = vpop.f32.mrf.mxu1 }
 0x49e   :  { %v1709_v42 = vmul.f32 1.442695, %v1706_v51 }
 0x4a0   :  { %4921 = vpow2.f32 %v1709_v42 }
 0x4ad   :  { %v4922_v17 = vpop.eup %4921 }
 0x4ae   :  { %v1711_v46 = vsel %vm126_vm1, %v1706_v51, %v4922_v17 }
 0x4af   :  { %1713 = vst [vmem:[#allocation15 + $0x10] sm:$0xff] %v1711_v46 }
 0x4bc   :  { %v2052_v4 = vpop.f32.mrf.mxu1  ;;  %v1981_v57 = vpop.f32.mrf.mxu0 }
 0x4bd   :  { %v2053_v28 = vadd.f32 %v2052_v4, %v1910_v19 }
 0x4be   :  { %v2054_v30 = vpop.f32.mrf.mxu1  ;;  %v1983_v61 = vpop.f32.mrf.mxu0 }
 0x4bf   :  { %v2055_v38 = vadd.f32 %v2054_v30, %v1912_v0  ;;  %v4423_v6 = vmul.f32 -1.442695, %v2053_v28  ;;  %v6714_v28 = vld [vmem:[#allocation10 + $0x1e0] sm:$0xff] }
 0x4c1   :  { %v4424_v36 = vmul.f32 -1.442695, %v2055_v38  ;;  %v6712_v38 = vld [vmem:[#allocation12 + $0x1f0] sm:$0xff] }
 0x4c3   :  { %4923 = vpow2.f32 %v4424_v36  ;;  %v6716_v36 = vld [vmem:[#allocation12 + $0x1d8] sm:$0xff] }
 0x4c4   :  { %4925 = vpow2.f32 %v4423_v6  ;;  %v6718_v6 = vld [vmem:[#allocation10 + $0x1c8] sm:$0xff] }
 0x4d0   :  { %v4924_v40 = vpop.eup %4923 }
 0x4d1   :  { %v4926_v44 = vpop.eup %4925  ;;  %v2137_v59 = vadd.f32 1.0, %v4924_v40  ;;  %v6724_v40 = vld [vmem:[#allocation10 + $0x1c0] sm:$0xff] }
 0x4d2   :  { %v2131_v23 = vadd.f32 1.0, %v4926_v44  ;;  %v6730_v44 = vld [vmem:[#allocation10 + $0x1a8] sm:$0xff] }
 0x4d3   :  { %4927 = vrcp.f32 %v2137_v59  ;;  %v6734_v59 = vld [vmem:[#allocation12 + $0x1b0] sm:$0xff] }
 0x4d4   :  { %4929 = vrcp.f32 %v2131_v23  ;;  %v6736_v23 = vld [vmem:[#allocation10 + $0x1a0] sm:$0xff] }
 0x4dd   :  { %v2123_v25 = vpop.f32.mrf.mxu0 }
 0x4de   :  { %v2124_v2 = vadd.f32 %v2123_v25, %v1981_v57  ;;  %v6728_v57 = vld [vmem:[#allocation12 + $0x1b8] sm:$0xff]  ;;  %v6742_v25 = vld [vmem:[#allocation10 + $0x188] sm:$0xff] }
 0x4df   :  { %v2125_v27 = vpop.f32.mrf.mxu0 }
 0x4e0   :  { %4931 = vtanh.f32 %v2124_v2  ;;  %v2126_v63 = vadd.f32 %v2125_v27, %v1983_v61  ;;  %v4928_v33 = vpop.eup %4927  ;;  %v6740_v61 = vld [vmem:[#allocation12 + $0x198] sm:$0xff]  ;;  %v6746_v2 = vld [vmem:[#allocation12 + $0x190] sm:$0xff]  ;;  %v6748_v27 = vld [vmem:[#allocation10 + $0x180] sm:$0xff] }
 0x4e1   :  { %v4930_v15 = vpop.eup %4929  ;;  %v2147_v3 = vmul.f32 %v4928_v33, %v6452_v49  ;;  %v6722_v49 = vld [vmem:[#allocation12 + $0x1d0] sm:$0xff] }
 0x4e2   :  { %v4425_v29 = vmul.f32 -1.442695, %v2126_v63  ;;  %v6752_v63 = vld [vmem:[#allocation12 + $0x178] sm:$0xff]  ;;  %v6758_v33 = vld [vmem:[#allocation12 + $0x170] sm:$0xff] }
 0x4e3   :  { %8489 = vst [vmem:[#allocation56_spill] sm:$0xff] %v6752_v63  ;;  %8491 = vst [vmem:[#allocation58_spill] sm:$0xff] %v6758_v33 }
 0x4e4   :  { %4933 = vpow2.f32 %v4425_v29  ;;  %v6754_v29 = vld [vmem:[#allocation10 + $0x168] sm:$0xff] }
 0x4e5   :  { %8490 = vst [vmem:[#allocation25_spill] sm:$0xff] %v6754_v29 }
 0x4ed   :  { %v4932_v51 = vpop.eup %4931 }
 0x4ee   :  { %v2148_v42 = vmul.f32 %v4932_v51, %v4930_v15  ;;  %v6760_v15 = vld [vmem:[#allocation10 + $0x160] sm:$0xff]  ;;  %v6764_v51 = vld [vmem:[#allocation12 + $0x158] sm:$0xff] }
 0x4ef   :  { %8492 = vst [vmem:[#allocation26_spill] sm:$0xff] %v6760_v15  ;;  %8493 = vst [vmem:[#allocation60_spill] sm:$0xff] %v6764_v51 }
 0x4f0   :  { %v6707_v17 = vadd.f32 %v2148_v42, %v2147_v3  ;;  %v6766_v3 = vld [vmem:[#allocation10 + $0x148] sm:$0xff]  ;;  %v6770_v42 = vld [vmem:[#allocation12 + $0x150] sm:$0xff] }
 0x4f1   :  { %v4934_v46 = vpop.eup %4933  ;;  %8494 = vst [vmem:[#allocation27_spill] sm:$0xff] %v6766_v3  ;;  %8495 = vst [vmem:[#allocation62_spill] sm:$0xff] %v6770_v42 }
 0x4f2   :  { %v2144_v19 = vadd.f32 1.0, %v4934_v46  ;;  %4935 = vtanh.f32 %v6707_v17  ;;  %v6772_v46 = vld [vmem:[#allocation10 + $0x140] sm:$0xff] }
 0x4f3   :  { %8496 = vst [vmem:[#allocation28_spill] sm:$0xff] %v6772_v46 }
 0x4f4   :  { %4937 = vrcp.f32 %v2144_v19  ;;  %v6776_v19 = vld [vmem:[#allocation12 + $0x138] sm:$0xff] }
 0x4f5   :  { %8497 = vst [vmem:[#allocation64_spill] sm:$0xff] %v6776_v19 }
 0x4ff   :  { %v4936_v0 = vpop.eup %4935 }
 0x501   :  { %v4938_v4 = vpop.eup %4937 }
 0x502   :  { %v6710_v30 = vmul.f32 %v4938_v4, %v4936_v0  ;;  %v6778_v0 = vld [vmem:[#allocation10 + $0x128] sm:$0xff]  ;;  %v6782_v4 = vld [vmem:[#allocation12 + $0x130] sm:$0xff] }
 0x503   :  { %8498 = vst [vmem:[#allocation29_spill] sm:$0xff] %v6778_v0  ;;  %8499 = vst [vmem:[#allocation66_spill] sm:$0xff] %v6782_v4 }
 0x504   :  { %4712 = vmatmul.mubr.f32.vlgmr.msra.gmra.mxu1 %v6710_v30  ;;  %2438 = vmatmul.mubr.f32.vlgmr.msra.gmra.mxu0 %v6710_v30 }
 0x505   :  { %2445 = vmatpush1.msra.mxu1 %v6712_v38  ;;  %2516 = vmatpush1.msra.mxu0 %v6714_v28 }
 0x506   :  { %2446 = vmatprep.subr.mxu1 %v6716_v36  ;;  %2517 = vmatprep.subr.mxu0 %v6718_v6 }
 0x507   :  { %2447 = vmatpush1.msra.mxu1 %v6722_v49  ;;  %2518 = vmatpush1.msra.mxu0 %v6724_v40 }
 0x508   :  { %2448 = vmatprep.subr.mxu1 %v6728_v57  ;;  %2519 = vmatprep.subr.mxu0 %v6730_v44 }
 0x509   :  { %2449 = vmatpush1.msra.mxu1 %v6734_v59  ;;  %2520 = vmatpush1.msra.mxu0 %v6736_v23 }
 0x50a   :  { %2450 = vmatprep.subr.mxu1 %v6740_v61  ;;  %2521 = vmatprep.subr.mxu0 %v6742_v25 }
 0x50b   :  { %2451 = vmatpush1.msra.mxu1 %v6746_v2  ;;  %2522 = vmatpush1.msra.mxu0 %v6748_v27 }
 0x50c   :  { %2452 = vmatprep.subr.mxu1 %v6752_v63  ;;  %2523 = vmatprep.subr.mxu0 %v6754_v29  ;;  %v6784_v63 = vld [vmem:[#allocation10 + $0x120] sm:$0xff]  ;;  %v6788_v29 = vld [vmem:[#allocation12 + $0x118] sm:$0xff] }
 0x50d   :  { %2453 = vmatpush1.msra.mxu1 %v6758_v33  ;;  %2524 = vmatpush1.msra.mxu0 %v6760_v15  ;;  %8500 = vst [vmem:[#allocation30_spill] sm:$0xff] %v6784_v63  ;;  %8501 = vst [vmem:[#allocation68_spill] sm:$0xff] %v6788_v29  ;;  %v6790_v33 = vld [vmem:[#allocation10 + $0x108] sm:$0xff]  ;;  %v6794_v15 = vld [vmem:[#allocation12 + $0x110] sm:$0xff] }
 0x50e   :  { %2454 = vmatprep.subr.mxu1 %v6764_v51  ;;  %2525 = vmatprep.subr.mxu0 %v6766_v3  ;;  %8502 = vst [vmem:[#allocation31_spill] sm:$0xff] %v6790_v33  ;;  %8503 = vst [vmem:[#allocation70_spill] sm:$0xff] %v6794_v15  ;;  %v6796_v51 = vld [vmem:[#allocation10 + $0x100] sm:$0xff]  ;;  %v6800_v3 = vld [vmem:[#allocation12 + $0xf8] sm:$0xff] }
 0x50f   :  { %2455 = vmatpush1.msra.mxu1 %v6770_v42  ;;  %2526 = vmatpush1.msra.mxu0 %v6772_v46  ;;  %8504 = vst [vmem:[#allocation32_spill] sm:$0xff] %v6796_v51  ;;  %8505 = vst [vmem:[#allocation72_spill] sm:$0xff] %v6800_v3  ;;  %v6802_v42 = vld [vmem:[#allocation10 + $0xe8] sm:$0xff]  ;;  %v6806_v46 = vld [vmem:[#allocation12 + $0xf0] sm:$0xff] }
 0x510   :  { %2456 = vmatprep.subr.mxu1 %v6776_v19  ;;  %2527 = vmatprep.subr.mxu0 %v6778_v0  ;;  %8506 = vst [vmem:[#allocation33_spill] sm:$0xff] %v6802_v42  ;;  %8507 = vst [vmem:[#allocation74_spill] sm:$0xff] %v6806_v46  ;;  %v6808_v19 = vld [vmem:[#allocation10 + $0xe0] sm:$0xff]  ;;  %v6812_v0 = vld [vmem:[#allocation12 + $0xd8] sm:$0xff] }
 0x511   :  { %2457 = vmatpush1.msra.mxu1 %v6782_v4  ;;  %2528 = vmatpush1.msra.mxu0 %v6784_v63  ;;  %8508 = vst [vmem:[#allocation34_spill] sm:$0xff] %v6808_v19  ;;  %8509 = vst [vmem:[#allocation76_spill] sm:$0xff] %v6812_v0  ;;  %v6814_v4 = vld [vmem:[#allocation10 + $0xc8] sm:$0xff]  ;;  %v6818_v63 = vld [vmem:[#allocation12 + $0xd0] sm:$0xff] }
 0x512   :  { %2458 = vmatprep.subr.mxu1 %v6788_v29  ;;  %2529 = vmatprep.subr.mxu0 %v6790_v33  ;;  %8510 = vst [vmem:[#allocation35_spill] sm:$0xff] %v6814_v4  ;;  %8511 = vst [vmem:[#allocation78_spill] sm:$0xff] %v6818_v63  ;;  %v6820_v29 = vld [vmem:[#allocation10 + $0xc0] sm:$0xff]  ;;  %v6824_v33 = vld [vmem:[#allocation12 + $0xb8] sm:$0xff] }
 0x513   :  { %2459 = vmatpush1.msra.mxu1 %v6794_v15  ;;  %2530 = vmatpush1.msra.mxu0 %v6796_v51  ;;  %8512 = vst [vmem:[#allocation36_spill] sm:$0xff] %v6820_v29  ;;  %8513 = vst [vmem:[#allocation80_spill] sm:$0xff] %v6824_v33  ;;  %v6826_v15 = vld [vmem:[#allocation10 + $0xa8] sm:$0xff]  ;;  %v6830_v51 = vld [vmem:[#allocation12 + $0xb0] sm:$0xff] }
 0x514   :  { %2460 = vmatprep.subr.mxu1 %v6800_v3  ;;  %2531 = vmatprep.subr.mxu0 %v6802_v42  ;;  %8514 = vst [vmem:[#allocation37_spill] sm:$0xff] %v6826_v15  ;;  %8515 = vst [vmem:[#allocation82_spill] sm:$0xff] %v6830_v51  ;;  %v6832_v3 = vld [vmem:[#allocation10 + $0xa0] sm:$0xff]  ;;  %v6836_v42 = vld [vmem:[#allocation12 + $0x98] sm:$0xff] }
 0x515   :  { %2461 = vmatpush1.msra.mxu1 %v6806_v46  ;;  %2532 = vmatpush1.msra.mxu0 %v6808_v19  ;;  %8516 = vst [vmem:[#allocation38_spill] sm:$0xff] %v6832_v3  ;;  %8517 = vst [vmem:[#allocation84_spill] sm:$0xff] %v6836_v42  ;;  %v6838_v46 = vld [vmem:[#allocation10 + $0x88] sm:$0xff]  ;;  %v6842_v19 = vld [vmem:[#allocation12 + $0x90] sm:$0xff] }
 0x516   :  { %2462 = vmatprep.subr.mxu1 %v6812_v0  ;;  %2533 = vmatprep.subr.mxu0 %v6814_v4  ;;  %8518 = vst [vmem:[#allocation39_spill] sm:$0xff] %v6838_v46  ;;  %8519 = vst [vmem:[#allocation86_spill] sm:$0xff] %v6842_v19  ;;  %v6844_v0 = vld [vmem:[#allocation10 + $0x80] sm:$0xff]  ;;  %v6848_v4 = vld [vmem:[#allocation12 + $0x78] sm:$0xff] }
 0x517   :  { %2463 = vmatpush1.msra.mxu1 %v6818_v63  ;;  %2534 = vmatpush1.msra.mxu0 %v6820_v29  ;;  %8520 = vst [vmem:[#allocation40_spill] sm:$0xff] %v6844_v0  ;;  %8521 = vst [vmem:[#allocation41_spill] sm:$0xff] %v6848_v4  ;;  %v6850_v63 = vld [vmem:[#allocation10 + $0x68] sm:$0xff]  ;;  %v6854_v29 = vld [vmem:[#allocation12 + $0x70] sm:$0xff] }
 0x518   :  { %2464 = vmatprep.subr.mxu1 %v6824_v33  ;;  %2535 = vmatprep.subr.mxu0 %v6826_v15  ;;  %8522 = vst [vmem:[#allocation89_spill] sm:$0xff] %v6850_v63  ;;  %8523 = vst [vmem:[#allocation42_spill] sm:$0xff] %v6854_v29  ;;  %v6856_v33 = vld [vmem:[#allocation10 + $0x60] sm:$0xff]  ;;  %v6860_v15 = vld [vmem:[#allocation12 + $0x58] sm:$0xff] }
 0x519   :  { %2465 = vmatpush1.msra.mxu1 %v6830_v51  ;;  %2536 = vmatpush1.msra.mxu0 %v6832_v3  ;;  %8524 = vst [vmem:[#allocation43_spill] sm:$0xff] %v6856_v33  ;;  %v6862_v51 = vld [vmem:[#allocation10 + $0x48] sm:$0xff]  ;;  %v6866_v3 = vld [vmem:[#allocation12 + $0x50] sm:$0xff] }
 0x51a   :  { %2466 = vmatprep.subr.mxu1 %v6836_v42  ;;  %2537 = vmatprep.subr.mxu0 %v6838_v46  ;;  %8525 = vst [vmem:[#allocation44_spill] sm:$0xff] %v6862_v51  ;;  %v6868_v42 = vld [vmem:[#allocation10 + $0x40] sm:$0xff]  ;;  %v6872_v46 = vld [vmem:[#allocation12 + $0x38] sm:$0xff] }
 0x51b   :  { %2467 = vmatpush1.msra.mxu1 %v6842_v19  ;;  %2538 = vmatpush1.msra.mxu0 %v6844_v0  ;;  %8526 = vst [vmem:[#allocation45_spill] sm:$0xff] %v6868_v42  ;;  %8527 = vst [vmem:[#allocation46_spill] sm:$0xff] %v6872_v46  ;;  %v6874_v19 = vld [vmem:[#allocation10 + $0x28] sm:$0xff]  ;;  %v6878_v0 = vld [vmem:[#allocation12 + $0x30] sm:$0xff] }
 0x51c   :  { %2468 = vmatprep.subr.mxu1 %v6848_v4  ;;  %2539 = vmatprep.subr.mxu0 %v6850_v63  ;;  %8528 = vst [vmem:[#allocation47_spill] sm:$0xff] %v6878_v0  ;;  %v6880_v4 = vld [vmem:[#allocation10 + $0x20] sm:$0xff]  ;;  %v6884_v63 = vld [vmem:[#allocation12 + $0x18] sm:$0xff] }
 0x51d   :  { %2469 = vmatpush1.msra.mxu1 %v6854_v29  ;;  %2540 = vmatpush1.msra.mxu0 %v6856_v33  ;;  %8529 = vst [vmem:[#allocation48_spill] sm:$0xff] %v6880_v4  ;;  %8530 = vst [vmem:[#allocation49_spill] sm:$0xff] %v6884_v63  ;;  %v6886_v29 = vld [vmem:[#allocation10 + $0x8] sm:$0xff]  ;;  %v6890_v33 = vld [vmem:[#allocation12 + $0x10] sm:$0xff] }
 0x51e   :  { %2470 = vmatprep.subr.mxu1 %v6860_v15  ;;  %2541 = vmatprep.subr.mxu0 %v6862_v51  ;;  %8531 = vst [vmem:[#allocation50_spill] sm:$0xff] %v6886_v29  ;;  %8532 = vst [vmem:[#allocation51_spill] sm:$0xff] %v6890_v33  ;;  %v6894_v51 = vld [vmem:[#allocation10] sm:$0xff] }
 0x51f   :  { %2471 = vmatpush1.msra.mxu1 %v6866_v3  ;;  %2542 = vmatpush1.msra.mxu0 %v6868_v42  ;;  %8533 = vst [vmem:[#allocation52_spill] sm:$0xff] %v6894_v51  ;;  %v6898_v42 = vld [vmem:[#allocation4 + $0x20] sm:$0xff] }
 0x520   :  { %2472 = vmatprep.subr.mxu1 %v6872_v46  ;;  %2543 = vmatprep.subr.mxu0 %v6874_v19  ;;  %v6902_v46 = vld [vmem:[#allocation10 + $0x1f8] sm:$0xff] }
 0x521   :  { %2473 = vmatpush1.msra.mxu1 %v6878_v0  ;;  %2544 = vmatpush1.msra.mxu0 %v6880_v4  ;;  %8534 = vst [vmem:[#allocation53_spill] sm:$0xff] %v6902_v46  ;;  %v6906_v0 = vld [vmem:[#allocation10 + $0x1f0] sm:$0xff]  ;;  %v6938_v4 = vld [vmem:[#allocation10 + $0x158] sm:$0xff] }
 0x522   :  { %2474 = vmatprep.subr.mxu1 %v6884_v63  ;;  %2545 = vmatprep.subr.mxu0 %v6886_v29  ;;  %8535 = vst [vmem:[#allocation54_spill] sm:$0xff] %v6906_v0  ;;  %v6910_v63 = vld [vmem:[#allocation10 + $0x1d8] sm:$0xff]  ;;  %v6913_v29 = vld [vmem:[#allocation10 + $0x1d0] sm:$0xff]  ;;  %8544 = vst [vmem:[#allocation71_spill] sm:$0xff] %v6938_v4 }
 0x523   :  { %2475 = vmatpush1.msra.mxu1 %v6890_v33  ;;  %2508 = vmatprep.mubr.f32.mxu1 %v8282_v32  ;;  %8536 = vst [vmem:[#allocation55_spill] sm:$0xff] %v6910_v63  ;;  %8537 = vst [vmem:[#allocation57_spill] sm:$0xff] %v6913_v29  ;;  %v6917_v33 = vld [vmem:[#allocation10 + $0x1b8] sm:$0xff] }
 0x524   :  { %2546 = vmatpush1.msra.mxu0 %v6894_v51  ;;  %2579 = vmatprep.mubr.f32.mxu0 %v8282_v32  ;;  %8538 = vst [vmem:[#allocation59_spill] sm:$0xff] %v6917_v33  ;;  %v6921_v51 = vld [vmem:[#allocation10 + $0x1b0] sm:$0xff] }
 0x525   :  { %2509 = vmatmul.mubr.f32.vlgmr.msra.gmra.mxu1 %v6710_v30  ;;  %2580 = vmatmul.mubr.f32.vlgmr.msra.gmra.mxu0 %v6898_v42  ;;  %8539 = vst [vmem:[#allocation61_spill] sm:$0xff] %v6921_v51  ;;  %v6926_v30 = vld [vmem:[#allocation10 + $0x198] sm:$0xff] }
 0x526   :  { %2586 = vmatprep.subr.mxu1 %v6902_v46  ;;  %2650 = vmatprep.mubr.f32.mxu1 %v8282_v32  ;;  %8540 = vst [vmem:[#allocation63_spill] sm:$0xff] %v6926_v30  ;;  %v6929_v46 = vld [vmem:[#allocation10 + $0x190] sm:$0xff] }
 0x527   :  { %2587 = vmatpush1.msra.mxu1 %v6906_v0  ;;  %4714 = vmatprep.subr.mxu0 %v8282_v32  ;;  %8541 = vst [vmem:[#allocation65_spill] sm:$0xff] %v6929_v46  ;;  %v6932_v0 = vld [vmem:[#allocation10 + $0x178] sm:$0xff] }
 0x528   :  { %2588 = vmatprep.subr.mxu1 %v6910_v63  ;;  %4746 = vmatprep.mubr.msk.f32.mxu0 %vm5219_vm0, %v8282_v32  ;;  %8542 = vst [vmem:[#allocation67_spill] sm:$0xff] %v6932_v0  ;;  %v6935_v63 = vld [vmem:[#allocation10 + $0x170] sm:$0xff] }
 0x529   :  { %2589 = vmatpush1.msra.mxu1 %v6913_v29  ;;  %8543 = vst [vmem:[#allocation69_spill] sm:$0xff] %v6935_v63  ;;  %v6941_v29 = vld [vmem:[#allocation10 + $0x150] sm:$0xff] }
 0x52a   :  { %2590 = vmatprep.subr.mxu1 %v6917_v33  ;;  %8545 = vst [vmem:[#allocation73_spill] sm:$0xff] %v6941_v29  ;;  %v6944_v33 = vld [vmem:[#allocation10 + $0x138] sm:$0xff] }
 0x52b   :  { %2591 = vmatpush1.msra.mxu1 %v6921_v51  ;;  %8546 = vst [vmem:[#allocation75_spill] sm:$0xff] %v6944_v33  ;;  %v6947_v51 = vld [vmem:[#allocation10 + $0x130] sm:$0xff] }
 0x52c   :  { %2592 = vmatprep.subr.mxu1 %v6926_v30  ;;  %8547 = vst [vmem:[#allocation77_spill] sm:$0xff] %v6947_v51  ;;  %v6950_v30 = vld [vmem:[#allocation10 + $0x118] sm:$0xff] }
 0x52d   :  { %2593 = vmatpush1.msra.mxu1 %v6929_v46  ;;  %8548 = vst [vmem:[#allocation79_spill] sm:$0xff] %v6950_v30  ;;  %v6953_v46 = vld [vmem:[#allocation10 + $0x110] sm:$0xff] }
 0x52e   :  { %2594 = vmatprep.subr.mxu1 %v6932_v0  ;;  %8549 = vst [vmem:[#allocation81_spill] sm:$0xff] %v6953_v46  ;;  %v6956_v0 = vld [vmem:[#allocation10 + $0xf8] sm:$0xff] }
 0x52f   :  { %2595 = vmatpush1.msra.mxu1 %v6935_v63  ;;  %8550 = vst [vmem:[#allocation83_spill] sm:$0xff] %v6956_v0  ;;  %v6959_v63 = vld [vmem:[#allocation10 + $0xf0] sm:$0xff] }
 0x530   :  { %2596 = vmatprep.subr.mxu1 %v6938_v4  ;;  %8551 = vst [vmem:[#allocation85_spill] sm:$0xff] %v6959_v63  ;;  %v6962_v4 = vld [vmem:[#allocation10 + $0xd8] sm:$0xff] }
 0x531   :  { %2597 = vmatpush1.msra.mxu1 %v6941_v29  ;;  %8552 = vst [vmem:[#allocation87_spill] sm:$0xff] %v6962_v4  ;;  %v6965_v29 = vld [vmem:[#allocation10 + $0xd0] sm:$0xff] }
 0x532   :  { %2598 = vmatprep.subr.mxu1 %v6944_v33  ;;  %8553 = vst [vmem:[#allocation88_spill] sm:$0xff] %v6965_v29  ;;  %v6968_v33 = vld [vmem:[#allocation10 + $0xb8] sm:$0xff] }
 0x533   :  { %2599 = vmatpush1.msra.mxu1 %v6947_v51  ;;  %8554 = vst [vmem:[#allocation90_spill] sm:$0xff] %v6968_v33  ;;  %v6971_v51 = vld [vmem:[#allocation10 + $0xb0] sm:$0xff] }
 0x534   :  { %2600 = vmatprep.subr.mxu1 %v6950_v30  ;;  %8555 = vst [vmem:[#allocation91_spill] sm:$0xff] %v6971_v51  ;;  %v6974_v30 = vld [vmem:[#allocation10 + $0x98] sm:$0xff] }
 0x535   :  { %2601 = vmatpush1.msra.mxu1 %v6953_v46  ;;  %8556 = vst [vmem:[#allocation92_spill] sm:$0xff] %v6974_v30  ;;  %v6977_v46 = vld [vmem:[#allocation10 + $0x90] sm:$0xff] }
 0x536   :  { %2602 = vmatprep.subr.mxu1 %v6956_v0  ;;  %8557 = vst [vmem:[#allocation93_spill] sm:$0xff] %v6977_v46  ;;  %v6980_v0 = vld [vmem:[#allocation10 + $0x78] sm:$0xff] }
 0x537   :  { %2603 = vmatpush1.msra.mxu1 %v6959_v63  ;;  %v6983_v63 = vld [vmem:[#allocation10 + $0x70] sm:$0xff] }
 0x538   :  { %2604 = vmatprep.subr.mxu1 %v6962_v4  ;;  %v6986_v4 = vld [vmem:[#allocation10 + $0x58] sm:$0xff] }
 0x539   :  { %2605 = vmatpush1.msra.mxu1 %v6965_v29  ;;  %v6989_v29 = vld [vmem:[#allocation10 + $0x50] sm:$0xff] }
 0x53a   :  { %2606 = vmatprep.subr.mxu1 %v6968_v33  ;;  %v6992_v33 = vld [vmem:[#allocation10 + $0x38] sm:$0xff] }
 0x53b   :  { %2607 = vmatpush1.msra.mxu1 %v6971_v51  ;;  %v6995_v51 = vld [vmem:[#allocation10 + $0x30] sm:$0xff] }
 0x53c   :  { %2608 = vmatprep.subr.mxu1 %v6974_v30  ;;  %v6998_v30 = vld [vmem:[#allocation10 + $0x18] sm:$0xff] }
 0x53d   :  { %2609 = vmatpush1.msra.mxu1 %v6977_v46  ;;  %v7001_v46 = vld [vmem:[#allocation10 + $0x10] sm:$0xff] }
 0x53e   :  { %2610 = vmatprep.subr.mxu1 %v6980_v0 }
 0x53f   :  { %2611 = vmatpush1.msra.mxu1 %v6983_v63 }
 0x540   :  { %2612 = vmatprep.subr.mxu1 %v6986_v4 }
 0x541   :  { %2613 = vmatpush1.msra.mxu1 %v6989_v29 }
 0x542   :  { %2614 = vmatprep.subr.mxu1 %v6992_v33 }
 0x543   :  { %2615 = vmatpush1.msra.mxu1 %v6995_v51 }
 0x544   :  { %2616 = vmatprep.subr.mxu1 %v6998_v30 }
 0x545   :  { %2617 = vmatpush1.msra.mxu1 %v7001_v46 }
 0x546   :  { %2651 = vmatmul.mubr.f32.vlgmr.msra.gmra.mxu1 %v6898_v42  ;;  %2902 = vmatprep.subr.mxu1 %v6596_v48  ;;  %v7041_v48 = vld [vmem:[#allocation13 + $0x78] sm:$0xff] }
 0x547   :  { %2903 = vmatpush1.msra.mxu1 %v6599_v21  ;;  %2966 = vmatprep.mubr.f32.mxu1 %v8282_v32  ;;  %v7045_v21 = vld [vmem:[#allocation13 + $0x70] sm:$0xff] }
 0x548   :  { %2904 = vmatprep.subr.mxu1 %v6602_v26  ;;  %4715 = vmatpush3.msra.mxu0 %v7041_v48  ;;  %v7049_v26 = vld [vmem:[#allocation13 + $0x68] sm:$0xff] }
 0x549   :  { %2905 = vmatpush1.msra.mxu1 %v6605_v24  ;;  %4716 = vmatprep.subr.mxu0 %v8282_v32  ;;  %v7053_v24 = vld [vmem:[#allocation13 + $0x60] sm:$0xff] }
 0x54a   :  { %2906 = vmatprep.subr.mxu1 %v6608_v10  ;;  %4717 = vmatpush3.msra.mxu0 %v7045_v21  ;;  %v7057_v10 = vld [vmem:[#allocation13 + $0x58] sm:$0xff] }
 0x54b   :  { %2907 = vmatpush1.msra.mxu1 %v6611_v12  ;;  %4718 = vmatprep.subr.mxu0 %v8282_v32  ;;  %v7061_v12 = vld [vmem:[#allocation13 + $0x50] sm:$0xff] }
 0x54c   :  { %2908 = vmatprep.subr.mxu1 %v6614_v5  ;;  %4719 = vmatpush3.msra.mxu0 %v7049_v26  ;;  %v7065_v5 = vld [vmem:[#allocation13 + $0x48] sm:$0xff] }
 0x54d   :  { %2909 = vmatpush1.msra.mxu1 %v6617_v14  ;;  %4720 = vmatprep.subr.mxu0 %v8282_v32  ;;  %v7069_v14 = vld [vmem:[#allocation13 + $0x40] sm:$0xff] }
 0x54e   :  { %2910 = vmatprep.subr.mxu1 %v6620_v50  ;;  %4721 = vmatpush3.msra.mxu0 %v7053_v24  ;;  %v7073_v50 = vld [vmem:[#allocation13 + $0x38] sm:$0xff] }
 0x54f   :  { %2911 = vmatpush1.msra.mxu1 %v6623_v58  ;;  %4722 = vmatprep.subr.mxu0 %v8282_v32  ;;  %v7076_v58 = vld [vmem:[#allocation13 + $0x30] sm:$0xff] }
 0x550   :  { %2912 = vmatprep.subr.mxu1 %v6626_v60  ;;  %4723 = vmatpush3.msra.mxu0 %v7057_v10  ;;  %v7079_v60 = vld [vmem:[#allocation13 + $0x28] sm:$0xff] }
 0x551   :  { %2913 = vmatpush1.msra.mxu1 %v6629_v62  ;;  %4724 = vmatprep.subr.mxu0 %v8282_v32  ;;  %v7083_v62 = vld [vmem:[#allocation13 + $0x20] sm:$0xff] }
 0x552   :  { %2914 = vmatprep.subr.mxu1 %v6632_v54  ;;  %4725 = vmatpush3.msra.mxu0 %v7061_v12  ;;  %v7087_v54 = vld [vmem:[#allocation13 + $0x18] sm:$0xff] }
 0x553   :  { %2915 = vmatpush1.msra.mxu1 %v6635_v53  ;;  %4726 = vmatprep.subr.mxu0 %v8282_v32  ;;  %v7091_v53 = vld [vmem:[#allocation13 + $0x10] sm:$0xff] }
 0x554   :  { %2916 = vmatprep.subr.mxu1 %v6638_v55  ;;  %4727 = vmatpush3.msra.mxu0 %v7065_v5  ;;  %v7095_v55 = vld [vmem:[#allocation13 + $0x8] sm:$0xff] }
 0x555   :  { %2917 = vmatpush1.msra.mxu1 %v6641_v56  ;;  %4728 = vmatprep.subr.mxu0 %v8282_v32  ;;  %v7099_v56 = vld [vmem:[#allocation13] sm:$0xff] }
 0x556   :  { %2918 = vmatprep.subr.mxu1 %v6644_v39  ;;  %4729 = vmatpush3.msra.mxu0 %v7069_v14 }
 0x557   :  { %2919 = vmatpush1.msra.mxu1 %v6647_v41  ;;  %4730 = vmatprep.subr.mxu0 %v8282_v32 }
 0x558   :  { %2920 = vmatprep.subr.mxu1 %v6650_v35  ;;  %4731 = vmatpush3.msra.mxu0 %v7073_v50 }
 0x559   :  { %2921 = vmatpush1.msra.mxu1 %v6652_v47  ;;  %4732 = vmatprep.subr.mxu0 %v8282_v32 }
 0x55a   :  { %2922 = vmatprep.subr.mxu1 %v6654_v52  ;;  %4733 = vmatpush3.msra.mxu0 %v7076_v58 }
 0x55b   :  { %2923 = vmatpush1.msra.mxu1 %v6657_v37  ;;  %4734 = vmatprep.subr.mxu0 %v8282_v32 }
 0x55c   :  { %2924 = vmatprep.subr.mxu1 %v6660_v45  ;;  %4735 = vmatpush3.msra.mxu0 %v7079_v60 }
 0x55d   :  { %2925 = vmatpush1.msra.mxu1 %v6663_v43  ;;  %4736 = vmatprep.subr.mxu0 %v8282_v32 }
 0x55e   :  { %2926 = vmatprep.subr.mxu1 %v6666_v1  ;;  %4737 = vmatpush3.msra.mxu0 %v7083_v62 }
 0x55f   :  { %2927 = vmatpush1.msra.mxu1 %v6671_v16  ;;  %4738 = vmatprep.subr.mxu0 %v8282_v32 }
 0x560   :  { %2928 = vmatprep.subr.mxu1 %v6675_v9  ;;  %4739 = vmatpush3.msra.mxu0 %v7087_v54 }
 0x561   :  { %2929 = vmatpush1.msra.mxu1 %v6678_v18  ;;  %4740 = vmatprep.subr.mxu0 %v8282_v32 }
 0x562   :  { %2930 = vmatprep.subr.mxu1 %v6681_v31  ;;  %4741 = vmatpush3.msra.mxu0 %v7091_v53 }
 0x563   :  { %2931 = vmatpush1.msra.mxu1 %v6684_v11  ;;  %4742 = vmatprep.subr.mxu0 %v8282_v32 }
 0x564   :  { %2932 = vmatprep.subr.mxu1 %v6687_v20  ;;  %4743 = vmatpush3.msra.mxu0 %v7095_v55 }
 0x565   :  { %2933 = vmatpush1.msra.mxu1 %v6690_v13  ;;  %4744 = vmatprep.subr.mxu0 %v8282_v32 }
 0x566   :  { %3044 = vmatprep.subr.mxu1 %v6693_v22  ;;  %4745 = vmatpush3.msra.mxu0 %v7099_v56 }
 0x567   :  { %2973 = vmatprep.subr.mxu0 %v6668_v7 }
 0x5c4   :  { %v2234_v39 = vpop.f32.mrf.mxu1  ;;  %v2439_v45 = vpop.f32.mrf.mxu0 }
 0x5c5   :  { %v2235_v41 = vadd.f32 %v6701_v34, %v2234_v39 }
 0x5c6   :  { %v4713_v35 = vpop.f32.mrf.mxu1  ;;  %v2441_v43 = vpop.f32.mrf.mxu0 }
 0x5c7   :  { %v2238_v47 = vmul.f32 1.442695, %v2235_v41 }
 0x5c9   :  { %4939 = vpow2.f32 %v2238_v47 }
 0x5d6   :  { %v4940_v52 = vpop.eup %4939 }
 0x5d7   :  { %v2240_v37 = vsel %vm126_vm1, %v2235_v41, %v4940_v52 }
 0x5d8   :  { %2242 = vst [vmem:[#allocation15 + $0x18] sm:$0xff] %v2240_v37 }
 0x5e5   :  { %v2581_v1 = vpop.f32.mrf.mxu0  ;;  %v2510_v20 = vpop.f32.mrf.mxu1 }
 0x5e6   :  { %v2582_v18 = vadd.f32 %v2581_v1, %v2439_v45 }
 0x5e7   :  { %v2583_v16 = vpop.f32.mrf.mxu0  ;;  %v2512_v42 = vpop.f32.mrf.mxu1 }
 0x5e8   :  { %v2584_v9 = vadd.f32 %v2583_v16, %v2441_v43  ;;  %v4426_v11 = vmul.f32 -1.442695, %v2582_v18 }
 0x5ea   :  { %v4427_v31 = vmul.f32 -1.442695, %v2584_v9 }
 0x5ec   :  { %4941 = vpow2.f32 %v4427_v31 }
 0x5ed   :  { %4943 = vpow2.f32 %v4426_v11 }
 0x5f9   :  { %v4942_v7 = vpop.eup %4941 }
 0x5fa   :  { %v4944_v13 = vpop.eup %4943  ;;  %v2666_v22 = vadd.f32 1.0, %v4942_v7 }
 0x5fb   :  { %v2660_v34 = vadd.f32 1.0, %v4944_v13  ;;  %v8573_v13 = vld [vmem:[#allocation32_spill] sm:$0xff] }
 0x5fc   :  { %4945 = vrcp.f32 %v2666_v22  ;;  %v8574_v22 = vld [vmem:[#allocation72_spill] sm:$0xff] }
 0x5fd   :  { %4947 = vrcp.f32 %v2660_v34  ;;  %v8575_v34 = vld [vmem:[#allocation33_spill] sm:$0xff] }
 0x606   :  { %v2652_v39 = vpop.f32.mrf.mxu1 }
 0x607   :  { %v2653_v41 = vadd.f32 %v2652_v39, %v2510_v20  ;;  %v8577_v39 = vld [vmem:[#allocation34_spill] sm:$0xff] }
 0x608   :  { %v2654_v35 = vpop.f32.mrf.mxu1 }
 0x609   :  { %4949 = vtanh.f32 %v2653_v41  ;;  %v2655_v47 = vadd.f32 %v2654_v35, %v2512_v42  ;;  %v4946_v37 = vpop.eup %4945  ;;  %v8576_v42 = vld [vmem:[#allocation74_spill] sm:$0xff]  ;;  %v8578_v41 = vld [vmem:[#allocation76_spill] sm:$0xff]  ;;  %v8579_v35 = vld [vmem:[#allocation35_spill] sm:$0xff] }
 0x60a   :  { %v4948_v45 = vpop.eup %4947  ;;  %v2676_v1 = vmul.f32 %v4946_v37, %v6707_v17  ;;  %v8558_v17 = vld [vmem:[#allocation56_spill] sm:$0xff] }
 0x60b   :  { %v4428_v52 = vmul.f32 -1.442695, %v2655_v47  ;;  %v8580_v47 = vld [vmem:[#allocation78_spill] sm:$0xff]  ;;  %v8582_v37 = vld [vmem:[#allocation80_spill] sm:$0xff] }
 0x60d   :  { %4951 = vpow2.f32 %v4428_v52  ;;  %v8581_v52 = vld [vmem:[#allocation36_spill] sm:$0xff] }
 0x616   :  { %v4950_v43 = vpop.eup %4949 }
 0x617   :  { %v2677_v16 = vmul.f32 %v4950_v43, %v4948_v45  ;;  %v8583_v45 = vld [vmem:[#allocation37_spill] sm:$0xff]  ;;  %v8584_v43 = vld [vmem:[#allocation82_spill] sm:$0xff] }
 0x619   :  { %v7109_v9 = vadd.f32 %v2677_v16, %v2676_v1  ;;  %v8585_v1 = vld [vmem:[#allocation38_spill] sm:$0xff]  ;;  %v8586_v16 = vld [vmem:[#allocation84_spill] sm:$0xff] }
 0x61a   :  { %v4952_v18 = vpop.eup %4951 }
 0x61b   :  { %v2673_v31 = vadd.f32 1.0, %v4952_v18  ;;  %4953 = vtanh.f32 %v7109_v9  ;;  %v8587_v18 = vld [vmem:[#allocation39_spill] sm:$0xff] }
 0x61d   :  { %4955 = vrcp.f32 %v2673_v31  ;;  %v8588_v31 = vld [vmem:[#allocation86_spill] sm:$0xff] }
 0x628   :  { %v4954_v11 = vpop.eup %4953 }
 0x62a   :  { %v4956_v7 = vpop.eup %4955 }
 0x62b   :  { %v7112_v20 = vmul.f32 %v4956_v7, %v4954_v11  ;;  %v8589_v11 = vld [vmem:[#allocation40_spill] sm:$0xff]  ;;  %v8590_v7 = vld [vmem:[#allocation41_spill] sm:$0xff] }
 0x62d   :  { %4747 = vmatmul.mubr.f32.vlgmr.msra.gmra.mxu0 %v7112_v20  ;;  %2967 = vmatmul.mubr.f32.vlgmr.msra.gmra.mxu1 %v7112_v20 }
 0x62e   :  { %2974 = vmatpush1.msra.mxu0 %v6712_v38  ;;  %3045 = vmatpush1.msra.mxu1 %v6714_v28  ;;  %v8559_v38 = vld [vmem:[#allocation25_spill] sm:$0xff]  ;;  %v8560_v28 = vld [vmem:[#allocation58_spill] sm:$0xff] }
 0x62f   :  { %2975 = vmatprep.subr.mxu0 %v6716_v36  ;;  %3046 = vmatprep.subr.mxu1 %v6718_v6  ;;  %v8561_v36 = vld [vmem:[#allocation26_spill] sm:$0xff]  ;;  %v8562_v6 = vld [vmem:[#allocation60_spill] sm:$0xff] }
 0x630   :  { %2976 = vmatpush1.msra.mxu0 %v6722_v49  ;;  %3047 = vmatpush1.msra.mxu1 %v6724_v40  ;;  %v8563_v49 = vld [vmem:[#allocation27_spill] sm:$0xff]  ;;  %v8564_v40 = vld [vmem:[#allocation62_spill] sm:$0xff] }
 0x631   :  { %2977 = vmatprep.subr.mxu0 %v6728_v57  ;;  %3048 = vmatprep.subr.mxu1 %v6730_v44  ;;  %v8565_v57 = vld [vmem:[#allocation28_spill] sm:$0xff] }
 0x632   :  { %2978 = vmatpush1.msra.mxu0 %v6734_v59  ;;  %3049 = vmatpush1.msra.mxu1 %v6736_v23  ;;  %v8566_v44 = vld [vmem:[#allocation64_spill] sm:$0xff]  ;;  %v8567_v59 = vld [vmem:[#allocation29_spill] sm:$0xff]  ;;  %v8568_v23 = vld [vmem:[#allocation66_spill] sm:$0xff] }
 0x633   :  { %2979 = vmatprep.subr.mxu0 %v6740_v61  ;;  %3050 = vmatprep.subr.mxu1 %v6742_v25  ;;  %v8569_v61 = vld [vmem:[#allocation30_spill] sm:$0xff]  ;;  %v8570_v25 = vld [vmem:[#allocation68_spill] sm:$0xff] }
 0x634   :  { %2980 = vmatpush1.msra.mxu0 %v6746_v2  ;;  %3051 = vmatpush1.msra.mxu1 %v6748_v27  ;;  %v8571_v2 = vld [vmem:[#allocation31_spill] sm:$0xff]  ;;  %v8572_v27 = vld [vmem:[#allocation70_spill] sm:$0xff] }
 0x635   :  { %2981 = vmatprep.subr.mxu0 %v8558_v17  ;;  %3052 = vmatprep.subr.mxu1 %v8559_v38  ;;  %v8591_v17 = vld [vmem:[#allocation89_spill] sm:$0xff]  ;;  %v8592_v38 = vld [vmem:[#allocation42_spill] sm:$0xff] }
 0x636   :  { %2982 = vmatpush1.msra.mxu0 %v8560_v28  ;;  %3053 = vmatpush1.msra.mxu1 %v8561_v36  ;;  %v8593_v28 = vld [vmem:[#allocation43_spill] sm:$0xff]  ;;  %v8594_v36 = vld [vmem:[#allocation44_spill] sm:$0xff] }
 0x637   :  { %2983 = vmatprep.subr.mxu0 %v8562_v6  ;;  %3054 = vmatprep.subr.mxu1 %v8563_v49  ;;  %v8595_v6 = vld [vmem:[#allocation45_spill] sm:$0xff]  ;;  %v8596_v49 = vld [vmem:[#allocation46_spill] sm:$0xff] }
 0x638   :  { %2984 = vmatpush1.msra.mxu0 %v8564_v40  ;;  %3055 = vmatpush1.msra.mxu1 %v8565_v57  ;;  %v8597_v40 = vld [vmem:[#allocation47_spill] sm:$0xff]  ;;  %v8598_v57 = vld [vmem:[#allocation48_spill] sm:$0xff] }
 0x639   :  { %2985 = vmatprep.subr.mxu0 %v8566_v44  ;;  %3056 = vmatprep.subr.mxu1 %v8567_v59  ;;  %v8599_v44 = vld [vmem:[#allocation49_spill] sm:$0xff]  ;;  %v8600_v59 = vld [vmem:[#allocation50_spill] sm:$0xff] }
 0x63a   :  { %2986 = vmatpush1.msra.mxu0 %v8568_v23  ;;  %3057 = vmatpush1.msra.mxu1 %v8569_v61  ;;  %v7176_v23 = vld [vmem:[#allocation4 + $0x28] sm:$0xff] }
 0x63b   :  { %2987 = vmatprep.subr.mxu0 %v8570_v25  ;;  %3058 = vmatprep.subr.mxu1 %v8571_v2  ;;  %v8604_v61 = vld [vmem:[#allocation54_spill] sm:$0xff]  ;;  %v8605_v25 = vld [vmem:[#allocation55_spill] sm:$0xff]  ;;  %v8606_v2 = vld [vmem:[#allocation57_spill] sm:$0xff] }
 0x63c   :  { %2988 = vmatpush1.msra.mxu0 %v8572_v27  ;;  %3059 = vmatpush1.msra.mxu1 %v8573_v13  ;;  %v8607_v27 = vld [vmem:[#allocation59_spill] sm:$0xff] }
 0x63d   :  { %2989 = vmatprep.subr.mxu0 %v8574_v22  ;;  %3060 = vmatprep.subr.mxu1 %v8575_v34  ;;  %v8609_v13 = vld [vmem:[#allocation63_spill] sm:$0xff]  ;;  %v8610_v22 = vld [vmem:[#allocation65_spill] sm:$0xff] }
 0x63e   :  { %2990 = vmatpush1.msra.mxu0 %v8576_v42  ;;  %3061 = vmatpush1.msra.mxu1 %v8577_v39  ;;  %v8612_v34 = vld [vmem:[#allocation69_spill] sm:$0xff] }
 0x63f   :  { %2991 = vmatprep.subr.mxu0 %v8578_v41  ;;  %3062 = vmatprep.subr.mxu1 %v8579_v35  ;;  %v8614_v42 = vld [vmem:[#allocation73_spill] sm:$0xff] }
 0x640   :  { %2992 = vmatpush1.msra.mxu0 %v8580_v47  ;;  %3063 = vmatpush1.msra.mxu1 %v8581_v52  ;;  %v8616_v39 = vld [vmem:[#allocation77_spill] sm:$0xff]  ;;  %v8622_v47 = vld [vmem:[#allocation88_spill] sm:$0xff]  ;;  %v8624_v52 = vld [vmem:[#allocation91_spill] sm:$0xff] }
 0x641   :  { %2993 = vmatprep.subr.mxu0 %v8582_v37  ;;  %3064 = vmatprep.subr.mxu1 %v8583_v45  ;;  %v8618_v41 = vld [vmem:[#allocation81_spill] sm:$0xff]  ;;  %v7301_v45 = vld [vmem:[#allocation12 + $0xe8] sm:$0xff] }
 0x642   :  { %2994 = vmatpush1.msra.mxu0 %v8584_v43  ;;  %3065 = vmatpush1.msra.mxu1 %v8585_v1  ;;  %v8620_v35 = vld [vmem:[#allocation85_spill] sm:$0xff]  ;;  %v7304_v43 = vld [vmem:[#allocation12 + $0xe0] sm:$0xff]  ;;  %v7307_v1 = vld [vmem:[#allocation12 + $0xc8] sm:$0xff] }
 0x643   :  { %2995 = vmatprep.subr.mxu0 %v8586_v16  ;;  %3066 = vmatprep.subr.mxu1 %v8587_v18  ;;  %v8626_v37 = vld [vmem:[#allocation93_spill] sm:$0xff]  ;;  %v7309_v16 = vld [vmem:[#allocation12 + $0xc0] sm:$0xff]  ;;  %v7311_v18 = vld [vmem:[#allocation12 + $0xa8] sm:$0xff] }
 0x644   :  { %2996 = vmatpush1.msra.mxu0 %v8588_v31  ;;  %3067 = vmatpush1.msra.mxu1 %v8589_v11  ;;  %v7314_v31 = vld [vmem:[#allocation12 + $0xa0] sm:$0xff]  ;;  %v7317_v11 = vld [vmem:[#allocation12 + $0x88] sm:$0xff] }
 0x645   :  { %2997 = vmatprep.subr.mxu0 %v8590_v7  ;;  %3068 = vmatprep.subr.mxu1 %v8591_v17  ;;  %v7320_v7 = vld [vmem:[#allocation12 + $0x80] sm:$0xff]  ;;  %v7323_v17 = vld [vmem:[#allocation12 + $0x68] sm:$0xff] }
 0x646   :  { %2998 = vmatpush1.msra.mxu0 %v8592_v38  ;;  %3069 = vmatpush1.msra.mxu1 %v8593_v28  ;;  %v7325_v38 = vld [vmem:[#allocation12 + $0x1f8] sm:$0xff]  ;;  %v7328_v28 = vld [vmem:[#allocation12 + $0x60] sm:$0xff] }
 0x647   :  { %2999 = vmatprep.subr.mxu0 %v6860_v15  ;;  %3070 = vmatprep.subr.mxu1 %v8594_v36  ;;  %v8601_v15 = vld [vmem:[#allocation51_spill] sm:$0xff]  ;;  %v7332_v36 = vld [vmem:[#allocation12 + $0x48] sm:$0xff] }
 0x648   :  { %3000 = vmatpush1.msra.mxu0 %v6866_v3  ;;  %3071 = vmatpush1.msra.mxu1 %v8595_v6  ;;  %v8602_v3 = vld [vmem:[#allocation52_spill] sm:$0xff]  ;;  %v7335_v6 = vld [vmem:[#allocation12 + $0x40] sm:$0xff] }
 0x649   :  { %3001 = vmatprep.subr.mxu0 %v8596_v49  ;;  %3072 = vmatprep.subr.mxu1 %v6874_v19  ;;  %v8603_v19 = vld [vmem:[#allocation53_spill] sm:$0xff]  ;;  %v7338_v49 = vld [vmem:[#allocation12 + $0x28] sm:$0xff] }
 0x64a   :  { %3002 = vmatpush1.msra.mxu0 %v8597_v40  ;;  %3073 = vmatpush1.msra.mxu1 %v8598_v57  ;;  %v7341_v40 = vld [vmem:[#allocation12 + $0x20] sm:$0xff]  ;;  %v7344_v57 = vld [vmem:[#allocation12 + $0x8] sm:$0xff] }
 0x64b   :  { %3003 = vmatprep.subr.mxu0 %v8599_v44  ;;  %3074 = vmatprep.subr.mxu1 %v8600_v59  ;;  %v7347_v44 = vld [vmem:[#allocation12] sm:$0xff]  ;;  %v7350_v59 = vld [vmem:[#allocation10 + $0x1e8] sm:$0xff] }
 0x64c   :  { %3004 = vmatpush1.msra.mxu0 %v8601_v15  ;;  %3037 = vmatprep.mubr.f32.mxu0 %v8282_v32  ;;  %v7358_v15 = vld [vmem:[%s7936_s6] ss:$0 sm:$0xff] }
 0x64d   :  { %3075 = vmatpush1.msra.mxu1 %v8602_v3  ;;  %3108 = vmatprep.mubr.f32.mxu1 %v8282_v32 }
 0x64e   :  { %3038 = vmatmul.mubr.f32.vlgmr.msra.gmra.mxu0 %v7112_v20  ;;  %3109 = vmatmul.mubr.f32.vlgmr.msra.gmra.mxu1 %v7176_v23  ;;  %v8608_v20 = vld [vmem:[#allocation61_spill] sm:$0xff] }
 0x64f   :  { %3115 = vmatprep.subr.mxu0 %v8603_v19  ;;  %3179 = vmatprep.mubr.f32.mxu0 %v8282_v32 }
 0x650   :  { %3116 = vmatpush1.msra.mxu0 %v8604_v61  ;;  %4749 = vmatprep.subr.mxu1 %v8282_v32 }
 0x651   :  { %3117 = vmatprep.subr.mxu0 %v8605_v25  ;;  %4750 = vmatpush3.msra.mxu1 %v7041_v48  ;;  %v8611_v48 = vld [vmem:[#allocation67_spill] sm:$0xff] }
 0x652   :  { %3118 = vmatpush1.msra.mxu0 %v8606_v2  ;;  %4751 = vmatprep.subr.mxu1 %v8282_v32 }
 0x653   :  { %3119 = vmatprep.subr.mxu0 %v8607_v27  ;;  %4752 = vmatpush3.msra.mxu1 %v7045_v21  ;;  %v8613_v21 = vld [vmem:[#allocation71_spill] sm:$0xff] }
 0x654   :  { %3120 = vmatpush1.msra.mxu0 %v8608_v20  ;;  %4753 = vmatprep.subr.mxu1 %v8282_v32 }
 0x655   :  { %3121 = vmatprep.subr.mxu0 %v8609_v13  ;;  %4754 = vmatpush3.msra.mxu1 %v7049_v26  ;;  %v8615_v26 = vld [vmem:[#allocation75_spill] sm:$0xff] }
 0x656   :  { %3122 = vmatpush1.msra.mxu0 %v8610_v22  ;;  %4755 = vmatprep.subr.mxu1 %v8282_v32 }
 0x657   :  { %3123 = vmatprep.subr.mxu0 %v8611_v48  ;;  %4756 = vmatpush3.msra.mxu1 %v7053_v24  ;;  %v8617_v24 = vld [vmem:[#allocation79_spill] sm:$0xff] }
 0x658   :  { %3124 = vmatpush1.msra.mxu0 %v8612_v34  ;;  %4757 = vmatprep.subr.mxu1 %v8282_v32 }
 0x659   :  { %3125 = vmatprep.subr.mxu0 %v8613_v21  ;;  %4758 = vmatpush3.msra.mxu1 %v7057_v10  ;;  %v8619_v10 = vld [vmem:[#allocation83_spill] sm:$0xff] }
 0x65a   :  { %3126 = vmatpush1.msra.mxu0 %v8614_v42  ;;  %4759 = vmatprep.subr.mxu1 %v8282_v32 }
 0x65b   :  { %3127 = vmatprep.subr.mxu0 %v8615_v26  ;;  %4760 = vmatpush3.msra.mxu1 %v7061_v12  ;;  %v8621_v12 = vld [vmem:[#allocation87_spill] sm:$0xff] }
 0x65c   :  { %3128 = vmatpush1.msra.mxu0 %v8616_v39  ;;  %4761 = vmatprep.subr.mxu1 %v8282_v32 }
 0x65d   :  { %3129 = vmatprep.subr.mxu0 %v8617_v24  ;;  %4762 = vmatpush3.msra.mxu1 %v7065_v5  ;;  %v8623_v5 = vld [vmem:[#allocation90_spill] sm:$0xff] }
 0x65e   :  { %3130 = vmatpush1.msra.mxu0 %v8618_v41  ;;  %4763 = vmatprep.subr.mxu1 %v8282_v32 }
 0x65f   :  { %3131 = vmatprep.subr.mxu0 %v8619_v10  ;;  %4764 = vmatpush3.msra.mxu1 %v7069_v14  ;;  %v8625_v14 = vld [vmem:[#allocation92_spill] sm:$0xff] }
 0x660   :  { %3132 = vmatpush1.msra.mxu0 %v8620_v35  ;;  %4765 = vmatprep.subr.mxu1 %v8282_v32 }
 0x661   :  { %3133 = vmatprep.subr.mxu0 %v8621_v12  ;;  %4766 = vmatpush3.msra.mxu1 %v7073_v50  ;;  %v7277_v50 = vld [vmem:[#allocation12 + $0x168] sm:$0xff] }
 0x662   :  { %3134 = vmatpush1.msra.mxu0 %v8622_v47  ;;  %4767 = vmatprep.subr.mxu1 %v8282_v32 }
 0x663   :  { %3135 = vmatprep.subr.mxu0 %v8623_v5  ;;  %4768 = vmatpush3.msra.mxu1 %v7076_v58  ;;  %v7280_v58 = vld [vmem:[#allocation12 + $0x160] sm:$0xff] }
 0x664   :  { %3136 = vmatpush1.msra.mxu0 %v8624_v52  ;;  %4769 = vmatprep.subr.mxu1 %v8282_v32 }
 0x665   :  { %3137 = vmatprep.subr.mxu0 %v8625_v14  ;;  %4770 = vmatpush3.msra.mxu1 %v7079_v60  ;;  %v7283_v60 = vld [vmem:[#allocation12 + $0x148] sm:$0xff] }
 0x666   :  { %3138 = vmatpush1.msra.mxu0 %v8626_v37  ;;  %4771 = vmatprep.subr.mxu1 %v8282_v32 }
 0x667   :  { %3139 = vmatprep.subr.mxu0 %v6980_v0  ;;  %4772 = vmatpush3.msra.mxu1 %v7083_v62  ;;  %v7268_v0 = vld [vmem:[#allocation12 + $0x1a0] sm:$0xff] }
 0x668   :  { %3140 = vmatpush1.msra.mxu0 %v6983_v63  ;;  %4773 = vmatprep.subr.mxu1 %v8282_v32  ;;  %v7253_v63 = vld [vmem:[#allocation12 + $0x1e8] sm:$0xff]  ;;  %v7286_v62 = vld [vmem:[#allocation12 + $0x140] sm:$0xff] }
 0x669   :  { %3141 = vmatprep.subr.mxu0 %v6986_v4  ;;  %4774 = vmatpush3.msra.mxu1 %v7087_v54  ;;  %v7271_v4 = vld [vmem:[#allocation12 + $0x188] sm:$0xff] }
 0x66a   :  { %3142 = vmatpush1.msra.mxu0 %v6989_v29  ;;  %4775 = vmatprep.subr.mxu1 %v8282_v32  ;;  %v7256_v29 = vld [vmem:[#allocation12 + $0x1e0] sm:$0xff]  ;;  %v7289_v54 = vld [vmem:[#allocation12 + $0x128] sm:$0xff] }
 0x66b   :  { %3143 = vmatprep.subr.mxu0 %v6992_v33  ;;  %4776 = vmatpush3.msra.mxu1 %v7091_v53  ;;  %v7259_v33 = vld [vmem:[#allocation12 + $0x1c8] sm:$0xff]  ;;  %v7292_v53 = vld [vmem:[#allocation12 + $0x120] sm:$0xff] }
 0x66c   :  { %3144 = vmatpush1.msra.mxu0 %v6995_v51  ;;  %4777 = vmatprep.subr.mxu1 %v8282_v32  ;;  %v7262_v51 = vld [vmem:[#allocation12 + $0x1c0] sm:$0xff] }
 0x66d   :  { %3145 = vmatprep.subr.mxu0 %v6998_v30  ;;  %4778 = vmatpush3.msra.mxu1 %v7095_v55  ;;  %v7274_v30 = vld [vmem:[#allocation12 + $0x180] sm:$0xff]  ;;  %v7295_v55 = vld [vmem:[#allocation12 + $0x108] sm:$0xff] }
 0x66e   :  { %3146 = vmatpush1.msra.mxu0 %v7001_v46  ;;  %4779 = vmatprep.subr.mxu1 %v8282_v32  ;;  %v7265_v46 = vld [vmem:[#allocation12 + $0x1a8] sm:$0xff] }
 0x66f   :  { %3180 = vmatmul.mubr.f32.vlgmr.msra.gmra.mxu0 %v7176_v23  ;;  %4780 = vmatpush3.msra.mxu1 %v7099_v56  ;;  %v7298_v56 = vld [vmem:[#allocation12 + $0x100] sm:$0xff] }
 0x670   :  { %4781 = vmatprep.mubr.msk.f32.mxu1 %vm5219_vm0, %v8282_v32  ;;  %3495 = vmatprep.mubr.f32.mxu0 %v8282_v32 }
 0x671   :  { %3431 = vmatprep.subr.mxu0 %v7253_v63  ;;  %3502 = vmatprep.subr.mxu1 %v7325_v38 }
 0x672   :  { %3432 = vmatpush1.msra.mxu0 %v7256_v29 }
 0x673   :  { %3433 = vmatprep.subr.mxu0 %v7259_v33 }
 0x674   :  { %3434 = vmatpush1.msra.mxu0 %v7262_v51 }
 0x675   :  { %3435 = vmatprep.subr.mxu0 %v7265_v46 }
 0x676   :  { %3436 = vmatpush1.msra.mxu0 %v7268_v0 }
 0x677   :  { %3437 = vmatprep.subr.mxu0 %v7271_v4 }
 0x678   :  { %3438 = vmatpush1.msra.mxu0 %v7274_v30 }
 0x679   :  { %3439 = vmatprep.subr.mxu0 %v7277_v50 }
 0x67a   :  { %3440 = vmatpush1.msra.mxu0 %v7280_v58 }
 0x67b   :  { %3441 = vmatprep.subr.mxu0 %v7283_v60 }
 0x67c   :  { %3442 = vmatpush1.msra.mxu0 %v7286_v62 }
 0x67d   :  { %3443 = vmatprep.subr.mxu0 %v7289_v54 }
 0x67e   :  { %3444 = vmatpush1.msra.mxu0 %v7292_v53 }
 0x67f   :  { %3445 = vmatprep.subr.mxu0 %v7295_v55 }
 0x680   :  { %3446 = vmatpush1.msra.mxu0 %v7298_v56 }
 0x681   :  { %3447 = vmatprep.subr.mxu0 %v7301_v45 }
 0x682   :  { %3448 = vmatpush1.msra.mxu0 %v7304_v43 }
 0x683   :  { %3449 = vmatprep.subr.mxu0 %v7307_v1 }
 0x684   :  { %3450 = vmatpush1.msra.mxu0 %v7309_v16 }
 0x685   :  { %3451 = vmatprep.subr.mxu0 %v7311_v18 }
 0x686   :  { %3452 = vmatpush1.msra.mxu0 %v7314_v31 }
 0x687   :  { %3453 = vmatprep.subr.mxu0 %v7317_v11 }
 0x688   :  { %3454 = vmatpush1.msra.mxu0 %v7320_v7 }
 0x689   :  { %3455 = vmatprep.subr.mxu0 %v7323_v17 }
 0x68a   :  { %3456 = vmatpush1.msra.mxu0 %v7328_v28 }
 0x68b   :  { %3457 = vmatprep.subr.mxu0 %v7332_v36 }
 0x68c   :  { %3458 = vmatpush1.msra.mxu0 %v7335_v6 }
 0x68d   :  { %3459 = vmatprep.subr.mxu0 %v7338_v49 }
 0x68e   :  { %3460 = vmatpush1.msra.mxu0 %v7341_v40 }
 0x68f   :  { %3461 = vmatprep.subr.mxu0 %v7344_v57 }
 0x690   :  { %3462 = vmatpush1.msra.mxu0 %v7347_v44 }
 0x691   :  { %3573 = vmatprep.subr.mxu0 %v7350_v59 }
 0x6ed   :  { %v2763_v23 = vpop.f32.mrf.mxu0  ;;  %v2968_v27 = vpop.f32.mrf.mxu1 }
 0x6ee   :  { %v2764_v3 = vadd.f32 %v7358_v15, %v2763_v23 }
 0x6ef   :  { %v4748_v19 = vpop.f32.mrf.mxu0  ;;  %v2970_v20 = vpop.f32.mrf.mxu1 }
 0x6f0   :  { %v2767_v61 = vmul.f32 1.442695, %v2764_v3 }
 0x6f2   :  { %4957 = vpow2.f32 %v2767_v61 }
 0x6ff   :  { %v4958_v25 = vpop.eup %4957 }
 0x700   :  { %v2769_v2 = vsel %vm126_vm1, %v2764_v3, %v4958_v25 }
 0x701   :  { %2771 = vst [vmem:[#allocation15 + $0x20] sm:$0xff] %v2769_v2 }
 0x70e   :  { %v3110_v13 = vpop.f32.mrf.mxu1  ;;  %v3039_v39 = vpop.f32.mrf.mxu0 }
 0x70f   :  { %v3111_v34 = vadd.f32 %v3110_v13, %v2968_v27 }
 0x710   :  { %v3112_v22 = vpop.f32.mrf.mxu1  ;;  %v3041_v35 = vpop.f32.mrf.mxu0 }
 0x711   :  { %v3113_v48 = vadd.f32 %v3112_v22, %v2970_v20  ;;  %v4429_v42 = vmul.f32 -1.442695, %v3111_v34  ;;  %v7371_v34 = vld [vmem:[#allocation10 + $0x1e0] sm:$0xff] }
 0x713   :  { %v4430_v21 = vmul.f32 -1.442695, %v3113_v48  ;;  %v7369_v48 = vld [vmem:[#allocation12 + $0x1f0] sm:$0xff] }
 0x715   :  { %4959 = vpow2.f32 %v4430_v21  ;;  %v7373_v21 = vld [vmem:[#allocation12 + $0x1d8] sm:$0xff] }
 0x716   :  { %4961 = vpow2.f32 %v4429_v42  ;;  %v7375_v42 = vld [vmem:[#allocation10 + $0x1c8] sm:$0xff] }
 0x722   :  { %v4960_v26 = vpop.eup %4959 }
 0x723   :  { %v4962_v24 = vpop.eup %4961  ;;  %v3195_v41 = vadd.f32 1.0, %v4960_v26  ;;  %v7381_v26 = vld [vmem:[#allocation10 + $0x1c0] sm:$0xff] }
 0x724   :  { %v3189_v10 = vadd.f32 1.0, %v4962_v24  ;;  %v7387_v24 = vld [vmem:[#allocation10 + $0x1a8] sm:$0xff] }
 0x725   :  { %4963 = vrcp.f32 %v3195_v41  ;;  %v7391_v41 = vld [vmem:[#allocation12 + $0x1b0] sm:$0xff] }
 0x726   :  { %4965 = vrcp.f32 %v3189_v10  ;;  %v7393_v10 = vld [vmem:[#allocation10 + $0x1a0] sm:$0xff] }
 0x72f   :  { %v3181_v12 = vpop.f32.mrf.mxu0 }
 0x730   :  { %v3182_v47 = vadd.f32 %v3181_v12, %v3039_v39  ;;  %v7385_v39 = vld [vmem:[#allocation12 + $0x1b8] sm:$0xff]  ;;  %v7399_v12 = vld [vmem:[#allocation10 + $0x188] sm:$0xff] }
 0x731   :  { %v3183_v5 = vpop.f32.mrf.mxu0 }
 0x732   :  { %4967 = vtanh.f32 %v3182_v47  ;;  %v3184_v52 = vadd.f32 %v3183_v5, %v3041_v35  ;;  %v4964_v37 = vpop.eup %4963  ;;  %v7397_v35 = vld [vmem:[#allocation12 + $0x198] sm:$0xff]  ;;  %v7403_v47 = vld [vmem:[#allocation12 + $0x190] sm:$0xff]  ;;  %v7405_v5 = vld [vmem:[#allocation10 + $0x180] sm:$0xff] }
 0x733   :  { %v4966_v23 = vpop.eup %4965  ;;  %v3205_v19 = vmul.f32 %v4964_v37, %v7109_v9  ;;  %v7379_v9 = vld [vmem:[#allocation12 + $0x1d0] sm:$0xff] }
 0x734   :  { %v4431_v14 = vmul.f32 -1.442695, %v3184_v52  ;;  %v7409_v52 = vld [vmem:[#allocation12 + $0x178] sm:$0xff]  ;;  %v7415_v37 = vld [vmem:[#allocation12 + $0x170] sm:$0xff] }
 0x735   :  { %8627 = vst [vmem:[#allocation56_spill] sm:$0xff] %v7409_v52  ;;  %8629 = vst [vmem:[#allocation58_spill] sm:$0xff] %v7415_v37 }
 0x736   :  { %4969 = vpow2.f32 %v4431_v14  ;;  %v7411_v14 = vld [vmem:[#allocation10 + $0x168] sm:$0xff] }
 0x737   :  { %8628 = vst [vmem:[#allocation25_spill] sm:$0xff] %v7411_v14 }
 0x73f   :  { %v4968_v3 = vpop.eup %4967 }
 0x740   :  { %v3206_v61 = vmul.f32 %v4968_v3, %v4966_v23  ;;  %v7417_v23 = vld [vmem:[#allocation10 + $0x160] sm:$0xff]  ;;  %v7421_v3 = vld [vmem:[#allocation12 + $0x158] sm:$0xff] }
 0x741   :  { %8630 = vst [vmem:[#allocation26_spill] sm:$0xff] %v7417_v23  ;;  %8631 = vst [vmem:[#allocation60_spill] sm:$0xff] %v7421_v3 }
 0x742   :  { %v7364_v25 = vadd.f32 %v3206_v61, %v3205_v19  ;;  %v7423_v19 = vld [vmem:[#allocation10 + $0x148] sm:$0xff]  ;;  %v7427_v61 = vld [vmem:[#allocation12 + $0x150] sm:$0xff] }
 0x743   :  { %v4970_v2 = vpop.eup %4969  ;;  %8632 = vst [vmem:[#allocation27_spill] sm:$0xff] %v7423_v19  ;;  %8633 = vst [vmem:[#allocation62_spill] sm:$0xff] %v7427_v61 }
 0x744   :  { %v3202_v27 = vadd.f32 1.0, %v4970_v2  ;;  %4971 = vtanh.f32 %v7364_v25  ;;  %v7429_v2 = vld [vmem:[#allocation10 + $0x140] sm:$0xff] }
 0x745   :  { %8634 = vst [vmem:[#allocation28_spill] sm:$0xff] %v7429_v2 }
 0x746   :  { %4973 = vrcp.f32 %v3202_v27  ;;  %v7433_v27 = vld [vmem:[#allocation12 + $0x138] sm:$0xff] }
 0x747   :  { %8635 = vst [vmem:[#allocation64_spill] sm:$0xff] %v7433_v27 }
 0x751   :  { %v4972_v20 = vpop.eup %4971 }
 0x753   :  { %v4974_v13 = vpop.eup %4973 }
 0x754   :  { %v7367_v22 = vmul.f32 %v4974_v13, %v4972_v20  ;;  %v7435_v20 = vld [vmem:[#allocation10 + $0x128] sm:$0xff]  ;;  %v7439_v13 = vld [vmem:[#allocation12 + $0x130] sm:$0xff] }
 0x755   :  { %8636 = vst [vmem:[#allocation29_spill] sm:$0xff] %v7435_v20  ;;  %8637 = vst [vmem:[#allocation66_spill] sm:$0xff] %v7439_v13 }
 0x756   :  { %4782 = vmatmul.mubr.f32.vlgmr.msra.gmra.mxu1 %v7367_v22  ;;  %3496 = vmatmul.mubr.f32.vlgmr.msra.gmra.mxu0 %v7367_v22 }
 0x757   :  { %3503 = vmatpush1.msra.mxu1 %v7369_v48  ;;  %3574 = vmatpush1.msra.mxu0 %v7371_v34 }
 0x758   :  { %3504 = vmatprep.subr.mxu1 %v7373_v21  ;;  %3575 = vmatprep.subr.mxu0 %v7375_v42 }
 0x759   :  { %3505 = vmatpush1.msra.mxu1 %v7379_v9  ;;  %3576 = vmatpush1.msra.mxu0 %v7381_v26 }
 0x75a   :  { %3506 = vmatprep.subr.mxu1 %v7385_v39  ;;  %3577 = vmatprep.subr.mxu0 %v7387_v24 }
 0x75b   :  { %3507 = vmatpush1.msra.mxu1 %v7391_v41  ;;  %3578 = vmatpush1.msra.mxu0 %v7393_v10 }
 0x75c   :  { %3508 = vmatprep.subr.mxu1 %v7397_v35  ;;  %3579 = vmatprep.subr.mxu0 %v7399_v12 }
 0x75d   :  { %3509 = vmatpush1.msra.mxu1 %v7403_v47  ;;  %3580 = vmatpush1.msra.mxu0 %v7405_v5 }
 0x75e   :  { %3510 = vmatprep.subr.mxu1 %v7409_v52  ;;  %3581 = vmatprep.subr.mxu0 %v7411_v14  ;;  %v7441_v52 = vld [vmem:[#allocation10 + $0x120] sm:$0xff]  ;;  %v7445_v14 = vld [vmem:[#allocation12 + $0x118] sm:$0xff] }
 0x75f   :  { %3511 = vmatpush1.msra.mxu1 %v7415_v37  ;;  %3582 = vmatpush1.msra.mxu0 %v7417_v23  ;;  %8638 = vst [vmem:[#allocation30_spill] sm:$0xff] %v7441_v52  ;;  %8639 = vst [vmem:[#allocation68_spill] sm:$0xff] %v7445_v14  ;;  %v7447_v37 = vld [vmem:[#allocation10 + $0x108] sm:$0xff]  ;;  %v7451_v23 = vld [vmem:[#allocation12 + $0x110] sm:$0xff] }
 0x760   :  { %3512 = vmatprep.subr.mxu1 %v7421_v3  ;;  %3583 = vmatprep.subr.mxu0 %v7423_v19  ;;  %8640 = vst [vmem:[#allocation31_spill] sm:$0xff] %v7447_v37  ;;  %8641 = vst [vmem:[#allocation70_spill] sm:$0xff] %v7451_v23  ;;  %v7453_v3 = vld [vmem:[#allocation10 + $0x100] sm:$0xff]  ;;  %v7457_v19 = vld [vmem:[#allocation12 + $0xf8] sm:$0xff] }
 0x761   :  { %3513 = vmatpush1.msra.mxu1 %v7427_v61  ;;  %3584 = vmatpush1.msra.mxu0 %v7429_v2  ;;  %8642 = vst [vmem:[#allocation32_spill] sm:$0xff] %v7453_v3  ;;  %8643 = vst [vmem:[#allocation72_spill] sm:$0xff] %v7457_v19  ;;  %v7459_v61 = vld [vmem:[#allocation10 + $0xe8] sm:$0xff]  ;;  %v7463_v2 = vld [vmem:[#allocation12 + $0xf0] sm:$0xff] }
 0x762   :  { %3514 = vmatprep.subr.mxu1 %v7433_v27  ;;  %3585 = vmatprep.subr.mxu0 %v7435_v20  ;;  %8644 = vst [vmem:[#allocation33_spill] sm:$0xff] %v7459_v61  ;;  %8645 = vst [vmem:[#allocation74_spill] sm:$0xff] %v7463_v2  ;;  %v7465_v27 = vld [vmem:[#allocation10 + $0xe0] sm:$0xff]  ;;  %v7469_v20 = vld [vmem:[#allocation12 + $0xd8] sm:$0xff] }
 0x763   :  { %3515 = vmatpush1.msra.mxu1 %v7439_v13  ;;  %3586 = vmatpush1.msra.mxu0 %v7441_v52  ;;  %8646 = vst [vmem:[#allocation34_spill] sm:$0xff] %v7465_v27  ;;  %8647 = vst [vmem:[#allocation76_spill] sm:$0xff] %v7469_v20  ;;  %v7471_v13 = vld [vmem:[#allocation10 + $0xc8] sm:$0xff]  ;;  %v7475_v52 = vld [vmem:[#allocation12 + $0xd0] sm:$0xff] }
 0x764   :  { %3516 = vmatprep.subr.mxu1 %v7445_v14  ;;  %3587 = vmatprep.subr.mxu0 %v7447_v37  ;;  %8648 = vst [vmem:[#allocation35_spill] sm:$0xff] %v7471_v13  ;;  %8649 = vst [vmem:[#allocation78_spill] sm:$0xff] %v7475_v52  ;;  %v7477_v14 = vld [vmem:[#allocation10 + $0xc0] sm:$0xff]  ;;  %v7481_v37 = vld [vmem:[#allocation12 + $0xb8] sm:$0xff] }
 0x765   :  { %3517 = vmatpush1.msra.mxu1 %v7451_v23  ;;  %3588 = vmatpush1.msra.mxu0 %v7453_v3  ;;  %8650 = vst [vmem:[#allocation36_spill] sm:$0xff] %v7477_v14  ;;  %8651 = vst [vmem:[#allocation80_spill] sm:$0xff] %v7481_v37  ;;  %v7483_v23 = vld [vmem:[#allocation10 + $0xa8] sm:$0xff]  ;;  %v7487_v3 = vld [vmem:[#allocation12 + $0xb0] sm:$0xff] }
 0x766   :  { %3518 = vmatprep.subr.mxu1 %v7457_v19  ;;  %3589 = vmatprep.subr.mxu0 %v7459_v61  ;;  %8652 = vst [vmem:[#allocation37_spill] sm:$0xff] %v7483_v23  ;;  %8653 = vst [vmem:[#allocation82_spill] sm:$0xff] %v7487_v3  ;;  %v7489_v19 = vld [vmem:[#allocation10 + $0xa0] sm:$0xff]  ;;  %v7493_v61 = vld [vmem:[#allocation12 + $0x98] sm:$0xff] }
 0x767   :  { %3519 = vmatpush1.msra.mxu1 %v7463_v2  ;;  %3590 = vmatpush1.msra.mxu0 %v7465_v27  ;;  %8654 = vst [vmem:[#allocation38_spill] sm:$0xff] %v7489_v19  ;;  %8655 = vst [vmem:[#allocation84_spill] sm:$0xff] %v7493_v61  ;;  %v7495_v2 = vld [vmem:[#allocation10 + $0x88] sm:$0xff]  ;;  %v7499_v27 = vld [vmem:[#allocation12 + $0x90] sm:$0xff] }
 0x768   :  { %3520 = vmatprep.subr.mxu1 %v7469_v20  ;;  %3591 = vmatprep.subr.mxu0 %v7471_v13  ;;  %8656 = vst [vmem:[#allocation39_spill] sm:$0xff] %v7495_v2  ;;  %8657 = vst [vmem:[#allocation86_spill] sm:$0xff] %v7499_v27  ;;  %v7501_v20 = vld [vmem:[#allocation10 + $0x80] sm:$0xff]  ;;  %v7505_v13 = vld [vmem:[#allocation12 + $0x78] sm:$0xff] }
 0x769   :  { %3521 = vmatpush1.msra.mxu1 %v7475_v52  ;;  %3592 = vmatpush1.msra.mxu0 %v7477_v14  ;;  %8658 = vst [vmem:[#allocation40_spill] sm:$0xff] %v7501_v20  ;;  %8659 = vst [vmem:[#allocation41_spill] sm:$0xff] %v7505_v13  ;;  %v7507_v52 = vld [vmem:[#allocation10 + $0x68] sm:$0xff]  ;;  %v7511_v14 = vld [vmem:[#allocation12 + $0x70] sm:$0xff] }
 0x76a   :  { %3522 = vmatprep.subr.mxu1 %v7481_v37  ;;  %3593 = vmatprep.subr.mxu0 %v7483_v23  ;;  %8660 = vst [vmem:[#allocation89_spill] sm:$0xff] %v7507_v52  ;;  %8661 = vst [vmem:[#allocation42_spill] sm:$0xff] %v7511_v14  ;;  %v7513_v37 = vld [vmem:[#allocation10 + $0x60] sm:$0xff]  ;;  %v7517_v23 = vld [vmem:[#allocation12 + $0x58] sm:$0xff] }
 0x76b   :  { %3523 = vmatpush1.msra.mxu1 %v7487_v3  ;;  %3594 = vmatpush1.msra.mxu0 %v7489_v19  ;;  %8662 = vst [vmem:[#allocation43_spill] sm:$0xff] %v7513_v37  ;;  %v7519_v3 = vld [vmem:[#allocation10 + $0x48] sm:$0xff]  ;;  %v7523_v19 = vld [vmem:[#allocation12 + $0x50] sm:$0xff] }
 0x76c   :  { %3524 = vmatprep.subr.mxu1 %v7493_v61  ;;  %3595 = vmatprep.subr.mxu0 %v7495_v2  ;;  %8663 = vst [vmem:[#allocation44_spill] sm:$0xff] %v7519_v3  ;;  %v7525_v61 = vld [vmem:[#allocation10 + $0x40] sm:$0xff]  ;;  %v7529_v2 = vld [vmem:[#allocation12 + $0x38] sm:$0xff] }
 0x76d   :  { %3525 = vmatpush1.msra.mxu1 %v7499_v27  ;;  %3596 = vmatpush1.msra.mxu0 %v7501_v20  ;;  %8664 = vst [vmem:[#allocation45_spill] sm:$0xff] %v7525_v61  ;;  %8665 = vst [vmem:[#allocation46_spill] sm:$0xff] %v7529_v2  ;;  %v7531_v27 = vld [vmem:[#allocation10 + $0x28] sm:$0xff]  ;;  %v7535_v20 = vld [vmem:[#allocation12 + $0x30] sm:$0xff] }
 0x76e   :  { %3526 = vmatprep.subr.mxu1 %v7505_v13  ;;  %3597 = vmatprep.subr.mxu0 %v7507_v52  ;;  %8666 = vst [vmem:[#allocation47_spill] sm:$0xff] %v7535_v20  ;;  %v7537_v13 = vld [vmem:[#allocation10 + $0x20] sm:$0xff]  ;;  %v7541_v52 = vld [vmem:[#allocation12 + $0x18] sm:$0xff] }
 0x76f   :  { %3527 = vmatpush1.msra.mxu1 %v7511_v14  ;;  %3598 = vmatpush1.msra.mxu0 %v7513_v37  ;;  %8667 = vst [vmem:[#allocation48_spill] sm:$0xff] %v7537_v13  ;;  %8668 = vst [vmem:[#allocation49_spill] sm:$0xff] %v7541_v52  ;;  %v7543_v14 = vld [vmem:[#allocation10 + $0x8] sm:$0xff]  ;;  %v7547_v37 = vld [vmem:[#allocation12 + $0x10] sm:$0xff] }
 0x770   :  { %3528 = vmatprep.subr.mxu1 %v7517_v23  ;;  %3599 = vmatprep.subr.mxu0 %v7519_v3  ;;  %8669 = vst [vmem:[#allocation50_spill] sm:$0xff] %v7543_v14  ;;  %8670 = vst [vmem:[#allocation51_spill] sm:$0xff] %v7547_v37  ;;  %v7551_v3 = vld [vmem:[#allocation10] sm:$0xff] }
 0x771   :  { %3529 = vmatpush1.msra.mxu1 %v7523_v19  ;;  %3600 = vmatpush1.msra.mxu0 %v7525_v61  ;;  %8671 = vst [vmem:[#allocation52_spill] sm:$0xff] %v7551_v3  ;;  %v7555_v61 = vld [vmem:[#allocation4 + $0x30] sm:$0xff] }
 0x772   :  { %3530 = vmatprep.subr.mxu1 %v7529_v2  ;;  %3601 = vmatprep.subr.mxu0 %v7531_v27  ;;  %v7559_v2 = vld [vmem:[#allocation10 + $0x1f8] sm:$0xff] }
 0x773   :  { %3531 = vmatpush1.msra.mxu1 %v7535_v20  ;;  %3602 = vmatpush1.msra.mxu0 %v7537_v13  ;;  %8672 = vst [vmem:[#allocation53_spill] sm:$0xff] %v7559_v2  ;;  %v7563_v20 = vld [vmem:[#allocation10 + $0x1f0] sm:$0xff]  ;;  %v7595_v13 = vld [vmem:[#allocation10 + $0x158] sm:$0xff] }
 0x774   :  { %3532 = vmatprep.subr.mxu1 %v7541_v52  ;;  %3603 = vmatprep.subr.mxu0 %v7543_v14  ;;  %8673 = vst [vmem:[#allocation54_spill] sm:$0xff] %v7563_v20  ;;  %v7567_v52 = vld [vmem:[#allocation10 + $0x1d8] sm:$0xff]  ;;  %v7570_v14 = vld [vmem:[#allocation10 + $0x1d0] sm:$0xff]  ;;  %8682 = vst [vmem:[#allocation71_spill] sm:$0xff] %v7595_v13 }
 0x775   :  { %3533 = vmatpush1.msra.mxu1 %v7547_v37  ;;  %3566 = vmatprep.mubr.f32.mxu1 %v8282_v32  ;;  %8674 = vst [vmem:[#allocation55_spill] sm:$0xff] %v7567_v52  ;;  %8675 = vst [vmem:[#allocation57_spill] sm:$0xff] %v7570_v14  ;;  %v7574_v37 = vld [vmem:[#allocation10 + $0x1b8] sm:$0xff] }
 0x776   :  { %3604 = vmatpush1.msra.mxu0 %v7551_v3  ;;  %3637 = vmatprep.mubr.f32.mxu0 %v8282_v32  ;;  %8676 = vst [vmem:[#allocation59_spill] sm:$0xff] %v7574_v37  ;;  %v7578_v3 = vld [vmem:[#allocation10 + $0x1b0] sm:$0xff] }
 0x777   :  { %3567 = vmatmul.mubr.f32.vlgmr.msra.gmra.mxu1 %v7367_v22  ;;  %3638 = vmatmul.mubr.f32.vlgmr.msra.gmra.mxu0 %v7555_v61  ;;  %8677 = vst [vmem:[#allocation61_spill] sm:$0xff] %v7578_v3  ;;  %v7583_v22 = vld [vmem:[#allocation10 + $0x198] sm:$0xff] }
 0x778   :  { %3644 = vmatprep.subr.mxu1 %v7559_v2  ;;  %3708 = vmatprep.mubr.f32.mxu1 %v8282_v32  ;;  %8678 = vst [vmem:[#allocation63_spill] sm:$0xff] %v7583_v22  ;;  %v7586_v2 = vld [vmem:[#allocation10 + $0x190] sm:$0xff] }
 0x779   :  { %3645 = vmatpush1.msra.mxu1 %v7563_v20  ;;  %4784 = vmatprep.subr.mxu0 %v8282_v32  ;;  %8679 = vst [vmem:[#allocation65_spill] sm:$0xff] %v7586_v2  ;;  %v7589_v20 = vld [vmem:[#allocation10 + $0x178] sm:$0xff] }
 0x77a   :  { %3646 = vmatprep.subr.mxu1 %v7567_v52  ;;  %4816 = vmatprep.mubr.msk.f32.mxu0 %vm5219_vm0, %v8282_v32  ;;  %8680 = vst [vmem:[#allocation67_spill] sm:$0xff] %v7589_v20  ;;  %v7592_v52 = vld [vmem:[#allocation10 + $0x170] sm:$0xff] }
 0x77b   :  { %3647 = vmatpush1.msra.mxu1 %v7570_v14  ;;  %8681 = vst [vmem:[#allocation69_spill] sm:$0xff] %v7592_v52  ;;  %v7598_v14 = vld [vmem:[#allocation10 + $0x150] sm:$0xff] }
 0x77c   :  { %3648 = vmatprep.subr.mxu1 %v7574_v37  ;;  %8683 = vst [vmem:[#allocation73_spill] sm:$0xff] %v7598_v14  ;;  %v7601_v37 = vld [vmem:[#allocation10 + $0x138] sm:$0xff] }
 0x77d   :  { %3649 = vmatpush1.msra.mxu1 %v7578_v3  ;;  %8684 = vst [vmem:[#allocation75_spill] sm:$0xff] %v7601_v37  ;;  %v7604_v3 = vld [vmem:[#allocation10 + $0x130] sm:$0xff] }
 0x77e   :  { %3650 = vmatprep.subr.mxu1 %v7583_v22  ;;  %8685 = vst [vmem:[#allocation77_spill] sm:$0xff] %v7604_v3  ;;  %v7607_v22 = vld [vmem:[#allocation10 + $0x118] sm:$0xff] }
 0x77f   :  { %3651 = vmatpush1.msra.mxu1 %v7586_v2  ;;  %8686 = vst [vmem:[#allocation79_spill] sm:$0xff] %v7607_v22  ;;  %v7610_v2 = vld [vmem:[#allocation10 + $0x110] sm:$0xff] }
 0x780   :  { %3652 = vmatprep.subr.mxu1 %v7589_v20  ;;  %8687 = vst [vmem:[#allocation81_spill] sm:$0xff] %v7610_v2  ;;  %v7613_v20 = vld [vmem:[#allocation10 + $0xf8] sm:$0xff] }
 0x781   :  { %3653 = vmatpush1.msra.mxu1 %v7592_v52  ;;  %8688 = vst [vmem:[#allocation83_spill] sm:$0xff] %v7613_v20  ;;  %v7616_v52 = vld [vmem:[#allocation10 + $0xf0] sm:$0xff] }
 0x782   :  { %3654 = vmatprep.subr.mxu1 %v7595_v13  ;;  %8689 = vst [vmem:[#allocation85_spill] sm:$0xff] %v7616_v52  ;;  %v7619_v13 = vld [vmem:[#allocation10 + $0xd8] sm:$0xff] }
 0x783   :  { %3655 = vmatpush1.msra.mxu1 %v7598_v14  ;;  %8690 = vst [vmem:[#allocation87_spill] sm:$0xff] %v7619_v13  ;;  %v7622_v14 = vld [vmem:[#allocation10 + $0xd0] sm:$0xff] }
 0x784   :  { %3656 = vmatprep.subr.mxu1 %v7601_v37  ;;  %8691 = vst [vmem:[#allocation88_spill] sm:$0xff] %v7622_v14  ;;  %v7625_v37 = vld [vmem:[#allocation10 + $0xb8] sm:$0xff] }
 0x785   :  { %3657 = vmatpush1.msra.mxu1 %v7604_v3  ;;  %8692 = vst [vmem:[#allocation90_spill] sm:$0xff] %v7625_v37  ;;  %v7628_v3 = vld [vmem:[#allocation10 + $0xb0] sm:$0xff] }
 0x786   :  { %3658 = vmatprep.subr.mxu1 %v7607_v22  ;;  %8693 = vst [vmem:[#allocation91_spill] sm:$0xff] %v7628_v3  ;;  %v7631_v22 = vld [vmem:[#allocation10 + $0x98] sm:$0xff] }
 0x787   :  { %3659 = vmatpush1.msra.mxu1 %v7610_v2  ;;  %8694 = vst [vmem:[#allocation92_spill] sm:$0xff] %v7631_v22  ;;  %v7634_v2 = vld [vmem:[#allocation10 + $0x90] sm:$0xff] }
 0x788   :  { %3660 = vmatprep.subr.mxu1 %v7613_v20  ;;  %8695 = vst [vmem:[#allocation93_spill] sm:$0xff] %v7634_v2  ;;  %v7637_v20 = vld [vmem:[#allocation10 + $0x78] sm:$0xff] }
 0x789   :  { %3661 = vmatpush1.msra.mxu1 %v7616_v52  ;;  %v7640_v52 = vld [vmem:[#allocation10 + $0x70] sm:$0xff] }
 0x78a   :  { %3662 = vmatprep.subr.mxu1 %v7619_v13  ;;  %v7643_v13 = vld [vmem:[#allocation10 + $0x58] sm:$0xff] }
 0x78b   :  { %3663 = vmatpush1.msra.mxu1 %v7622_v14  ;;  %v7646_v14 = vld [vmem:[#allocation10 + $0x50] sm:$0xff] }
 0x78c   :  { %3664 = vmatprep.subr.mxu1 %v7625_v37  ;;  %v7649_v37 = vld [vmem:[#allocation10 + $0x38] sm:$0xff] }
 0x78d   :  { %3665 = vmatpush1.msra.mxu1 %v7628_v3  ;;  %v7652_v3 = vld [vmem:[#allocation10 + $0x30] sm:$0xff] }
 0x78e   :  { %3666 = vmatprep.subr.mxu1 %v7631_v22  ;;  %v7655_v22 = vld [vmem:[#allocation10 + $0x18] sm:$0xff] }
 0x78f   :  { %3667 = vmatpush1.msra.mxu1 %v7634_v2  ;;  %v7658_v2 = vld [vmem:[#allocation10 + $0x10] sm:$0xff] }
 0x790   :  { %3668 = vmatprep.subr.mxu1 %v7637_v20 }
 0x791   :  { %3669 = vmatpush1.msra.mxu1 %v7640_v52 }
 0x792   :  { %3670 = vmatprep.subr.mxu1 %v7643_v13 }
 0x793   :  { %3671 = vmatpush1.msra.mxu1 %v7646_v14 }
 0x794   :  { %3672 = vmatprep.subr.mxu1 %v7649_v37 }
 0x795   :  { %3673 = vmatpush1.msra.mxu1 %v7652_v3 }
 0x796   :  { %3674 = vmatprep.subr.mxu1 %v7655_v22 }
 0x797   :  { %3675 = vmatpush1.msra.mxu1 %v7658_v2 }
 0x798   :  { %3709 = vmatmul.mubr.f32.vlgmr.msra.gmra.mxu1 %v7555_v61  ;;  %3960 = vmatprep.subr.mxu1 %v7253_v63  ;;  %v7698_v63 = vld [vmem:[#allocation13 + $0x78] sm:$0xff] }
 0x799   :  { %3961 = vmatpush1.msra.mxu1 %v7256_v29  ;;  %4024 = vmatprep.mubr.f32.mxu1 %v8282_v32  ;;  %v7702_v29 = vld [vmem:[#allocation13 + $0x70] sm:$0xff] }
 0x79a   :  { %3962 = vmatprep.subr.mxu1 %v7259_v33  ;;  %4785 = vmatpush3.msra.mxu0 %v7698_v63  ;;  %v7706_v33 = vld [vmem:[#allocation13 + $0x68] sm:$0xff] }
 0x79b   :  { %3963 = vmatpush1.msra.mxu1 %v7262_v51  ;;  %4786 = vmatprep.subr.mxu0 %v8282_v32  ;;  %v7710_v51 = vld [vmem:[#allocation13 + $0x60] sm:$0xff] }
 0x79c   :  { %3964 = vmatprep.subr.mxu1 %v7265_v46  ;;  %4787 = vmatpush3.msra.mxu0 %v7702_v29  ;;  %v7714_v46 = vld [vmem:[#allocation13 + $0x58] sm:$0xff] }
 0x79d   :  { %3965 = vmatpush1.msra.mxu1 %v7268_v0  ;;  %4788 = vmatprep.subr.mxu0 %v8282_v32  ;;  %v7718_v0 = vld [vmem:[#allocation13 + $0x50] sm:$0xff] }
 0x79e   :  { %3966 = vmatprep.subr.mxu1 %v7271_v4  ;;  %4789 = vmatpush3.msra.mxu0 %v7706_v33  ;;  %v7722_v4 = vld [vmem:[#allocation13 + $0x48] sm:$0xff] }
 0x79f   :  { %3967 = vmatpush1.msra.mxu1 %v7274_v30  ;;  %4790 = vmatprep.subr.mxu0 %v8282_v32  ;;  %v7726_v30 = vld [vmem:[#allocation13 + $0x40] sm:$0xff] }
 0x7a0   :  { %3968 = vmatprep.subr.mxu1 %v7277_v50  ;;  %4791 = vmatpush3.msra.mxu0 %v7710_v51  ;;  %v7730_v50 = vld [vmem:[#allocation13 + $0x38] sm:$0xff] }
 0x7a1   :  { %3969 = vmatpush1.msra.mxu1 %v7280_v58  ;;  %4792 = vmatprep.subr.mxu0 %v8282_v32  ;;  %v7733_v58 = vld [vmem:[#allocation13 + $0x30] sm:$0xff] }
 0x7a2   :  { %3970 = vmatprep.subr.mxu1 %v7283_v60  ;;  %4793 = vmatpush3.msra.mxu0 %v7714_v46  ;;  %v7736_v60 = vld [vmem:[#allocation13 + $0x28] sm:$0xff] }
 0x7a3   :  { %3971 = vmatpush1.msra.mxu1 %v7286_v62  ;;  %4794 = vmatprep.subr.mxu0 %v8282_v32  ;;  %v7740_v62 = vld [vmem:[#allocation13 + $0x20] sm:$0xff] }
 0x7a4   :  { %3972 = vmatprep.subr.mxu1 %v7289_v54  ;;  %4795 = vmatpush3.msra.mxu0 %v7718_v0  ;;  %v7744_v54 = vld [vmem:[#allocation13 + $0x18] sm:$0xff] }
 0x7a5   :  { %3973 = vmatpush1.msra.mxu1 %v7292_v53  ;;  %4796 = vmatprep.subr.mxu0 %v8282_v32  ;;  %v7748_v53 = vld [vmem:[#allocation13 + $0x10] sm:$0xff] }
 0x7a6   :  { %3974 = vmatprep.subr.mxu1 %v7295_v55  ;;  %4797 = vmatpush3.msra.mxu0 %v7722_v4  ;;  %v7752_v55 = vld [vmem:[#allocation13 + $0x8] sm:$0xff] }
 0x7a7   :  { %3975 = vmatpush1.msra.mxu1 %v7298_v56  ;;  %4798 = vmatprep.subr.mxu0 %v8282_v32  ;;  %v7756_v56 = vld [vmem:[#allocation13] sm:$0xff] }
 0x7a8   :  { %3976 = vmatprep.subr.mxu1 %v7301_v45  ;;  %4799 = vmatpush3.msra.mxu0 %v7726_v30 }
 0x7a9   :  { %3977 = vmatpush1.msra.mxu1 %v7304_v43  ;;  %4800 = vmatprep.subr.mxu0 %v8282_v32 }
 0x7aa   :  { %3978 = vmatprep.subr.mxu1 %v7307_v1  ;;  %4801 = vmatpush3.msra.mxu0 %v7730_v50 }
 0x7ab   :  { %3979 = vmatpush1.msra.mxu1 %v7309_v16  ;;  %4802 = vmatprep.subr.mxu0 %v8282_v32 }
 0x7ac   :  { %3980 = vmatprep.subr.mxu1 %v7311_v18  ;;  %4803 = vmatpush3.msra.mxu0 %v7733_v58 }
 0x7ad   :  { %3981 = vmatpush1.msra.mxu1 %v7314_v31  ;;  %4804 = vmatprep.subr.mxu0 %v8282_v32 }
 0x7ae   :  { %3982 = vmatprep.subr.mxu1 %v7317_v11  ;;  %4805 = vmatpush3.msra.mxu0 %v7736_v60 }
 0x7af   :  { %3983 = vmatpush1.msra.mxu1 %v7320_v7  ;;  %4806 = vmatprep.subr.mxu0 %v8282_v32 }
 0x7b0   :  { %3984 = vmatprep.subr.mxu1 %v7323_v17  ;;  %4807 = vmatpush3.msra.mxu0 %v7740_v62 }
 0x7b1   :  { %3985 = vmatpush1.msra.mxu1 %v7328_v28  ;;  %4808 = vmatprep.subr.mxu0 %v8282_v32 }
 0x7b2   :  { %3986 = vmatprep.subr.mxu1 %v7332_v36  ;;  %4809 = vmatpush3.msra.mxu0 %v7744_v54 }
 0x7b3   :  { %3987 = vmatpush1.msra.mxu1 %v7335_v6  ;;  %4810 = vmatprep.subr.mxu0 %v8282_v32 }
 0x7b4   :  { %3988 = vmatprep.subr.mxu1 %v7338_v49  ;;  %4811 = vmatpush3.msra.mxu0 %v7748_v53 }
 0x7b5   :  { %3989 = vmatpush1.msra.mxu1 %v7341_v40  ;;  %4812 = vmatprep.subr.mxu0 %v8282_v32 }
 0x7b6   :  { %3990 = vmatprep.subr.mxu1 %v7344_v57  ;;  %4813 = vmatpush3.msra.mxu0 %v7752_v55 }
 0x7b7   :  { %3991 = vmatpush1.msra.mxu1 %v7347_v44  ;;  %4814 = vmatprep.subr.mxu0 %v8282_v32 }
 0x7b8   :  { %4102 = vmatprep.subr.mxu1 %v7350_v59  ;;  %4815 = vmatpush3.msra.mxu0 %v7756_v56 }
 0x7b9   :  { %4031 = vmatprep.subr.mxu0 %v7325_v38 }
 0x816   :  { %v3292_v45 = vpop.f32.mrf.mxu1  ;;  %v3497_v11 = vpop.f32.mrf.mxu0 }
 0x817   :  { %v3293_v43 = vadd.f32 %v7358_v15, %v3292_v45 }
 0x818   :  { %v4783_v1 = vpop.f32.mrf.mxu1  ;;  %v3499_v7 = vpop.f32.mrf.mxu0 }
 0x819   :  { %v3296_v16 = vmul.f32 1.442695, %v3293_v43 }
 0x81b   :  { %4975 = vpow2.f32 %v3296_v16 }
 0x828   :  { %v4976_v18 = vpop.eup %4975 }
 0x829   :  { %v3298_v31 = vsel %vm126_vm1, %v3293_v43, %v4976_v18 }
 0x82a   :  { %3300 = vst [vmem:[#allocation15 + $0x28] sm:$0xff] %v3298_v31 }
 0x837   :  { %v3639_v17 = vpop.f32.mrf.mxu0  ;;  %v3568_v57 = vpop.f32.mrf.mxu1 }
 0x838   :  { %v3640_v6 = vadd.f32 %v3639_v17, %v3497_v11 }
 0x839   :  { %v3641_v28 = vpop.f32.mrf.mxu0  ;;  %v3570_v45 = vpop.f32.mrf.mxu1 }
 0x83a   :  { %v3642_v36 = vadd.f32 %v3641_v28, %v3499_v7  ;;  %v4432_v40 = vmul.f32 -1.442695, %v3640_v6 }
 0x83c   :  { %v4433_v49 = vmul.f32 -1.442695, %v3642_v36 }
 0x83e   :  { %4977 = vpow2.f32 %v4433_v49 }
 0x83f   :  { %4979 = vpow2.f32 %v4432_v40 }
 0x84b   :  { %v4978_v38 = vpop.eup %4977 }
 0x84c   :  { %v4980_v44 = vpop.eup %4979  ;;  %v3724_v59 = vadd.f32 1.0, %v4978_v38 }
 0x84d   :  { %v3718_v61 = vadd.f32 1.0, %v4980_v44 }
 0x84e   :  { %4981 = vrcp.f32 %v3724_v59  ;;  %v8711_v59 = vld [vmem:[#allocation32_spill] sm:$0xff] }
 0x84f   :  { %4983 = vrcp.f32 %v3718_v61  ;;  %v8712_v61 = vld [vmem:[#allocation72_spill] sm:$0xff] }
 0x858   :  { %v3710_v1 = vpop.f32.mrf.mxu1 }
 0x859   :  { %v3711_v43 = vadd.f32 %v3710_v1, %v3568_v57  ;;  %v8714_v1 = vld [vmem:[#allocation74_spill] sm:$0xff] }
 0x85a   :  { %v3712_v16 = vpop.f32.mrf.mxu1 }
 0x85b   :  { %4985 = vtanh.f32 %v3711_v43  ;;  %v3713_v18 = vadd.f32 %v3712_v16, %v3570_v45  ;;  %v4982_v11 = vpop.eup %4981  ;;  %v8713_v45 = vld [vmem:[#allocation33_spill] sm:$0xff]  ;;  %v8715_v43 = vld [vmem:[#allocation34_spill] sm:$0xff]  ;;  %v8716_v16 = vld [vmem:[#allocation76_spill] sm:$0xff] }
 0x85c   :  { %v4984_v7 = vpop.eup %4983  ;;  %v3734_v28 = vmul.f32 %v4982_v11, %v7364_v25  ;;  %v8696_v25 = vld [vmem:[#allocation56_spill] sm:$0xff] }
 0x85d   :  { %v4434_v31 = vmul.f32 -1.442695, %v3713_v18  ;;  %v8717_v18 = vld [vmem:[#allocation35_spill] sm:$0xff]  ;;  %v8719_v11 = vld [vmem:[#allocation36_spill] sm:$0xff] }
 0x85f   :  { %4987 = vpow2.f32 %v4434_v31  ;;  %v8718_v31 = vld [vmem:[#allocation78_spill] sm:$0xff] }
 0x868   :  { %v4986_v17 = vpop.eup %4985 }
 0x869   :  { %v3735_v36 = vmul.f32 %v4986_v17, %v4984_v7  ;;  %v8720_v7 = vld [vmem:[#allocation80_spill] sm:$0xff]  ;;  %v8721_v17 = vld [vmem:[#allocation37_spill] sm:$0xff] }
 0x86b   :  { %v7766_v6 = vadd.f32 %v3735_v36, %v3734_v28  ;;  %v8722_v28 = vld [vmem:[#allocation82_spill] sm:$0xff] }
 0x86c   :  { %v4988_v49 = vpop.eup %4987  ;;  %v8723_v36 = vld [vmem:[#allocation38_spill] sm:$0xff] }
 0x86d   :  { %v3731_v40 = vadd.f32 1.0, %v4988_v49  ;;  %4989 = vtanh.f32 %v7766_v6  ;;  %v8724_v49 = vld [vmem:[#allocation84_spill] sm:$0xff] }
 0x86f   :  { %4991 = vrcp.f32 %v3731_v40  ;;  %v8725_v40 = vld [vmem:[#allocation39_spill] sm:$0xff] }
 0x87a   :  { %v4990_v38 = vpop.eup %4989 }
 0x87c   :  { %v4992_v57 = vpop.eup %4991 }
 0x87d   :  { %v7769_v44 = vmul.f32 %v4992_v57, %v4990_v38  ;;  %v8726_v38 = vld [vmem:[#allocation86_spill] sm:$0xff]  ;;  %v8727_v57 = vld [vmem:[#allocation40_spill] sm:$0xff] }
 0x87f   :  { %4817 = vmatmul.mubr.f32.vlgmr.msra.gmra.mxu0 %v7769_v44  ;;  %4025 = vmatmul.mubr.f32.vlgmr.msra.gmra.mxu1 %v7769_v44 }
 0x880   :  { %4032 = vmatpush1.msra.mxu0 %v7369_v48  ;;  %4103 = vmatpush1.msra.mxu1 %v7371_v34  ;;  %v8697_v48 = vld [vmem:[#allocation25_spill] sm:$0xff]  ;;  %v8698_v34 = vld [vmem:[#allocation58_spill] sm:$0xff] }
 0x881   :  { %4033 = vmatprep.subr.mxu0 %v7373_v21  ;;  %4104 = vmatprep.subr.mxu1 %v7375_v42  ;;  %v8699_v21 = vld [vmem:[#allocation26_spill] sm:$0xff]  ;;  %v8700_v42 = vld [vmem:[#allocation60_spill] sm:$0xff] }
 0x882   :  { %4034 = vmatpush1.msra.mxu0 %v7379_v9  ;;  %4105 = vmatpush1.msra.mxu1 %v7381_v26  ;;  %v8701_v9 = vld [vmem:[#allocation27_spill] sm:$0xff]  ;;  %v8702_v26 = vld [vmem:[#allocation62_spill] sm:$0xff] }
 0x883   :  { %4035 = vmatprep.subr.mxu0 %v7385_v39  ;;  %4106 = vmatprep.subr.mxu1 %v7387_v24  ;;  %v8703_v39 = vld [vmem:[#allocation28_spill] sm:$0xff] }
 0x884   :  { %4036 = vmatpush1.msra.mxu0 %v7391_v41  ;;  %4107 = vmatpush1.msra.mxu1 %v7393_v10  ;;  %v8704_v24 = vld [vmem:[#allocation64_spill] sm:$0xff]  ;;  %v8705_v41 = vld [vmem:[#allocation29_spill] sm:$0xff]  ;;  %v8706_v10 = vld [vmem:[#allocation66_spill] sm:$0xff] }
 0x885   :  { %4037 = vmatprep.subr.mxu0 %v7397_v35  ;;  %4108 = vmatprep.subr.mxu1 %v7399_v12  ;;  %v8707_v35 = vld [vmem:[#allocation30_spill] sm:$0xff]  ;;  %v8708_v12 = vld [vmem:[#allocation68_spill] sm:$0xff] }
 0x886   :  { %4038 = vmatpush1.msra.mxu0 %v7403_v47  ;;  %4109 = vmatpush1.msra.mxu1 %v7405_v5  ;;  %v8709_v47 = vld [vmem:[#allocation31_spill] sm:$0xff]  ;;  %v8710_v5 = vld [vmem:[#allocation70_spill] sm:$0xff] }
 0x887   :  { %4039 = vmatprep.subr.mxu0 %v8696_v25  ;;  %4110 = vmatprep.subr.mxu1 %v8697_v48  ;;  %v8728_v25 = vld [vmem:[#allocation41_spill] sm:$0xff] }
 0x888   :  { %4040 = vmatpush1.msra.mxu0 %v8698_v34  ;;  %4111 = vmatpush1.msra.mxu1 %v8699_v21  ;;  %v8729_v48 = vld [vmem:[#allocation89_spill] sm:$0xff]  ;;  %v8730_v34 = vld [vmem:[#allocation42_spill] sm:$0xff]  ;;  %v8731_v21 = vld [vmem:[#allocation43_spill] sm:$0xff] }
 0x889   :  { %4041 = vmatprep.subr.mxu0 %v8700_v42  ;;  %4112 = vmatprep.subr.mxu1 %v8701_v9  ;;  %v8732_v42 = vld [vmem:[#allocation44_spill] sm:$0xff]  ;;  %v8733_v9 = vld [vmem:[#allocation45_spill] sm:$0xff] }
 0x88a   :  { %4042 = vmatpush1.msra.mxu0 %v8702_v26  ;;  %4113 = vmatpush1.msra.mxu1 %v8703_v39  ;;  %v8734_v26 = vld [vmem:[#allocation46_spill] sm:$0xff]  ;;  %v8735_v39 = vld [vmem:[#allocation47_spill] sm:$0xff] }
 0x88b   :  { %4043 = vmatprep.subr.mxu0 %v8704_v24  ;;  %4114 = vmatprep.subr.mxu1 %v8705_v41  ;;  %v8736_v24 = vld [vmem:[#allocation48_spill] sm:$0xff]  ;;  %v8737_v41 = vld [vmem:[#allocation49_spill] sm:$0xff] }
 0x88c   :  { %4044 = vmatpush1.msra.mxu0 %v8706_v10  ;;  %4115 = vmatpush1.msra.mxu1 %v8707_v35  ;;  %v8738_v10 = vld [vmem:[#allocation50_spill] sm:$0xff]  ;;  %v7833_v35 = vld [vmem:[#allocation4 + $0x38] sm:$0xff] }
 0x88d   :  { %4045 = vmatprep.subr.mxu0 %v8708_v12  ;;  %4116 = vmatprep.subr.mxu1 %v8709_v47  ;;  %v8742_v12 = vld [vmem:[#allocation54_spill] sm:$0xff]  ;;  %v8743_v47 = vld [vmem:[#allocation55_spill] sm:$0xff] }
 0x88e   :  { %4046 = vmatpush1.msra.mxu0 %v8710_v5  ;;  %4117 = vmatpush1.msra.mxu1 %v8711_v59  ;;  %v8744_v5 = vld [vmem:[#allocation57_spill] sm:$0xff]  ;;  %v8745_v59 = vld [vmem:[#allocation59_spill] sm:$0xff] }
 0x88f   :  { %4047 = vmatprep.subr.mxu0 %v8712_v61  ;;  %4118 = vmatprep.subr.mxu1 %v8713_v45  ;;  %v8747_v61 = vld [vmem:[#allocation63_spill] sm:$0xff]  ;;  %v8748_v45 = vld [vmem:[#allocation65_spill] sm:$0xff] }
 0x890   :  { %4048 = vmatpush1.msra.mxu0 %v8714_v1  ;;  %4119 = vmatpush1.msra.mxu1 %v8715_v43  ;;  %v8750_v1 = vld [vmem:[#allocation69_spill] sm:$0xff] }
 0x891   :  { %4049 = vmatprep.subr.mxu0 %v8716_v16  ;;  %4120 = vmatprep.subr.mxu1 %v8717_v18  ;;  %v8752_v43 = vld [vmem:[#allocation73_spill] sm:$0xff] }
 0x892   :  { %4050 = vmatpush1.msra.mxu0 %v8718_v31  ;;  %4121 = vmatpush1.msra.mxu1 %v8719_v11  ;;  %v8754_v16 = vld [vmem:[#allocation77_spill] sm:$0xff]  ;;  %v8760_v11 = vld [vmem:[#allocation88_spill] sm:$0xff] }
 0x893   :  { %4051 = vmatprep.subr.mxu0 %v8720_v7  ;;  %4122 = vmatprep.subr.mxu1 %v8721_v17  ;;  %v8756_v18 = vld [vmem:[#allocation81_spill] sm:$0xff]  ;;  %v8762_v7 = vld [vmem:[#allocation91_spill] sm:$0xff] }
 0x894   :  { %4052 = vmatpush1.msra.mxu0 %v8722_v28  ;;  %4123 = vmatpush1.msra.mxu1 %v8723_v36  ;;  %v8758_v31 = vld [vmem:[#allocation85_spill] sm:$0xff] }
 0x895   :  { %4053 = vmatprep.subr.mxu0 %v8724_v49  ;;  %4124 = vmatprep.subr.mxu1 %v8725_v40  ;;  %v8764_v17 = vld [vmem:[#allocation93_spill] sm:$0xff] }
 0x896   :  { %4054 = vmatpush1.msra.mxu0 %v8726_v38  ;;  %4125 = vmatpush1.msra.mxu1 %v8727_v57 }
 0x897   :  { %4055 = vmatprep.subr.mxu0 %v8728_v25  ;;  %4126 = vmatprep.subr.mxu1 %v8729_v48 }
 0x898   :  { %4056 = vmatpush1.msra.mxu0 %v8730_v34  ;;  %4127 = vmatpush1.msra.mxu1 %v8731_v21 }
 0x899   :  { %4057 = vmatprep.subr.mxu0 %v7517_v23  ;;  %4128 = vmatprep.subr.mxu1 %v8732_v42  ;;  %v8739_v23 = vld [vmem:[#allocation51_spill] sm:$0xff] }
 0x89a   :  { %4058 = vmatpush1.msra.mxu0 %v7523_v19  ;;  %4129 = vmatpush1.msra.mxu1 %v8733_v9  ;;  %v8740_v19 = vld [vmem:[#allocation52_spill] sm:$0xff] }
 0x89b   :  { %4059 = vmatprep.subr.mxu0 %v8734_v26  ;;  %4130 = vmatprep.subr.mxu1 %v7531_v27  ;;  %v8741_v27 = vld [vmem:[#allocation53_spill] sm:$0xff] }
 0x89c   :  { %4060 = vmatpush1.msra.mxu0 %v8735_v39  ;;  %4131 = vmatpush1.msra.mxu1 %v8736_v24 }
 0x89d   :  { %4061 = vmatprep.subr.mxu0 %v8737_v41  ;;  %4132 = vmatprep.subr.mxu1 %v8738_v10 }
 0x89e   :  { %4062 = vmatpush1.msra.mxu0 %v8739_v23  ;;  %4095 = vmatprep.mubr.f32.mxu0 %v8282_v32 }
 0x89f   :  { %4133 = vmatpush1.msra.mxu1 %v8740_v19  ;;  %4166 = vmatprep.mubr.f32.mxu1 %v8282_v32 }
 0x8a0   :  { %4096 = vmatmul.mubr.f32.vlgmr.msra.gmra.mxu0 %v7769_v44  ;;  %4167 = vmatmul.mubr.f32.vlgmr.msra.gmra.mxu1 %v7833_v35  ;;  %v8746_v44 = vld [vmem:[#allocation61_spill] sm:$0xff] }
 0x8a1   :  { %4173 = vmatprep.subr.mxu0 %v8741_v27  ;;  %4237 = vmatprep.mubr.f32.mxu0 %v8282_v32 }
 0x8a2   :  { %4174 = vmatpush1.msra.mxu0 %v8742_v12  ;;  %4819 = vmatprep.subr.mxu1 %v8282_v32 }
 0x8a3   :  { %4175 = vmatprep.subr.mxu0 %v8743_v47  ;;  %4820 = vmatpush3.msra.mxu1 %v7698_v63  ;;  %v8749_v63 = vld [vmem:[#allocation67_spill] sm:$0xff] }
 0x8a4   :  { %4176 = vmatpush1.msra.mxu0 %v8744_v5  ;;  %4821 = vmatprep.subr.mxu1 %v8282_v32 }
 0x8a5   :  { %4177 = vmatprep.subr.mxu0 %v8745_v59  ;;  %4822 = vmatpush3.msra.mxu1 %v7702_v29  ;;  %v8751_v29 = vld [vmem:[#allocation71_spill] sm:$0xff] }
 0x8a6   :  { %4178 = vmatpush1.msra.mxu0 %v8746_v44  ;;  %4823 = vmatprep.subr.mxu1 %v8282_v32 }
 0x8a7   :  { %4179 = vmatprep.subr.mxu0 %v8747_v61  ;;  %4824 = vmatpush3.msra.mxu1 %v7706_v33  ;;  %v8753_v33 = vld [vmem:[#allocation75_spill] sm:$0xff] }
 0x8a8   :  { %4180 = vmatpush1.msra.mxu0 %v8748_v45  ;;  %4825 = vmatprep.subr.mxu1 %v8282_v32 }
 0x8a9   :  { %4181 = vmatprep.subr.mxu0 %v8749_v63  ;;  %4826 = vmatpush3.msra.mxu1 %v7710_v51  ;;  %v8755_v51 = vld [vmem:[#allocation79_spill] sm:$0xff] }
 0x8aa   :  { %4182 = vmatpush1.msra.mxu0 %v8750_v1  ;;  %4827 = vmatprep.subr.mxu1 %v8282_v32 }
 0x8ab   :  { %4183 = vmatprep.subr.mxu0 %v8751_v29  ;;  %4828 = vmatpush3.msra.mxu1 %v7714_v46  ;;  %v8757_v46 = vld [vmem:[#allocation83_spill] sm:$0xff] }
 0x8ac   :  { %4184 = vmatpush1.msra.mxu0 %v8752_v43  ;;  %4829 = vmatprep.subr.mxu1 %v8282_v32 }
 0x8ad   :  { %4185 = vmatprep.subr.mxu0 %v8753_v33  ;;  %4830 = vmatpush3.msra.mxu1 %v7718_v0  ;;  %v8759_v0 = vld [vmem:[#allocation87_spill] sm:$0xff] }
 0x8ae   :  { %4186 = vmatpush1.msra.mxu0 %v8754_v16  ;;  %4831 = vmatprep.subr.mxu1 %v8282_v32 }
 0x8af   :  { %4187 = vmatprep.subr.mxu0 %v8755_v51  ;;  %4832 = vmatpush3.msra.mxu1 %v7722_v4  ;;  %v8761_v4 = vld [vmem:[#allocation90_spill] sm:$0xff] }
 0x8b0   :  { %4188 = vmatpush1.msra.mxu0 %v8756_v18  ;;  %4833 = vmatprep.subr.mxu1 %v8282_v32 }
 0x8b1   :  { %4189 = vmatprep.subr.mxu0 %v8757_v46  ;;  %4834 = vmatpush3.msra.mxu1 %v7726_v30  ;;  %v8763_v30 = vld [vmem:[#allocation92_spill] sm:$0xff] }
 0x8b2   :  { %4190 = vmatpush1.msra.mxu0 %v8758_v31  ;;  %4835 = vmatprep.subr.mxu1 %v8282_v32 }
 0x8b3   :  { %4191 = vmatprep.subr.mxu0 %v8759_v0  ;;  %4836 = vmatpush3.msra.mxu1 %v7730_v50 }
 0x8b4   :  { %4192 = vmatpush1.msra.mxu0 %v8760_v11  ;;  %4837 = vmatprep.subr.mxu1 %v8282_v32 }
 0x8b5   :  { %4193 = vmatprep.subr.mxu0 %v8761_v4  ;;  %4838 = vmatpush3.msra.mxu1 %v7733_v58 }
 0x8b6   :  { %4194 = vmatpush1.msra.mxu0 %v8762_v7  ;;  %4839 = vmatprep.subr.mxu1 %v8282_v32 }
 0x8b7   :  { %4195 = vmatprep.subr.mxu0 %v8763_v30  ;;  %4840 = vmatpush3.msra.mxu1 %v7736_v60 }
 0x8b8   :  { %4196 = vmatpush1.msra.mxu0 %v8764_v17  ;;  %4841 = vmatprep.subr.mxu1 %v8282_v32 }
 0x8b9   :  { %4197 = vmatprep.subr.mxu0 %v7637_v20  ;;  %4842 = vmatpush3.msra.mxu1 %v7740_v62 }
 0x8ba   :  { %4198 = vmatpush1.msra.mxu0 %v7640_v52  ;;  %4843 = vmatprep.subr.mxu1 %v8282_v32 }
 0x8bb   :  { %4199 = vmatprep.subr.mxu0 %v7643_v13  ;;  %4844 = vmatpush3.msra.mxu1 %v7744_v54 }
 0x8bc   :  { %4200 = vmatpush1.msra.mxu0 %v7646_v14  ;;  %4845 = vmatprep.subr.mxu1 %v8282_v32 }
 0x8bd   :  { %4201 = vmatprep.subr.mxu0 %v7649_v37  ;;  %4846 = vmatpush3.msra.mxu1 %v7748_v53 }
 0x8be   :  { %4202 = vmatpush1.msra.mxu0 %v7652_v3  ;;  %4847 = vmatprep.subr.mxu1 %v8282_v32 }
 0x8bf   :  { %4203 = vmatprep.subr.mxu0 %v7655_v22  ;;  %4848 = vmatpush3.msra.mxu1 %v7752_v55 }
 0x8c0   :  { %4204 = vmatpush1.msra.mxu0 %v7658_v2  ;;  %4849 = vmatprep.subr.mxu1 %v8282_v32 }
 0x8c1   :  { %4238 = vmatmul.mubr.f32.vlgmr.msra.gmra.mxu0 %v7833_v35  ;;  %4850 = vmatpush3.msra.mxu1 %v7756_v56 }
 0x8c2   :  { %4851 = vmatprep.mubr.msk.f32.mxu1 %vm5219_vm0, %v8282_v32 }
 0x93f   :  { %v3821_v52 = vpop.f32.mrf.mxu0  ;;  %v4026_v2 = vpop.f32.mrf.mxu1 }
 0x940   :  { %v3822_v14 = vadd.f32 %v7358_v15, %v3821_v52 }
 0x941   :  { %v4818_v37 = vpop.f32.mrf.mxu0  ;;  %v4028_v22 = vpop.f32.mrf.mxu1 }
 0x942   :  { %v3825_v3 = vmul.f32 1.442695, %v3822_v14 }
 0x944   :  { %4993 = vpow2.f32 %v3825_v3 }
 0x951   :  { %v4994_v20 = vpop.eup %4993 }
 0x952   :  { %v3827_v13 = vsel %vm126_vm1, %v3822_v14, %v4994_v20 }
 0x953   :  { %3829 = vst [vmem:[#allocation15 + $0x30] sm:$0xff] %v3827_v13 }
 0x960   :  { %v4168_v50 = vpop.f32.mrf.mxu1  ;;  %v4097_v15 = vpop.f32.mrf.mxu0 }
 0x961   :  { %v4169_v62 = vadd.f32 %v4168_v50, %v4026_v2 }
 0x962   :  { %v4170_v58 = vpop.f32.mrf.mxu1  ;;  %v4099_v36 = vpop.f32.mrf.mxu0 }
 0x963   :  { %v4171_v60 = vadd.f32 %v4170_v58, %v4028_v22  ;;  %v4435_v53 = vmul.f32 -1.442695, %v4169_v62 }
 0x965   :  { %v4436_v54 = vmul.f32 -1.442695, %v4171_v60 }
 0x967   :  { %4995 = vpow2.f32 %v4436_v54 }
 0x968   :  { %4997 = vpow2.f32 %v4435_v53 }
 0x974   :  { %v4996_v32 = vpop.eup %4995 }
 0x975   :  { %v4998_v55 = vpop.eup %4997  ;;  %v4253_v56 = vadd.f32 1.0, %v4996_v32 }
 0x976   :  { %v4247_v28 = vadd.f32 1.0, %v4998_v55 }
 0x977   :  { %4999 = vrcp.f32 %v4253_v56 }
 0x978   :  { %5001 = vrcp.f32 %v4247_v28 }
 0x981   :  { %v4239_v49 = vpop.f32.mrf.mxu0 }
 0x982   :  { %v4240_v40 = vadd.f32 %v4239_v49, %v4097_v15 }
 0x983   :  { %v4241_v38 = vpop.f32.mrf.mxu0 }
 0x984   :  { %5003 = vtanh.f32 %v4240_v40  ;;  %v4242_v57 = vadd.f32 %v4241_v38, %v4099_v36  ;;  %v5000_v48 = vpop.eup %4999 }
 0x985   :  { %v5002_v34 = vpop.eup %5001  ;;  %v4263_v42 = vmul.f32 %v5000_v48, %v7766_v6 }
 0x986   :  { %v4437_v25 = vmul.f32 -1.442695, %v4242_v57 }
 0x988   :  { %5005 = vpow2.f32 %v4437_v25 }
 0x991   :  { %v5004_v21 = vpop.eup %5003 }
 0x992   :  { %v4264_v9 = vmul.f32 %v5004_v21, %v5002_v34 }
 0x994   :  { %v4265_v26 = vadd.f32 %v4264_v9, %v4263_v42 }
 0x995   :  { %v5006_v39 = vpop.eup %5005 }
 0x996   :  { %4365 = vst [vmem:[#allocation18] sm:$0xff] %v4265_v26  ;;  %v4260_v24 = vadd.f32 1.0, %v5006_v39  ;;  %5007 = vtanh.f32 %v4265_v26 }
 0x998   :  { %5009 = vrcp.f32 %v4260_v24 }
 0x9a3   :  { %v5008_v41 = vpop.eup %5007 }
 0x9a5   :  { %v5010_v10 = vpop.eup %5009 }
 0x9a6   :  { %v4267_v35 = vmul.f32 %v5010_v10, %v5008_v41 }
 0x9a8   :  { %4852 = vmatmul.mubr.f32.vlgmr.msra.gmra.mxu1 %v4267_v35  ;;  %4364 = vst [vmem:[#allocation16] sm:$0xff] %v4267_v35 }
 0x9a9   :  { %5147 = shalt.err (!%p5144_p6)
}
 0x9aa   :  { %4387 = dma.vmem_to_hbm [thread:$0]  %s4385_s1, 128, %s7938_s8, [#allocation17]  }
 0x9ab   :  { %s5221_s27 = smov [#allocation18]  }
 0x9ac   :  { %s4394_s28 = sshll.u32 %s5221_s27, 4  ;;  %s4395_s28 = int_to_ptr.vmem [resolvable:$true] %s4394_s28 }
 0x9ad   :  { %s5156_s29 = scalar_lea.vmem %s4395_s28, 128  ;;  %p5161_p8 = scmp.lt.s32.totalorder %s4395_s28, %s4395_s28 }
 0x9ae   :  { %p5157_p7 = scmp.ne.s32.totalorder %s4395_s28, %s5156_s29  ;;  %p5162_p9 = scmp.lt.s32.totalorder %s5156_s29, %s5156_s29 }
 0x9b0   :  { %p5163_p10 = por %p5162_p9, %p5161_p8 }
 0x9b2   :  { %p5164_p11 = pnand %p5163_p10, %p5157_p7 }
 0x9b4   :  { %5167 = shalt.err (!%p5164_p11)
}
 0x9b5   :  { %4397 = dma.vmem_to_hbm [thread:$0]  %s4395_s28, 128, %s7939_s9, [#allocation17]   ;;  %v5015_v23 = vld [vmem:[%s7936_s6] ss:$0 sm:$0xff] }
 0x9b6   :  { %s5222_s8 = smov [#allocation15]  }
 0x9b7   :  { %s4371_s0 = sshll.u32 %s5222_s8, 4  ;;  %s4372_s0 = int_to_ptr.vmem [resolvable:$true] %s4371_s0 }
 0x9b8   :  { %s5176_s13 = scalar_lea.vmem %s4372_s0, 1024  ;;  %p5181_p13 = scmp.lt.s32.totalorder %s4372_s0, %s4372_s0 }
 0x9b9   :  { %p5177_p12 = scmp.ne.s32.totalorder %s4372_s0, %s5176_s13  ;;  %p5182_p0 = scmp.lt.s32.totalorder %s5176_s13, %s5176_s13 }
 0x9bb   :  { %p5183_p1 = por %p5182_p0, %p5181_p13 }
 0x9bd   :  { %p5184_p2 = pnand %p5183_p1, %p5177_p12 }
 0xa68   :  { %v4350_v6 = vpop.f32.mrf.mxu1 }
 0xa69   :  { %v4351_v19 = vadd.f32 %v5015_v23, %v4350_v6 }
 0xa6a   :  { %v4853_v27 = vpop.f32.mrf.mxu1 }
 0xa6b   :  { %v4354_v12 = vmul.f32 1.442695, %v4351_v19 }
 0xa6d   :  { %5011 = vpow2.f32 %v4354_v12 }
 0xa7a   :  { %v5012_v47 = vpop.eup %5011 }
 0xa7b   :  { %v4356_v5 = vsel %vm126_vm1, %v4351_v19, %v5012_v47 }
 0xa7c   :  { %4358 = vst [vmem:[#allocation15 + $0x38] sm:$0xff] %v4356_v5 }
 0xa7d   :  { %5187 = shalt.err (!%p5184_p2)
}
 0xa7e   :  { %4377 = dma.vmem_to_hbm [thread:$0]  %s4372_s0, 1024, %s7937_s7, [#allocation6], %s5213_s23, %s5213_s23, %s5214_s24  }
 0xa7f   :  { %5204 = dma.done.wait [#allocation6], 1024  }
 0xa80   :  { %5205 = vsyncadd [#allocation6], 4294966272 }
 0xa81   :  { %5206 = dma.done.wait [#allocation17], 256  }
 0xa82   :  { %5207 = vsyncadd [#allocation17], 4294967040 }
 0xa83   :  { %4407 = vsyncpa [#allocation5], 1 }
 0xa84   :  { %4408 = vsyncpa [#allocation8], 1 }
 0xa85   :  { %4409 = vsyncpa [#allocation11], 1 }
 0xa86   :  { %4410 = vsyncpa [#allocation14], 1 }
 0xa87   :  { %4411 = vsyncpa [#allocation6], 1 }
 0xa88   :  { %4412 = vsyncpa [#allocation17], 1 }

</bundles_post_ra>
